<compile_context>
chip_gen: v5e
topology: v5e:2x2
jax: 0.10.0
libtpu: 0.0.40
codegen_flags: <defaults>
</compile_context>

<pallas_src>
import jax
import jax.numpy as jnp
import numpy as np
from jax.experimental import pallas as pl
from jax.experimental.pallas import tpu as pltpu

EPS = 1e-5


def _vmem_limit_bytes():
    # Generation-aware budget: v5e/v6e have 128 MiB VMEM per TensorCore,
    # v7x only 64 MiB — never claim all of it.  Working set here is < 1 MiB.
    try:
        cap = int(getattr(pltpu.get_tpu_info(), "vmem_capacity_bytes", 0))
    except Exception:
        cap = 0
    if cap <= 0:
        cap = 128 * 1024 * 1024
    return int(min(48 * 1024 * 1024, (cap * 3) // 4))


def _make_kernel(N, C, H, W):
    Hp, Wp = H + 2, W + 2
    NHp = N * Hp
    WpC = Wp * C
    WC = W * C
    inv_m = 1.0 / float(N * H * W)

    def kernel(x_ref, b1_ref, b2_ref, g1_ref, be1_ref, g2_ref, be2_ref,
               t_ref, tt_ref, rmask_ref, out_ref, pb_ref):
        # pb_ref: (NHp + 2, WpC) padded activation slab.  Rows 0 and NHp+1 are
        # permanent guard-zero rows so the dy-shifted matmul operand slices
        # below are always in bounds.
        pb_ref[...] = jnp.zeros((NHp + 2, WpC), jnp.float32)

        # Stage x into the padded slab: one wide lane-contiguous block store
        # per image (interior rows / interior x-columns only; the rest of the
        # slab stays exactly zero and provides the conv "same" padding).
        for n in range(N):
            pb_ref[1 + n * Hp + 1:1 + n * Hp + 1 + H, C:C + WC] = (
                x_ref[n * H:(n + 1) * H, :])

        rmask = rmask_ref[...]   # (NHp, 1): 1.0 on real image rows, 0.0 on pad rows
        t = t_ref[...]           # (C, WpC): per-channel -> lane expansion (masks x-pad cols)
        tt = tt_ref[...]         # (WpC, C): lane -> per-channel reduction (masks x-pad cols)

        def conv(b_ref):
            # 3x3 "same" conv = 3 banded MXU matmuls on padded row slabs.
            acc = jnp.zeros((NHp, WpC), jnp.float32)
            for dy in range(3):
                acc = acc + jnp.dot(pb_ref[dy:dy + NHp, :],
                                    b_ref[dy * WpC:(dy + 1) * WpC, :],
                                    preferred_element_type=jnp.float32)
            return acc

        def bn(y, gamma, beta):
            # Training-mode BatchNorm over the N*H*W interior pixels,
            # two-pass statistics (mean, then centered variance).
            masked = y * rmask
            mean = jnp.dot(jnp.sum(masked, axis=0, keepdims=True), tt,
                           preferred_element_type=jnp.float32) * inv_m      # (1, C)
            mean_lane = jnp.dot(mean, t, preferred_element_type=jnp.float32)
            d = (y - mean_lane) * rmask
            var = jnp.dot(jnp.sum(d * d, axis=0, keepdims=True), tt,
                          preferred_element_type=jnp.float32) * inv_m       # (1, C)
            scale = gamma * jax.lax.rsqrt(var + EPS)                        # (1, C)
            shift = beta - mean * scale                                     # (1, C)
            scale_lane = jnp.dot(scale, t, preferred_element_type=jnp.float32)
            shift_lane = jnp.dot(shift, t, preferred_element_type=jnp.float32)
            return y * scale_lane + shift_lane

        # ---- conv1 -> BN1 -> ReLU (conv bias omitted: exactly cancelled by
        # the batch-mean subtraction of training-mode BN) ----
        y1 = jnp.maximum(bn(conv(b1_ref), g1_ref[...], be1_ref[...]), 0.0)

        # Re-zero the per-image vertical padding rows (x-padding columns are
        # already exact zeros because `t` masks them) and reuse the slab as
        # conv2's padded input: one full-width contiguous store.
        pb_ref[1:1 + NHp, :] = y1 * rmask

        # ---- conv2 -> BN2 (no ReLU) ----
        y2 = bn(conv(b2_ref), g2_ref[...], be2_ref[...])

        # ---- residual add + final ReLU: lane-contiguous per-image stores ----
        for n in range(N):
            res = y2[n * Hp + 1:n * Hp + 1 + H, C:C + WC]
            out_ref[n * H:(n + 1) * H, :] = jnp.maximum(
                x_ref[n * H:(n + 1) * H, :] + res, 0.0)

    return kernel


def residual_block(x_nchw, params):
    N, C, H, W = map(int, x_nchw.shape)
    Hp, Wp = H + 2, W + 2
    WpC, WC, NHp = Wp * C, W * C, N * Hp

    # NCHW -> (N*H, W*C): rows = (n, y), lanes = (x, c).
    x_rows = jnp.transpose(x_nchw.astype(jnp.float32),
                           (0, 2, 3, 1)).reshape(N * H, WC)

    # Banded conv weights: B[dy][(x+dx)*C + ci, (x+1)*C + co] = w[co, ci, dy, dx]
    # (output written at padded x position x+1; x-padding output columns stay 0).
    adj_np = np.zeros((3, Wp, Wp), np.float32)
    for dx in range(3):
        adj_np[dx, dx:dx + W, 1:1 + W] = np.eye(W, dtype=np.float32)
    adj = [jnp.asarray(a) for a in adj_np]

    def band(w_oihw):  # PyTorch Conv2d weight (Cout, Cin, 3, 3)
        w = w_oihw.astype(jnp.float32)
        mats = []
        for dy in range(3):
            m = jnp.zeros((WpC, WpC), jnp.float32)
            for dx in range(3):
                m = m + jnp.kron(adj[dx], jnp.transpose(w[:, :, dy, dx]))
            mats.append(m)
        return jnp.concatenate(mats, axis=0)          # (3*WpC, WpC)

    # Per-channel <-> lane selector (zero on x-padding columns).
    xint = np.zeros((Wp,), np.float32)
    xint[1:1 + W] = 1.0
    t_np = np.kron(xint[None, :], np.eye(C, dtype=np.float32))   # (C, WpC)
    t_mat = jnp.asarray(t_np)
    tt_mat = jnp.asarray(t_np.T)                                 # (WpC, C)

    # Row mask: 1.0 on real image rows, 0.0 on vertical padding rows.
    rm_np = np.zeros((NHp, 1), np.float32)
    for n in range(N):
        rm_np[n * Hp + 1:n * Hp + 1 + H, 0] = 1.0
    rmask = jnp.asarray(rm_np)

    row = lambda v: v.reshape(1, C).astype(jnp.float32)
    args = (x_rows, band(params["w1"]), band(params["w2"]),
            row(params["g1"]), row(params["be1"]),
            row(params["g2"]), row(params["be2"]),
            t_mat, tt_mat, rmask)

    vmem = pl.BlockSpec(memory_space=pltpu.MemorySpace.VMEM)
    flops = 2 * 3 * 2 * NHp * WpC * WpC          # two convs x three banded matmuls
    bytes_accessed = sum(int(a.size) * 4 for a in args) + N * H * WC * 4
    cost = pl.CostEstimate(flops=flops, transcendentals=2 * C,
                           bytes_accessed=bytes_accessed)

    # TODO(synk): for production shapes, tile over N*H row blocks with a grid
    # (halo rows via overlapping index_map), split BN into an accumulate pass +
    # normalize pass, mark the row axis "parallel" (2-TC sharding on v7x) and
    # cast the matmul operands to bf16 with f32 accumulation.  At this toy
    # shape the whole problem is a single < 1 MiB block, so a grid would be
    # pure per-step overhead and per-tile BN stats would be incorrect anyway.
    out = pl.pallas_call(
        _make_kernel(N, C, H, W),
        out_shape=jax.ShapeDtypeStruct((N * H, WC), jnp.float32),
        in_specs=[vmem] * len(args),
        out_specs=vmem,
        scratch_shapes=[pltpu.VMEM((NHp + 2, WpC), jnp.float32)],
        compiler_params=pltpu.CompilerParams(
            vmem_limit_bytes=_vmem_limit_bytes()),
        cost_estimate=cost,
    )(*args)

    return jnp.transpose(out.reshape(N, H, W, C), (0, 3, 1, 2))   # NCHW


def ref_forward(x, p):
    """Pure-JAX reference identical to the PyTorch module forward
    (conv biases included here to demonstrate they have no effect)."""
    dn = ("NCHW", "OIHW", "NCHW")

    def conv(x, w, b):
        y = jax.lax.conv_general_dilated(x, w, (1, 1), "SAME",
                                         dimension_numbers=dn,
                                         precision=jax.lax.Precision.HIGHEST)
        return y + b[None, :, None, None]

    def bn(y, g, b):
        m = jnp.mean(y, axis=(0, 2, 3), keepdims=True)
        v = jnp.mean((y - m) ** 2, axis=(0, 2, 3), keepdims=True)
        return (y - m) / jnp.sqrt(v + EPS) * g[None, :, None, None] \
            + b[None, :, None, None]

    y = jax.nn.relu(bn(conv(x, p["w1"], p["b1"]), p["g1"], p["be1"]))
    y = bn(conv(y, p["w2"], p["b2"]), p["g2"], p["be2"])
    return jax.nn.relu(x + y)


if __name__ == "__main__":
    # Pin full-precision matmuls so kernel and reference agree to f32 accuracy.
    jax.config.update("jax_default_matmul_precision", "highest")

    key = jax.random.PRNGKey(0)
    k0, k1, k2 = jax.random.split(key, 3)

    N, C, H, W = 2, 4, 16, 16
    x = jax.random.normal(k2, (N, C, H, W), jnp.float32)

    params = {
        "w1": jax.random.normal(k0, (C, C, 3, 3), jnp.float32) * 0.1,
        "b1": jnp.linspace(-0.1, 0.1, C, dtype=jnp.float32),
        "g1": 1.0 + 0.05 * jnp.arange(C, dtype=jnp.float32),
        "be1": 0.02 * jnp.arange(C, dtype=jnp.float32),
        "w2": jax.random.normal(k1, (C, C, 3, 3), jnp.float32) * 0.1,
        "b2": jnp.linspace(0.1, -0.1, C, dtype=jnp.float32),
        "g2": 1.0 - 0.03 * jnp.arange(C, dtype=jnp.float32),
        "be2": -0.01 * jnp.arange(C, dtype=jnp.float32),
    }

    out = jax.block_until_ready(residual_block(x, params))
    ref = jax.block_until_ready(ref_forward(x, params))

    assert out.shape == (N, C, H, W)
    np.testing.assert_allclose(np.asarray(out), np.asarray(ref),
                               rtol=1e-4, atol=1e-4)
    print("KERNEL_OK")
</pallas_src>

<mosaic_0001>
module attributes {stable_mosaic.version = 11 : i64} {
  func.func @kernel(%arg0: memref<32x64xf32, #tpu.memory_space<vmem>>, %arg1: memref<216x72xf32, #tpu.memory_space<vmem>>, %arg2: memref<216x72xf32, #tpu.memory_space<vmem>>, %arg3: memref<1x4xf32, #tpu.memory_space<vmem>>, %arg4: memref<1x4xf32, #tpu.memory_space<vmem>>, %arg5: memref<1x4xf32, #tpu.memory_space<vmem>>, %arg6: memref<1x4xf32, #tpu.memory_space<vmem>>, %arg7: memref<4x72xf32, #tpu.memory_space<vmem>>, %arg8: memref<72x4xf32, #tpu.memory_space<vmem>>, %arg9: memref<36x1xf32, #tpu.memory_space<vmem>>, %arg10: memref<32x64xf32, #tpu.memory_space<vmem>>, %arg11: memref<38x72xf32, #tpu.memory_space<vmem>>) attributes {dimension_semantics = [], scalar_prefetch = 0 : i64, scratch_operands = 1 : i64, tpu.core_type = #tpu.core_type<tc>} {
    %cst = arith.constant 0.000000e+00 : f32
    %0 = vector.broadcast %cst : f32 to vector<38x72xf32>
    %c0 = arith.constant 0 : index
    %c0_0 = arith.constant 0 : index
    %1 = vector.load %arg11[%c0, %c0_0] : memref<38x72xf32, #tpu.memory_space<vmem>>, vector<38x72xf32>
    tpu.vector_store %arg11[%c0, %c0_0], %0 {strides = array<i32>} : memref<38x72xf32, #tpu.memory_space<vmem>>, vector<38x72xf32>,
    %c0_1 = arith.constant 0 : index
    %c0_2 = arith.constant 0 : index
    %2 = vector.load %arg0[%c0_1, %c0_2] : memref<32x64xf32, #tpu.memory_space<vmem>>, vector<16x64xf32>
    %c2 = arith.constant 2 : index
    %c4 = arith.constant 4 : index
    %3 = vector.load %arg11[%c2, %c4] : memref<38x72xf32, #tpu.memory_space<vmem>>, vector<16x64xf32>
    tpu.vector_store %arg11[%c2, %c4], %2 {strides = array<i32>} : memref<38x72xf32, #tpu.memory_space<vmem>>, vector<16x64xf32>,
    %c16 = arith.constant 16 : index
    %c0_3 = arith.constant 0 : index
    %4 = vector.load %arg0[%c16, %c0_3] : memref<32x64xf32, #tpu.memory_space<vmem>>, vector<16x64xf32>
    %c20 = arith.constant 20 : index
    %c4_4 = arith.constant 4 : index
    %5 = vector.load %arg11[%c20, %c4_4] : memref<38x72xf32, #tpu.memory_space<vmem>>, vector<16x64xf32>
    tpu.vector_store %arg11[%c20, %c4_4], %4 {strides = array<i32>} : memref<38x72xf32, #tpu.memory_space<vmem>>, vector<16x64xf32>,
    %c0_5 = arith.constant 0 : index
    %c0_6 = arith.constant 0 : index
    %6 = vector.load %arg9[%c0_5, %c0_6] : memref<36x1xf32, #tpu.memory_space<vmem>>, vector<36x1xf32>
    %c0_7 = arith.constant 0 : index
    %c0_8 = arith.constant 0 : index
    %7 = vector.load %arg7[%c0_7, %c0_8] : memref<4x72xf32, #tpu.memory_space<vmem>>, vector<4x72xf32>
    %c0_9 = arith.constant 0 : index
    %c0_10 = arith.constant 0 : index
    %8 = vector.load %arg8[%c0_9, %c0_10] : memref<72x4xf32, #tpu.memory_space<vmem>>, vector<72x4xf32>
    %cst_11 = arith.constant 0.000000e+00 : f32
    %9 = vector.broadcast %cst_11 : f32 to vector<36x72xf32>
    %c0_12 = arith.constant 0 : index
    %c0_13 = arith.constant 0 : index
    %10 = vector.load %arg11[%c0_12, %c0_13] : memref<38x72xf32, #tpu.memory_space<vmem>>, vector<36x72xf32>
    %c0_14 = arith.constant 0 : index
    %c0_15 = arith.constant 0 : index
    %11 = vector.load %arg1[%c0_14, %c0_15] : memref<216x72xf32, #tpu.memory_space<vmem>>, vector<72x72xf32>
    %cst_16 = arith.constant dense<0.000000e+00> : vector<36x72xf32>
    %12 = tpu.matmul %10, %11, %cst_16 {dimension_numbers = #tpu.dot_dimension_numbers<[1], [0], [0], [1], [0, 0, 1, 1], [], []>, precision = #tpu.contract_precision<fp32>} : vector<36x72xf32>, vector<72x72xf32>, vector<36x72xf32> -> vector<36x72xf32>
    %13 = arith.addf %9, %12 : vector<36x72xf32>
    %c1 = arith.constant 1 : index
    %c0_17 = arith.constant 0 : index
    %14 = vector.load %arg11[%c1, %c0_17] : memref<38x72xf32, #tpu.memory_space<vmem>>, vector<36x72xf32>
    %c72 = arith.constant 72 : index
    %c0_18 = arith.constant 0 : index
    %15 = vector.load %arg1[%c72, %c0_18] : memref<216x72xf32, #tpu.memory_space<vmem>>, vector<72x72xf32>
    %cst_19 = arith.constant dense<0.000000e+00> : vector<36x72xf32>
    %16 = tpu.matmul %14, %15, %cst_19 {dimension_numbers = #tpu.dot_dimension_numbers<[1], [0], [0], [1], [0, 0, 1, 1], [], []>, precision = #tpu.contract_precision<fp32>} : vector<36x72xf32>, vector<72x72xf32>, vector<36x72xf32> -> vector<36x72xf32>
    %17 = arith.addf %13, %16 : vector<36x72xf32>
    %c2_20 = arith.constant 2 : index
    %c0_21 = arith.constant 0 : index
    %18 = vector.load %arg11[%c2_20, %c0_21] : memref<38x72xf32, #tpu.memory_space<vmem>>, vector<36x72xf32>
    %c144 = arith.constant 144 : index
    %c0_22 = arith.constant 0 : index
    %19 = vector.load %arg1[%c144, %c0_22] : memref<216x72xf32, #tpu.memory_space<vmem>>, vector<72x72xf32>
    %cst_23 = arith.constant dense<0.000000e+00> : vector<36x72xf32>
    %20 = tpu.matmul %18, %19, %cst_23 {dimension_numbers = #tpu.dot_dimension_numbers<[1], [0], [0], [1], [0, 0, 1, 1], [], []>, precision = #tpu.contract_precision<fp32>} : vector<36x72xf32>, vector<72x72xf32>, vector<36x72xf32> -> vector<36x72xf32>
    %21 = arith.addf %17, %20 : vector<36x72xf32>
    %c0_24 = arith.constant 0 : index
    %c0_25 = arith.constant 0 : index
    %22 = vector.load %arg3[%c0_24, %c0_25] : memref<1x4xf32, #tpu.memory_space<vmem>>, vector<1x4xf32>
    %c0_26 = arith.constant 0 : index
    %c0_27 = arith.constant 0 : index
    %23 = vector.load %arg4[%c0_26, %c0_27] : memref<1x4xf32, #tpu.memory_space<vmem>>, vector<1x4xf32>
    %24 = vector.broadcast %6 : vector<36x1xf32> to vector<36x72xf32>
    %25 = arith.mulf %21, %24 : vector<36x72xf32>
    %cst_28 = arith.constant dense<0.000000e+00> : vector<72xf32>
    %26 = vector.multi_reduction <add>, %25, %cst_28 [0] : vector<36x72xf32> to vector<72xf32>
    %27 = vector.shape_cast %26 : vector<72xf32> to vector<1x72xf32>
    %cst_29 = arith.constant dense<0.000000e+00> : vector<1x4xf32>
    %28 = tpu.matmul %27, %8, %cst_29 {dimension_numbers = #tpu.dot_dimension_numbers<[1], [0], [0], [1], [0, 0, 1, 1], [], []>, precision = #tpu.contract_precision<fp32>} : vector<1x72xf32>, vector<72x4xf32>, vector<1x4xf32> -> vector<1x4xf32>
    %cst_30 = arith.constant 0.001953125 : f32
    %29 = vector.broadcast %cst_30 : f32 to vector<1x4xf32>
    %30 = arith.mulf %28, %29 : vector<1x4xf32>
    %cst_31 = arith.constant dense<0.000000e+00> : vector<1x72xf32>
    %31 = tpu.matmul %30, %7, %cst_31 {dimension_numbers = #tpu.dot_dimension_numbers<[1], [0], [0], [1], [0, 0, 1, 1], [], []>, precision = #tpu.contract_precision<fp32>} : vector<1x4xf32>, vector<4x72xf32>, vector<1x72xf32> -> vector<1x72xf32>
    %32 = vector.broadcast %31 : vector<1x72xf32> to vector<36x72xf32>
    %33 = arith.subf %21, %32 : vector<36x72xf32>
    %34 = vector.broadcast %6 : vector<36x1xf32> to vector<36x72xf32>
    %35 = arith.mulf %33, %34 : vector<36x72xf32>
    %36 = arith.mulf %35, %35 : vector<36x72xf32>
    %cst_32 = arith.constant dense<0.000000e+00> : vector<72xf32>
    %37 = vector.multi_reduction <add>, %36, %cst_32 [0] : vector<36x72xf32> to vector<72xf32>
    %38 = vector.shape_cast %37 : vector<72xf32> to vector<1x72xf32>
    %cst_33 = arith.constant dense<0.000000e+00> : vector<1x4xf32>
    %39 = tpu.matmul %38, %8, %cst_33 {dimension_numbers = #tpu.dot_dimension_numbers<[1], [0], [0], [1], [0, 0, 1, 1], [], []>, precision = #tpu.contract_precision<fp32>} : vector<1x72xf32>, vector<72x4xf32>, vector<1x4xf32> -> vector<1x4xf32>
    %cst_34 = arith.constant 0.001953125 : f32
    %40 = vector.broadcast %cst_34 : f32 to vector<1x4xf32>
    %41 = arith.mulf %39, %40 : vector<1x4xf32>
    %cst_35 = arith.constant 9.99999974E-6 : f32
    %42 = vector.broadcast %cst_35 : f32 to vector<1x4xf32>
    %43 = arith.addf %41, %42 : vector<1x4xf32>
    %44 = math.rsqrt %43 : vector<1x4xf32>
    %45 = arith.mulf %22, %44 : vector<1x4xf32>
    %46 = arith.mulf %30, %45 : vector<1x4xf32>
    %47 = arith.subf %23, %46 : vector<1x4xf32>
    %cst_36 = arith.constant dense<0.000000e+00> : vector<1x72xf32>
    %48 = tpu.matmul %45, %7, %cst_36 {dimension_numbers = #tpu.dot_dimension_numbers<[1], [0], [0], [1], [0, 0, 1, 1], [], []>, precision = #tpu.contract_precision<fp32>} : vector<1x4xf32>, vector<4x72xf32>, vector<1x72xf32> -> vector<1x72xf32>
    %cst_37 = arith.constant dense<0.000000e+00> : vector<1x72xf32>
    %49 = tpu.matmul %47, %7, %cst_37 {dimension_numbers = #tpu.dot_dimension_numbers<[1], [0], [0], [1], [0, 0, 1, 1], [], []>, precision = #tpu.contract_precision<fp32>} : vector<1x4xf32>, vector<4x72xf32>, vector<1x72xf32> -> vector<1x72xf32>
    %50 = vector.broadcast %48 : vector<1x72xf32> to vector<36x72xf32>
    %51 = arith.mulf %21, %50 : vector<36x72xf32>
    %52 = vector.broadcast %49 : vector<1x72xf32> to vector<36x72xf32>
    %53 = arith.addf %51, %52 : vector<36x72xf32>
    %cst_38 = arith.constant 0.000000e+00 : f32
    %54 = vector.broadcast %cst_38 : f32 to vector<36x72xf32>
    %55 = arith.maximumf %53, %54 : vector<36x72xf32>
    %56 = vector.broadcast %6 : vector<36x1xf32> to vector<36x72xf32>
    %57 = arith.mulf %55, %56 : vector<36x72xf32>
    %c1_39 = arith.constant 1 : index
    %c0_40 = arith.constant 0 : index
    %58 = vector.load %arg11[%c1_39, %c0_40] : memref<38x72xf32, #tpu.memory_space<vmem>>, vector<36x72xf32>
    tpu.vector_store %arg11[%c1_39, %c0_40], %57 {strides = array<i32>} : memref<38x72xf32, #tpu.memory_space<vmem>>, vector<36x72xf32>,
    %cst_41 = arith.constant 0.000000e+00 : f32
    %59 = vector.broadcast %cst_41 : f32 to vector<36x72xf32>
    %c0_42 = arith.constant 0 : index
    %c0_43 = arith.constant 0 : index
    %60 = vector.load %arg11[%c0_42, %c0_43] : memref<38x72xf32, #tpu.memory_space<vmem>>, vector<36x72xf32>
    %c0_44 = arith.constant 0 : index
    %c0_45 = arith.constant 0 : index
    %61 = vector.load %arg2[%c0_44, %c0_45] : memref<216x72xf32, #tpu.memory_space<vmem>>, vector<72x72xf32>
    %cst_46 = arith.constant dense<0.000000e+00> : vector<36x72xf32>
    %62 = tpu.matmul %60, %61, %cst_46 {dimension_numbers = #tpu.dot_dimension_numbers<[1], [0], [0], [1], [0, 0, 1, 1], [], []>, precision = #tpu.contract_precision<fp32>} : vector<36x72xf32>, vector<72x72xf32>, vector<36x72xf32> -> vector<36x72xf32>
    %63 = arith.addf %59, %62 : vector<36x72xf32>
    %c1_47 = arith.constant 1 : index
    %c0_48 = arith.constant 0 : index
    %64 = vector.load %arg11[%c1_47, %c0_48] : memref<38x72xf32, #tpu.memory_space<vmem>>, vector<36x72xf32>
    %c72_49 = arith.constant 72 : index
    %c0_50 = arith.constant 0 : index
    %65 = vector.load %arg2[%c72_49, %c0_50] : memref<216x72xf32, #tpu.memory_space<vmem>>, vector<72x72xf32>
    %cst_51 = arith.constant dense<0.000000e+00> : vector<36x72xf32>
    %66 = tpu.matmul %64, %65, %cst_51 {dimension_numbers = #tpu.dot_dimension_numbers<[1], [0], [0], [1], [0, 0, 1, 1], [], []>, precision = #tpu.contract_precision<fp32>} : vector<36x72xf32>, vector<72x72xf32>, vector<36x72xf32> -> vector<36x72xf32>
    %67 = arith.addf %63, %66 : vector<36x72xf32>
    %c2_52 = arith.constant 2 : index
    %c0_53 = arith.constant 0 : index
    %68 = vector.load %arg11[%c2_52, %c0_53] : memref<38x72xf32, #tpu.memory_space<vmem>>, vector<36x72xf32>
    %c144_54 = arith.constant 144 : index
    %c0_55 = arith.constant 0 : index
    %69 = vector.load %arg2[%c144_54, %c0_55] : memref<216x72xf32, #tpu.memory_space<vmem>>, vector<72x72xf32>
    %cst_56 = arith.constant dense<0.000000e+00> : vector<36x72xf32>
    %70 = tpu.matmul %68, %69, %cst_56 {dimension_numbers = #tpu.dot_dimension_numbers<[1], [0], [0], [1], [0, 0, 1, 1], [], []>, precision = #tpu.contract_precision<fp32>} : vector<36x72xf32>, vector<72x72xf32>, vector<36x72xf32> -> vector<36x72xf32>
    %71 = arith.addf %67, %70 : vector<36x72xf32>
    %c0_57 = arith.constant 0 : index
    %c0_58 = arith.constant 0 : index
    %72 = vector.load %arg5[%c0_57, %c0_58] : memref<1x4xf32, #tpu.memory_space<vmem>>, vector<1x4xf32>
    %c0_59 = arith.constant 0 : index
    %c0_60 = arith.constant 0 : index
    %73 = vector.load %arg6[%c0_59, %c0_60] : memref<1x4xf32, #tpu.memory_space<vmem>>, vector<1x4xf32>
    %74 = vector.broadcast %6 : vector<36x1xf32> to vector<36x72xf32>
    %75 = arith.mulf %71, %74 : vector<36x72xf32>
    %cst_61 = arith.constant dense<0.000000e+00> : vector<72xf32>
    %76 = vector.multi_reduction <add>, %75, %cst_61 [0] : vector<36x72xf32> to vector<72xf32>
    %77 = vector.shape_cast %76 : vector<72xf32> to vector<1x72xf32>
    %cst_62 = arith.constant dense<0.000000e+00> : vector<1x4xf32>
    %78 = tpu.matmul %77, %8, %cst_62 {dimension_numbers = #tpu.dot_dimension_numbers<[1], [0], [0], [1], [0, 0, 1, 1], [], []>, precision = #tpu.contract_precision<fp32>} : vector<1x72xf32>, vector<72x4xf32>, vector<1x4xf32> -> vector<1x4xf32>
    %cst_63 = arith.constant 0.001953125 : f32
    %79 = vector.broadcast %cst_63 : f32 to vector<1x4xf32>
    %80 = arith.mulf %78, %79 : vector<1x4xf32>
    %cst_64 = arith.constant dense<0.000000e+00> : vector<1x72xf32>
    %81 = tpu.matmul %80, %7, %cst_64 {dimension_numbers = #tpu.dot_dimension_numbers<[1], [0], [0], [1], [0, 0, 1, 1], [], []>, precision = #tpu.contract_precision<fp32>} : vector<1x4xf32>, vector<4x72xf32>, vector<1x72xf32> -> vector<1x72xf32>
    %82 = vector.broadcast %81 : vector<1x72xf32> to vector<36x72xf32>
    %83 = arith.subf %71, %82 : vector<36x72xf32>
    %84 = vector.broadcast %6 : vector<36x1xf32> to vector<36x72xf32>
    %85 = arith.mulf %83, %84 : vector<36x72xf32>
    %86 = arith.mulf %85, %85 : vector<36x72xf32>
    %cst_65 = arith.constant dense<0.000000e+00> : vector<72xf32>
    %87 = vector.multi_reduction <add>, %86, %cst_65 [0] : vector<36x72xf32> to vector<72xf32>
    %88 = vector.shape_cast %87 : vector<72xf32> to vector<1x72xf32>
    %cst_66 = arith.constant dense<0.000000e+00> : vector<1x4xf32>
    %89 = tpu.matmul %88, %8, %cst_66 {dimension_numbers = #tpu.dot_dimension_numbers<[1], [0], [0], [1], [0, 0, 1, 1], [], []>, precision = #tpu.contract_precision<fp32>} : vector<1x72xf32>, vector<72x4xf32>, vector<1x4xf32> -> vector<1x4xf32>
    %cst_67 = arith.constant 0.001953125 : f32
    %90 = vector.broadcast %cst_67 : f32 to vector<1x4xf32>
    %91 = arith.mulf %89, %90 : vector<1x4xf32>
    %cst_68 = arith.constant 9.99999974E-6 : f32
    %92 = vector.broadcast %cst_68 : f32 to vector<1x4xf32>
    %93 = arith.addf %91, %92 : vector<1x4xf32>
    %94 = math.rsqrt %93 : vector<1x4xf32>
    %95 = arith.mulf %72, %94 : vector<1x4xf32>
    %96 = arith.mulf %80, %95 : vector<1x4xf32>
    %97 = arith.subf %73, %96 : vector<1x4xf32>
    %cst_69 = arith.constant dense<0.000000e+00> : vector<1x72xf32>
    %98 = tpu.matmul %95, %7, %cst_69 {dimension_numbers = #tpu.dot_dimension_numbers<[1], [0], [0], [1], [0, 0, 1, 1], [], []>, precision = #tpu.contract_precision<fp32>} : vector<1x4xf32>, vector<4x72xf32>, vector<1x72xf32> -> vector<1x72xf32>
    %cst_70 = arith.constant dense<0.000000e+00> : vector<1x72xf32>
    %99 = tpu.matmul %97, %7, %cst_70 {dimension_numbers = #tpu.dot_dimension_numbers<[1], [0], [0], [1], [0, 0, 1, 1], [], []>, precision = #tpu.contract_precision<fp32>} : vector<1x4xf32>, vector<4x72xf32>, vector<1x72xf32> -> vector<1x72xf32>
    %100 = vector.broadcast %98 : vector<1x72xf32> to vector<36x72xf32>
    %101 = arith.mulf %71, %100 : vector<36x72xf32>
    %102 = vector.broadcast %99 : vector<1x72xf32> to vector<36x72xf32>
    %103 = arith.addf %101, %102 : vector<36x72xf32>
    %104 = vector.extract_strided_slice %103 {offsets = [1, 4], sizes = [16, 64], strides = [1, 1]} : vector<36x72xf32> to vector<16x64xf32>
    %c0_71 = arith.constant 0 : index
    %c0_72 = arith.constant 0 : index
    %105 = vector.load %arg0[%c0_71, %c0_72] : memref<32x64xf32, #tpu.memory_space<vmem>>, vector<16x64xf32>
    %106 = arith.addf %105, %104 : vector<16x64xf32>
    %cst_73 = arith.constant 0.000000e+00 : f32
    %107 = vector.broadcast %cst_73 : f32 to vector<16x64xf32>
    %108 = arith.maximumf %106, %107 : vector<16x64xf32>
    %c0_74 = arith.constant 0 : index
    %c0_75 = arith.constant 0 : index
    %109 = vector.load %arg10[%c0_74, %c0_75] : memref<32x64xf32, #tpu.memory_space<vmem>>, vector<16x64xf32>
    tpu.vector_store %arg10[%c0_74, %c0_75], %108 {strides = array<i32>} : memref<32x64xf32, #tpu.memory_space<vmem>>, vector<16x64xf32>,
    %110 = vector.extract_strided_slice %103 {offsets = [19, 4], sizes = [16, 64], strides = [1, 1]} : vector<36x72xf32> to vector<16x64xf32>
    %c16_76 = arith.constant 16 : index
    %c0_77 = arith.constant 0 : index
    %111 = vector.load %arg0[%c16_76, %c0_77] : memref<32x64xf32, #tpu.memory_space<vmem>>, vector<16x64xf32>
    %112 = arith.addf %111, %110 : vector<16x64xf32>
    %cst_78 = arith.constant 0.000000e+00 : f32
    %113 = vector.broadcast %cst_78 : f32 to vector<16x64xf32>
    %114 = arith.maximumf %112, %113 : vector<16x64xf32>
    %c16_79 = arith.constant 16 : index
    %c0_80 = arith.constant 0 : index
    %115 = vector.load %arg10[%c16_79, %c0_80] : memref<32x64xf32, #tpu.memory_space<vmem>>, vector<16x64xf32>
    tpu.vector_store %arg10[%c16_79, %c0_80], %114 {strides = array<i32>} : memref<32x64xf32, #tpu.memory_space<vmem>>, vector<16x64xf32>,
    return
  }
}

</mosaic_0001>

<bundles_post_ra>
// kernel: tpu_custom_call.1
= control target key start
LH: loop header
LB: loop body
LE: loop exit
PB: predicated region body
PF: predicated region fallthrough
CT: control target
= control target key end

     0   :  { %s4729_s17 = smov 4   ;;  %s6786_s0 = inlined_call_operand.vmem [shape: f32[32,64], index: 0, kind: input, shape index: {}]   ;;  %s6787_s1 = inlined_call_operand.vmem [shape: f32[216,72], index: 1, kind: input, shape index: {}]   ;;  %s6788_s2 = inlined_call_operand.vmem [shape: f32[216,72], index: 2, kind: input, shape index: {}]   ;;  %s6789_s3 = inlined_call_operand.vmem [shape: f32[1,4], index: 3, kind: input, shape index: {}]   ;;  %s6790_s4 = inlined_call_operand.vmem [shape: f32[1,4], index: 4, kind: input, shape index: {}]   ;;  %s6791_s5 = inlined_call_operand.vmem [shape: f32[1,4], index: 5, kind: input, shape index: {}]   ;;  %s6792_s6 = inlined_call_operand.vmem [shape: f32[1,4], index: 6, kind: input, shape index: {}]   ;;  %s6793_s7 = inlined_call_operand.vmem [shape: f32[4,72], index: 7, kind: input, shape index: {}]   ;;  %s6794_s8 = inlined_call_operand.vmem [shape: f32[72,4], index: 8, kind: input, shape index: {}]   ;;  %s6795_s9 = inlined_call_operand.vmem [shape: f32[36,1], index: 9, kind: input, shape index: {}]   ;;  %s6796_s10 = inlined_call_operand.hbm [shape: f32[32,64], index: 10, kind: output, shape index: {}]  }
   0x1   :  { %v43_v0 = vld [vmem:[%s6786_s0] sm:$0xff]  ;;  %v56_v1 = vld [vmem:[%s6786_s0 + $0x10] sm:$0xff]  ;;  %v110_v2 = vld [vmem:[%s6787_s1 + $0x88] sm:$0xff] }
   0x2   :  { %47 = vrot.lane.b32.xlu0 %v43_v0, %s4729_s17  ;;  %60 = vrot.lane.b32.xlu1 %v56_v1, %s4729_s17  ;;  %v4800_v3 = vand.u32 4294901760, %v110_v2  ;;  %v109_v4 = vld [vmem:[%s6787_s1 + $0x80] sm:$0xff]  ;;  %v108_v5 = vld [vmem:[%s6787_s1 + $0x78] sm:$0xff] }
   0x3   :  { %15 = vsyncpa [#allocation4], 0  ;;  %v4808_v6 = vand.u32 4294901760, %v109_v4  ;;  %v4810_v7 = vand.u32 4294901760, %v108_v5  ;;  %v44_v11 = vld [vmem:[%s6786_s0 + $0x8] sm:$0xff]  ;;  %v57_v12 = vld [vmem:[%s6786_s0 + $0x18] sm:$0xff] }
   0x4   :  { %v4813_v8 = vsub.f32 %v110_v2, %v4800_v3  ;;  %342 = vmatpush.msra.mxu3 %v4800_v3  ;;  %134 = vmatpush.msra.mxu0 %v4800_v3  ;;  %v107_v22 = vld [vmem:[%s6787_s1 + $0x70] sm:$0xff]  ;;  %v106_v24 = vld [vmem:[%s6787_s1 + $0x68] sm:$0xff]  ;;  %v105_v27 = vld [vmem:[%s6787_s1 + $0x60] sm:$0xff]  ;;  %vm36_vm0 = vcmask 588800   ;;  %v4730_v39 = vmov 0.0   ;;  %vm41_vm1 = vcmask 586752  }
   0x5   :  { %v4818_v9 = vsub.f32 %v109_v4, %v4808_v6  ;;  %v4821_v10 = vsub.f32 %v108_v5, %v4810_v7  ;;  %v4851_v23 = vand.u32 4294901760, %v107_v22  ;;  %v4859_v26 = vand.u32 4294901760, %v106_v24  ;;  %v104_v31 = vld [vmem:[%s6787_s1 + $0x58] sm:$0xff]  ;;  %v103_v36 = vld [vmem:[%s6787_s1 + $0x50] sm:$0xff]  ;;  %37 = vst.msk [vmem:[#allocation2] sm:$0xff] %vm36_vm0, %v4730_v39  ;;  %v102_v43 = vld [vmem:[%s6787_s1 + $0x48] sm:$0xff] }
   0x6   :  { %v201_v13 = vand.u32 4294901760, %v4813_v8  ;;  %283 = vmatpush.msra.mxu2 %v4813_v8  ;;  %344 = vmatpush.msra.mxu3 %v4808_v6  ;;  %v4871_v30 = vand.u32 4294901760, %v105_v27  ;;  %v4884_v35 = vand.u32 4294901760, %v104_v31  ;;  %v147_v42 = vand.u32 4294901760, %v103_v36  ;;  %38 = vst.msk [vmem:[#allocation2 + $0x8] sm:$0xff] %vm36_vm0, %v4730_v39  ;;  %v96_v59 = vld [vmem:[%s6787_s1 + $0x40] sm:$0xff] }
   0x7   :  { %v207_v14 = vand.u32 4294901760, %v4818_v9  ;;  %v213_v15 = vand.u32 4294901760, %v4821_v10  ;;  %136 = vmatpush.msra.mxu0 %v4808_v6  ;;  %v4857_v25 = vsub.f32 %v107_v22, %v4851_v23  ;;  %v4868_v29 = vsub.f32 %v106_v24, %v4859_v26  ;;  %39 = vst.msk [vmem:[#allocation2 + $0x10] sm:$0xff] %vm36_vm0, %v4730_v39  ;;  %v95_v61 = vld [vmem:[%s6787_s1 + $0x38] sm:$0xff]  ;;  %v94_v2 = vld [vmem:[%s6787_s1 + $0x30] sm:$0xff]  ;;  %s4733_s14 = smov [#allocation3]  }
   0x8   :  { %v202_v16 = vsub.f32 %v4813_v8, %v201_v13  ;;  %286 = vmatpush.msra.mxu2 %v4818_v9  ;;  %346 = vmatpush.msra.mxu3 %v4810_v7  ;;  %v230_v34 = vsub.f32 %v105_v27, %v4871_v30  ;;  %v236_v41 = vsub.f32 %v104_v31, %v4884_v35  ;;  %v149_v45 = vand.u32 4294901760, %v102_v43  ;;  %s4675_s15 = sshll.u32 %s4733_s14, 4  ;;  %s4734_s18 = smov 128   ;;  %s4676_s15 = int_to_ptr.vmem [resolvable:$true] %s4675_s15 }
   0x9   :  { %v208_v17 = vsub.f32 %v4818_v9, %v207_v14  ;;  %v214_v18 = vsub.f32 %v4821_v10, %v213_v15  ;;  %138 = vmatpush.msra.mxu0 %v4810_v7  ;;  %v219_v28 = vand.u32 4294901760, %v4857_v25  ;;  %v225_v33 = vand.u32 4294901760, %v4868_v29  ;;  %40 = vst.msk [vmem:[#allocation2 + $0x18] sm:$0xff] %vm36_vm0, %v4730_v39  ;;  %s4735_s19 = smov 8  }
   0xa   :  { %49 = vrot.lane.b32.xlu0 %v44_v11, %s4729_s17  ;;  %62 = vrot.lane.b32.xlu1 %v57_v12, %s4729_s17  ;;  %v203_v19 = vand.u32 4294901760, %v202_v16  ;;  %v231_v40 = vand.u32 4294901760, %v230_v34  ;;  %v237_v47 = vand.u32 4294901760, %v236_v41  ;;  %v242_v48 = vsub.f32 %v103_v36, %v147_v42  ;;  %42 = vst.msk [vmem:[#allocation2 + $0x20] sm:$0x3f] %vm41_vm1, %v4730_v39  ;;  %v92_v11 = vld [vmem:[%s6787_s1 + $0x20] sm:$0xff] }
   0xb   :  { %289 = vmatpush.msra.mxu2 %v4821_v10  ;;  %v209_v20 = vand.u32 4294901760, %v208_v17  ;;  %v215_v21 = vand.u32 4294901760, %v214_v18  ;;  %348 = vmatpush.msra.mxu3 %v4851_v23  ;;  %v220_v32 = vsub.f32 %v4857_v25, %v219_v28  ;;  %v226_v38 = vsub.f32 %v4868_v29, %v225_v33  ;;  %v91_v17 = vld [vmem:[%s6787_s1 + $0x18] sm:$0xff]  ;;  %s4677_s17 = sshll.u32 %s6796_s10, 4  ;;  %s4678_s17 = int_to_ptr.hbm [resolvable:$true] %s4677_s17 }
   0xc   :  { %204 = vmatpush.msra.mxu1 %v203_v19  ;;  %140 = vmatpush.msra.mxu0 %v4851_v23  ;;  %v232_v46 = vsub.f32 %v230_v34, %v231_v40  ;;  %v248_v49 = vsub.f32 %v102_v43, %v149_v45  ;;  %v238_v51 = vsub.f32 %v236_v41, %v237_v47  ;;  %v243_v52 = vand.u32 4294901760, %v242_v48 }
   0xd   :  { %292 = vmatpush.msra.mxu2 %v4857_v25  ;;  %350 = vmatpush.msra.mxu3 %v4859_v26  ;;  %v221_v37 = vand.u32 4294901760, %v220_v32  ;;  %v227_v44 = vand.u32 4294901760, %v226_v38  ;;  %v4920_v60 = vand.u32 4294901760, %v96_v59  ;;  %vm53_vm2 = vcmask 556064  }
   0xe   :  { %210 = vmatpush.msra.mxu1 %v209_v20  ;;  %142 = vmatpush.msra.mxu0 %v4859_v26  ;;  %v233_v50 = vand.u32 4294901760, %v232_v46  ;;  %v249_v53 = vand.u32 4294901760, %v248_v49  ;;  %v239_v54 = vand.u32 4294901760, %v238_v51  ;;  %v244_v55 = vsub.f32 %v242_v48, %v243_v52 }
   0xf   :  { %295 = vmatpush.msra.mxu2 %v4868_v29  ;;  %352 = vmatpush.msra.mxu3 %v4871_v30  ;;  %v4926_v62 = vand.u32 4294901760, %v95_v61  ;;  %v4929_v63 = vsub.f32 %v96_v59, %v4920_v60  ;;  %v4937_v4 = vand.u32 4294901760, %v94_v2  ;;  %v4976_v20 = vand.u32 4294901760, %v91_v17 }
  0x10   :  { %216 = vmatpush.msra.mxu1 %v215_v21  ;;  %144 = vmatpush.msra.mxu0 %v4871_v30  ;;  %v250_v56 = vsub.f32 %v248_v49, %v249_v53  ;;  %v245_v57 = vand.u32 4294901760, %v244_v55  ;;  %vm1336_vm3 = vcmask 584704   ;;  %vm1603_vm4 = vcmask 1043456  }
  0x11   :  { %298 = vmatpush.msra.mxu2 %v230_v34  ;;  %354 = vmatpush.msra.mxu3 %v4884_v35  ;;  %v4940_v5 = vsub.f32 %v95_v61, %v4926_v62  ;;  %v4954_v10 = vsub.f32 %v94_v2, %v4937_v4  ;;  %v89_v34 = vld [vmem:[%s6787_s1 + $0x8] sm:$0xff]  ;;  %vm1599_vm5 = vcmask 31744   ;;  %vm4653_vm12 = vcmask 1044480  }
  0x12   :  { %146 = vmatpush.msra.mxu0 %v4884_v35  ;;  %222 = vmatpush.msra.mxu1 %v221_v37  ;;  %v251_v58 = vand.u32 4294901760, %v250_v56  ;;  %v5007_v36 = vand.u32 4294901760, %v89_v34  ;;  %vm4630_vm13 = vcmask 1046528   ;;  %vm4646_vm14 = vcmask 523264  }
  0x13   :  { %301 = vmatpush.msra.mxu2 %v236_v41  ;;  %356 = vmatpush.msra.mxu3 %v147_v42  ;;  %v596_v8 = vand.u32 4294901760, %v4940_v5  ;;  %v88_v41 = vld [vmem:[%s6787_s1] sm:$0xff] }
  0x14   :  { %228 = vmatpush.msra.mxu1 %v227_v44  ;;  %148 = vmatpush.msra.mxu0 %v147_v42  ;;  %v5020_v44 = vand.u32 4294901760, %v88_v41 }
  0x15   :  { %304 = vmatpush.msra.mxu2 %v242_v48  ;;  %358 = vmatpush.msra.mxu3 %v149_v45 }
  0x16   :  { %150 = vmatpush.msra.mxu0 %v149_v45  ;;  %234 = vmatpush.msra.mxu1 %v233_v50 }
  0x17   :  { %307 = vmatpush.msra.mxu2 %v248_v49 }
  0x18   :  { %400 = vmatpush.msrb.mxu0 %v201_v13  ;;  %240 = vmatpush.msra.mxu1 %v239_v54  ;;  %v597_v13 = vsub.f32 %v4940_v5, %v596_v8 }
  0x19   :  { %523 = vmatpush.msrb.mxu2 %v4920_v60 }
  0x1a   :  { %404 = vmatpush.msrb.mxu0 %v207_v14  ;;  %246 = vmatpush.msra.mxu1 %v245_v57  ;;  %v602_v14 = vand.u32 4294901760, %v4954_v10  ;;  %v598_v18 = vand.u32 4294901760, %v597_v13 }
  0x1b   :  { %525 = vmatpush.msrb.mxu2 %v4926_v62 }
  0x1c   :  { %408 = vmatpush.msrb.mxu0 %v213_v15  ;;  %252 = vmatpush.msra.mxu1 %v251_v58  ;;  %v4964_v15 = vand.u32 4294901760, %v92_v11  ;;  %v603_v19 = vsub.f32 %v4954_v10, %v602_v14 }
  0x1d   :  { %527 = vmatpush.msrb.mxu2 %v4937_v4 }
  0x1e   :  { %462 = vmatpush.msrb.mxu1 %v4800_v3  ;;  %412 = vmatpush.msrb.mxu0 %v219_v28  ;;  %v590_v3 = vand.u32 4294901760, %v4929_v63  ;;  %v4979_v21 = vsub.f32 %v92_v11, %v4964_v15  ;;  %v604_v28 = vand.u32 4294901760, %v603_v19 }
  0x20   :  { %464 = vmatpush.msrb.mxu1 %v4808_v6  ;;  %416 = vmatpush.msrb.mxu0 %v225_v33  ;;  %v93_v6 = vld [vmem:[%s6787_s1 + $0x28] sm:$0xff]  ;;  %v614_v29 = vand.u32 4294901760, %v4979_v21  ;;  %v4998_v33 = vsub.f32 %v91_v17, %v4976_v20 }
  0x21   :  { %v4951_v9 = vand.u32 4294901760, %v93_v6 }
  0x22   :  { %466 = vmatpush.msrb.mxu1 %v4810_v7  ;;  %420 = vmatpush.msrb.mxu0 %v231_v40  ;;  %v591_v7 = vsub.f32 %v4929_v63, %v590_v3  ;;  %v620_v40 = vand.u32 4294901760, %v4998_v33 }
  0x23   :  { %529 = vmatpush.msrb.mxu2 %v4951_v9  ;;  %v4967_v16 = vsub.f32 %v93_v6, %v4951_v9 }
  0x24   :  { %468 = vmatpush.msrb.mxu1 %v4851_v23  ;;  %424 = vmatpush.msrb.mxu0 %v237_v47  ;;  %v592_v12 = vand.u32 4294901760, %v591_v7  ;;  %v621_v47 = vsub.f32 %v4998_v33, %v620_v40 }
  0x25   :  { %531 = vmatpush.msrb.mxu2 %v4964_v15  ;;  %v608_v25 = vand.u32 4294901760, %v4967_v16 }
  0x26   :  { %470 = vmatpush.msrb.mxu1 %v4859_v26  ;;  %428 = vmatpush.msrb.mxu0 %v243_v52  ;;  %v90_v26 = vld [vmem:[%s6787_s1 + $0x10] sm:$0xff] }
  0x27   :  { %593 = vmatpush.msrb.mxu3 %v592_v12  ;;  %533 = vmatpush.msrb.mxu2 %v4976_v20  ;;  %v609_v32 = vsub.f32 %v4967_v16, %v608_v25 }
  0x28   :  { %472 = vmatpush.msrb.mxu1 %v4871_v30  ;;  %432 = vmatpush.msrb.mxu0 %v249_v53  ;;  %v4989_v30 = vand.u32 4294901760, %v90_v26  ;;  %v622_v53 = vand.u32 4294901760, %v621_v47 }
  0x29   :  { %599 = vmatpush.msrb.mxu3 %v598_v18  ;;  %v610_v39 = vand.u32 4294901760, %v609_v32 }
  0x2a   :  { %474 = vmatpush.msrb.mxu1 %v4884_v35  ;;  %v615_v35 = vsub.f32 %v4979_v21, %v614_v29  ;;  %535 = vmatpush.msrb.mxu2 %v4989_v30  ;;  %v5010_v37 = vsub.f32 %v90_v26, %v4989_v30 }
  0x2b   :  { %605 = vmatpush.msrb.mxu3 %v604_v28 }
  0x2c   :  { %476 = vmatpush.msrb.mxu1 %v147_v42  ;;  %v616_v42 = vand.u32 4294901760, %v615_v35  ;;  %537 = vmatpush.msrb.mxu2 %v5007_v36  ;;  %v626_v43 = vand.u32 4294901760, %v5010_v37 }
  0x2d   :  { %611 = vmatpush.msrb.mxu3 %v610_v39 }
  0x2e   :  { %478 = vmatpush.msrb.mxu1 %v149_v45  ;;  %v5023_v45 = vsub.f32 %v89_v34, %v5007_v36  ;;  %v627_v48 = vsub.f32 %v5010_v37, %v626_v43  ;;  %539 = vmatpush.msrb.mxu2 %v5020_v44 }
  0x2f   :  { %617 = vmatpush.msrb.mxu3 %v616_v42 }
  0x30   :  { %v632_v49 = vand.u32 4294901760, %v5023_v45  ;;  %v628_v56 = vand.u32 4294901760, %v627_v48 }
  0x31   :  { %623 = vmatpush.msrb.mxu3 %v622_v53  ;;  %v902_v53 = vld [vmem:[%s6787_s1 + $0xd0] sm:$0xff] }
  0x32   :  { %v633_v57 = vsub.f32 %v5023_v45, %v632_v49 }
  0x33   :  { %629 = vmatpush.msrb.mxu3 %v628_v56 }
  0x74   :  { %v48_v0 = vpop.permute.xlu0 %47  ;;  %v61_v1 = vpop.permute.xlu1 %60 }
  0x75   :  { %54 = vst.msk [vmem:[#allocation2 + $0x2] sm:$0xff] %vm53_vm2, %v48_v0  ;;  %v634_v0 = vand.u32 4294901760, %v633_v57 }
  0x76   :  { %66 = vst.msk [vmem:[#allocation2 + $0x14] sm:$0xff] %vm53_vm2, %v61_v1 }
  0x77   :  { %635 = vmatpush.msrb.mxu3 %v634_v0 }
  0x7c   :  { %v50_v22 = vpop.permute.xlu0 %49  ;;  %v63_v23 = vpop.permute.xlu1 %62  ;;  %v97_v24 = vld [vmem:[#allocation2 + $0x1] sm:$0xff] }
  0x7d   :  { %55 = vst.msk [vmem:[#allocation2 + $0xa] sm:$0xff] %vm53_vm2, %v50_v22  ;;  %v112_v27 = vsel %vm36_vm0, %v97_v24, 0  ;;  %v83_v22 = vld [vmem:[#allocation2] sm:$0xff] }
  0x7e   :  { %67 = vst.msk [vmem:[#allocation2 + $0x1c] sm:$0xff] %vm53_vm2, %v63_v23  ;;  %v4992_v31 = vand.u32 4294901760, %v112_v27 }
  0x80   :  { %254 = vmatmul.f32.vlgmr.msra.gmra.mxu1 %v4992_v31  ;;  %v152_v38 = vsub.f32 %v112_v27, %v4992_v31 }
  0x81   :  { %731 = vmatpush.msra.mxu1 %v4920_v60 }
  0x82   :  { %310 = vmatmul.f32.vlgmr.msra.gmra.mxu2 %v152_v38  ;;  %v153_v46 = vand.u32 4294901760, %v152_v38 }
  0x83   :  { %733 = vmatpush.msra.mxu1 %v4926_v62  ;;  %789 = vmatpush.msra.mxu2 %v590_v3  ;;  %v5053_v3 = vsub.f32 %v88_v41, %v5020_v44 }
  0x84   :  { %362 = vmatmul.f32.vlgmr.msra.gmra.mxu3 %v153_v46  ;;  %v154_v50 = vsub.f32 %v152_v38, %v153_v46  ;;  %v98_v51 = vld [vmem:[#allocation2 + $0x9] sm:$0xff]  ;;  %v99_v52 = vld [vmem:[#allocation2 + $0x11] sm:$0xff] }
  0x85   :  { %v115_v54 = vsel %vm36_vm0, %v98_v51, 0  ;;  %v118_v55 = vsel %vm36_vm0, %v99_v52, 0  ;;  %735 = vmatpush.msra.mxu1 %v4937_v4  ;;  %793 = vmatpush.msra.mxu2 %v596_v8  ;;  %v100_v2 = vld [vmem:[#allocation2 + $0x19] sm:$0xff]  ;;  %v638_v8 = vand.u32 4294901760, %v5053_v3  ;;  %v84_v27 = vld [vmem:[#allocation2 + $0x8] sm:$0xff]  ;;  %v85_v34 = vld [vmem:[#allocation2 + $0x10] sm:$0xff] }
  0x86   :  { %v155_v58 = vand.u32 4294901760, %v154_v50  ;;  %v5043_v59 = vand.u32 4294901760, %v115_v54  ;;  %v5045_v61 = vand.u32 4294901760, %v118_v55  ;;  %v121_v11 = vsel %vm36_vm0, %v100_v2, 0  ;;  %v87_v47 = vld [vmem:[#allocation2 + $0x20] sm:$0xf] }
  0x87   :  { %737 = vmatpush.msra.mxu1 %v4951_v9  ;;  %v639_v13 = vsub.f32 %v5053_v3, %v638_v8  ;;  %797 = vmatpush.msra.mxu2 %v602_v14  ;;  %v5066_v18 = vand.u32 4294901760, %v121_v11  ;;  %v507_v35 = vsel %vm36_vm0, %v85_v34, 0 }
  0x88   :  { %156 = vmatmul.f32.vlgmr.msra.gmra.mxu0 %v155_v58  ;;  %258 = vmatmul.f32.gmra.mxu1 %v5043_v59  ;;  %v160_v1 = vsub.f32 %v115_v54, %v5043_v59  ;;  %v168_v7 = vsub.f32 %v118_v55, %v5045_v61  ;;  %v5123_v39 = vand.u32 4294901760, %v507_v35  ;;  %v5154_v54 = vand.u32 4294901760, %v902_v53  ;;  %v901_v58 = vld [vmem:[%s6787_s1 + $0xc8] sm:$0xff] }
  0x89   :  { %672 = vmatpush.msra.mxu0 %v4929_v63  ;;  %739 = vmatpush.msra.mxu1 %v4964_v15  ;;  %v640_v19 = vand.u32 4294901760, %v639_v13  ;;  %v176_v14 = vsub.f32 %v121_v11, %v5066_v18  ;;  %v5172_v0 = vand.u32 4294901760, %v901_v58 }
  0x8a   :  { %315 = vmatmul.f32.gmra.mxu2 %v160_v1  ;;  %v161_v6 = vand.u32 4294901760, %v160_v1  ;;  %v169_v17 = vand.u32 4294901760, %v168_v7  ;;  %v5130_v42 = vsub.f32 %v507_v35, %v5123_v39  ;;  %v5158_v55 = vsub.f32 %v902_v53, %v5154_v54  ;;  %v895_v35 = vld [vmem:[%s6787_s1 + $0x98] sm:$0xff] }
  0x8b   :  { %675 = vmatpush.msra.mxu0 %v4940_v5  ;;  %741 = vmatpush.msra.mxu1 %v4976_v20  ;;  %v101_v5 = vld [vmem:[#allocation2 + $0x21] sm:$0xf]  ;;  %v5180_v2 = vsub.f32 %v901_v58, %v5172_v0 }
  0x8c   :  { %368 = vmatmul.f32.gmra.mxu3 %v161_v6  ;;  %v162_v12 = vsub.f32 %v160_v1, %v161_v6  ;;  %801 = vmatpush.msra.mxu2 %v608_v25  ;;  %v124_v23 = vsel %vm36_vm0, %v101_v5, 0  ;;  %v177_v25 = vand.u32 4294901760, %v176_v14 }
  0x8d   :  { %678 = vmatpush.msra.mxu0 %v4954_v10  ;;  %743 = vmatpush.msra.mxu1 %v4989_v30  ;;  %v170_v10 = vsub.f32 %v168_v7, %v169_v17  ;;  %v5084_v26 = vand.u32 4294901760, %v124_v23  ;;  %v999_v11 = vand.u32 4294901760, %v5180_v2 }
  0x8e   :  { %v163_v63 = vand.u32 4294901760, %v162_v12  ;;  %641 = vmatpush.msrb.mxu3 %v640_v19  ;;  %805 = vmatpush.msra.mxu2 %v614_v29 }
  0x8f   :  { %681 = vmatpush.msra.mxu0 %v4967_v16  ;;  %745 = vmatpush.msra.mxu1 %v5007_v36  ;;  %v501_v16 = vsel %vm36_vm0, %v83_v22, 0  ;;  %v171_v24 = vand.u32 4294901760, %v170_v10 }
  0x90   :  { %164 = vmatmul.f32.gmra.mxu0 %v163_v63  ;;  %262 = vmatmul.f32.gmra.mxu1 %v5045_v61 }
  0x91   :  { %684 = vmatpush.msra.mxu0 %v4979_v21  ;;  %851 = vmatpush.msra.mxu3 %v4920_v60  ;;  %v5092_v60 = vand.u32 4294901760, %v501_v16  ;;  %v184_v21 = vsub.f32 %v124_v23, %v5084_v26 }
  0x92   :  { %320 = vmatmul.f32.gmra.mxu2 %v168_v7  ;;  %747 = vmatpush.msra.mxu1 %v5020_v44  ;;  %v900_v7 = vld [vmem:[%s6787_s1 + $0xc0] sm:$0xff] }
  0x93   :  { %687 = vmatpush.msra.mxu0 %v4998_v33  ;;  %853 = vmatpush.msra.mxu3 %v4926_v62  ;;  %v178_v62 = vsub.f32 %v176_v14, %v177_v25  ;;  %v185_v29 = vand.u32 4294901760, %v184_v21  ;;  %v5190_v12 = vand.u32 4294901760, %v900_v7 }
  0x94   :  { %374 = vmatmul.f32.gmra.mxu3 %v169_v17  ;;  %809 = vmatpush.msra.mxu2 %v620_v40  ;;  %v86_v40 = vld [vmem:[#allocation2 + $0x18] sm:$0xff] }
  0x95   :  { %690 = vmatpush.msra.mxu0 %v5010_v37  ;;  %855 = vmatpush.msra.mxu3 %v4937_v4  ;;  %v5103_v4 = vsub.f32 %v501_v16, %v5092_v60  ;;  %v179_v28 = vand.u32 4294901760, %v178_v62  ;;  %v186_v33 = vsub.f32 %v184_v21, %v185_v29  ;;  %v5198_v13 = vsub.f32 %v900_v7, %v5190_v12  ;;  %v899_v17 = vld [vmem:[%s6787_s1 + $0xb8] sm:$0xff] }
  0x96   :  { %813 = vmatpush.msra.mxu2 %v626_v43  ;;  %v510_v43 = vsel %vm36_vm0, %v86_v40, 0  ;;  %v5208_v10 = vand.u32 4294901760, %v899_v17 }
  0x97   :  { %693 = vmatpush.msra.mxu0 %v5023_v45  ;;  %857 = vmatpush.msra.mxu3 %v4951_v9  ;;  %v504_v9 = vsel %vm36_vm0, %v84_v27, 0  ;;  %v187_v37 = vand.u32 4294901760, %v186_v33  ;;  %v558_v45 = vand.u32 4294901760, %v5130_v42  ;;  %v5136_v46 = vand.u32 4294901760, %v510_v43 }
  0x98   :  { %172 = vmatmul.f32.gmra.mxu0 %v171_v24  ;;  %266 = vmatmul.f32.gmra.mxu1 %v5066_v18  ;;  %v5110_v32 = vand.u32 4294901760, %v504_v9  ;;  %v1005_v5 = vand.u32 4294901760, %v5198_v13  ;;  %v5219_v23 = vsub.f32 %v899_v17, %v5208_v10  ;;  %v898_v24 = vld [vmem:[%s6787_s1 + $0xb0] sm:$0xff] }
  0x99   :  { %696 = vmatpush.msra.mxu0 %v5053_v3  ;;  %859 = vmatpush.msra.mxu3 %v4964_v15  ;;  %v542_v15 = vand.u32 4294901760, %v5103_v4  ;;  %v559_v48 = vsub.f32 %v5130_v42, %v558_v45  ;;  %v5226_v62 = vand.u32 4294901760, %v898_v24 }
  0x9a   :  { %325 = vmatmul.f32.gmra.mxu2 %v176_v14  ;;  %v1006_v14 = vsub.f32 %v5198_v13, %v1005_v5 }
  0x9b   :  { %817 = vmatpush.msra.mxu2 %v632_v49  ;;  %861 = vmatpush.msra.mxu3 %v4976_v20  ;;  %v543_v20 = vsub.f32 %v5103_v4, %v542_v15  ;;  %v5143_v49 = vsub.f32 %v510_v43, %v5136_v46  ;;  %v560_v50 = vand.u32 4294901760, %v559_v48  ;;  %v5238_v27 = vsub.f32 %v898_v24, %v5226_v62  ;;  %v894_v43 = vld [vmem:[%s6787_s1 + $0x90] sm:$0xff] }
  0x9c   :  { %380 = vmatmul.f32.gmra.mxu3 %v177_v25  ;;  %v1007_v16 = vand.u32 4294901760, %v1006_v14  ;;  %v1011_v25 = vand.u32 4294901760, %v5219_v23  ;;  %v941_v48 = vand.u32 4294901760, %v894_v43  ;;  %v893_v14 = vld [vmem:[#allocation2 + $0x22] sm:$0xf] }
  0x9d   :  { %821 = vmatpush.msra.mxu2 %v638_v8  ;;  %863 = vmatpush.msra.mxu3 %v4989_v30  ;;  %v5118_v30 = vsub.f32 %v504_v9, %v5110_v32  ;;  %v566_v51 = vand.u32 4294901760, %v5143_v49  ;;  %v1017_v33 = vand.u32 4294901760, %v5238_v27 }
  0x9f   :  { %865 = vmatpush.msra.mxu3 %v5007_v36  ;;  %v544_v36 = vand.u32 4294901760, %v543_v20  ;;  %v550_v38 = vand.u32 4294901760, %v5118_v30  ;;  %v567_v56 = vsub.f32 %v5143_v49, %v566_v51 }
  0xa0   :  { %180 = vmatmul.f32.gmra.mxu0 %v179_v28  ;;  %270 = vmatmul.f32.gmra.mxu1 %v5084_v26  ;;  %v896_v28 = vld [vmem:[%s6787_s1 + $0xa0] sm:$0xff] }
  0xa1   :  { %867 = vmatpush.msra.mxu3 %v5020_v44  ;;  %v551_v41 = vsub.f32 %v5118_v30, %v550_v38  ;;  %v568_v3 = vand.u32 4294901760, %v567_v56  ;;  %v5250_v20 = vand.u32 4294901760, %v896_v28  ;;  %v1040_v56 = vsub.f32 %v894_v43, %v941_v48 }
  0xa2   :  { %330 = vmatmul.f32.gmra.mxu2 %v184_v21  ;;  %v1012_v21 = vsub.f32 %v5219_v23, %v1011_v25 }
  0xa3   :  { %v552_v44 = vand.u32 4294901760, %v551_v41  ;;  %v1028_v40 = vsub.f32 %v896_v28, %v5250_v20  ;;  %v5261_v41 = vand.u32 4294901760, %v895_v35 }
  0xa4   :  { %386 = vmatmul.f32.gmra.mxu3 %v185_v29  ;;  %v1013_v29 = vand.u32 4294901760, %v1012_v21 }
  0xa8   :  { %188 = vmatmul.f32.gmra.mxu0 %v187_v37  ;;  %480 = vmatmul.f32.vlgmr.msrb.gmra.mxu1 %v4992_v31  ;;  %v1018_v37 = vsub.f32 %v5238_v27, %v1017_v33 }
  0xaa   :  { %545 = vmatmul.f32.vlgmr.msrb.gmra.mxu2 %v544_v36 }
  0xab   :  { %1075 = vmatpush.msrb.mxu2 %v5158_v55 }
  0xac   :  { %643 = vmatmul.f32.vlgmr.msrb.gmra.mxu3 %v5092_v60 }
  0xad   :  { %1134 = vmatpush.msrb.mxu3 %v5154_v54  ;;  %1078 = vmatpush.msrb.mxu2 %v5180_v2 }
  0xaf   :  { %1136 = vmatpush.msrb.mxu3 %v5172_v0  ;;  %1081 = vmatpush.msrb.mxu2 %v5198_v13 }
  0xb0   :  { %434 = vmatmul.f32.vlgmr.msrb.gmra.mxu0 %v4992_v31  ;;  %484 = vmatmul.f32.gmra.mxu1 %v5043_v59  ;;  %v513_v31 = vsel %vm36_vm0, %v87_v47, 0  ;;  %v1029_v47 = vand.u32 4294901760, %v1028_v40 }
  0xb1   :  { %v5149_v52 = vand.u32 4294901760, %v513_v31  ;;  %926 = vmatpush.msrb.mxu0 %v5154_v54  ;;  %1138 = vmatpush.msrb.mxu3 %v5190_v12 }
  0xb2   :  { %553 = vmatmul.f32.gmra.mxu2 %v552_v44 }
  0xb3   :  { %v5166_v57 = vsub.f32 %v513_v31, %v5149_v52  ;;  %928 = vmatpush.msrb.mxu0 %v5172_v0  ;;  %1140 = vmatpush.msrb.mxu3 %v5208_v10 }
  0xb4   :  { %647 = vmatmul.f32.gmra.mxu3 %v5110_v32  ;;  %1084 = vmatpush.msrb.mxu2 %v5219_v23 }
  0xb5   :  { %v574_v6 = vand.u32 4294901760, %v5166_v57  ;;  %930 = vmatpush.msrb.mxu0 %v5190_v12  ;;  %1142 = vmatpush.msrb.mxu3 %v5226_v62 }
  0xb6   :  { %1087 = vmatpush.msrb.mxu2 %v5238_v27 }
  0xb7   :  { %v575_v63 = vsub.f32 %v5166_v57, %v574_v6  ;;  %932 = vmatpush.msrb.mxu0 %v5208_v10 }
  0xb8   :  { %438 = vmatmul.f32.gmra.mxu0 %v5043_v59  ;;  %488 = vmatmul.f32.gmra.mxu1 %v5045_v61  ;;  %v993_v59 = vand.u32 4294901760, %v5158_v55 }
  0xb9   :  { %v576_v22 = vand.u32 4294901760, %v575_v63  ;;  %934 = vmatpush.msrb.mxu0 %v5226_v62 }
  0xba   :  { %561 = vmatmul.f32.gmra.mxu2 %v560_v50  ;;  %v994_v1 = vsub.f32 %v5158_v55, %v993_v59  ;;  %v1030_v50 = vsub.f32 %v1028_v40, %v1029_v47 }
  0xbc   :  { %651 = vmatmul.f32.gmra.mxu3 %v5123_v39  ;;  %v995_v8 = vand.u32 4294901760, %v994_v1  ;;  %v1031_v58 = vand.u32 4294901760, %v1030_v50 }
  0xbe   :  { %996 = vmatpush.msrb.mxu1 %v995_v8 }
  0xc0   :  { %442 = vmatmul.f32.gmra.mxu0 %v5045_v61  ;;  %492 = vmatmul.f32.gmra.mxu1 %v5066_v18  ;;  %v1000_v61 = vsub.f32 %v5180_v2, %v999_v11 }
  0xc2   :  { %569 = vmatmul.f32.gmra.mxu2 %v568_v3  ;;  %v1001_v19 = vand.u32 4294901760, %v1000_v61  ;;  %v1041_v3 = vand.u32 4294901760, %v1040_v56 }
  0xc4   :  { %655 = vmatmul.f32.gmra.mxu3 %v5136_v46  ;;  %1002 = vmatpush.msrb.mxu1 %v1001_v19  ;;  %v1042_v7 = vsub.f32 %v1040_v56, %v1041_v3 }
  0xc6   :  { %1008 = vmatpush.msrb.mxu1 %v1007_v16  ;;  %v1043_v8 = vand.u32 4294901760, %v1042_v7  ;;  %v916_v16 = vsel %vm36_vm0, %v893_v14, 0  ;;  %v71_v7 = vld [vmem:[%s6795_s9 + $0x18] sm:$0xff] }
  0xc7   :  { %v5346_v27 = vand.u32 4294901760, %v916_v16 }
  0xc8   :  { %446 = vmatmul.f32.gmra.mxu0 %v5066_v18  ;;  %496 = vmatmul.f32.gmra.mxu1 %v5084_v26  ;;  %v897_v18 = vld [vmem:[%s6787_s1 + $0xa8] sm:$0xff] }
  0xc9   :  { %v5240_v9 = vand.u32 4294901760, %v897_v18  ;;  %1014 = vmatpush.msrb.mxu1 %v1013_v29  ;;  %v976_v29 = vsub.f32 %v916_v16, %v5346_v27 }
  0xca   :  { %577 = vmatmul.f32.gmra.mxu2 %v576_v22 }
  0xcb   :  { %936 = vmatpush.msrb.mxu0 %v5240_v9  ;;  %v1022_v34 = vsub.f32 %v897_v18, %v5240_v9  ;;  %1144 = vmatpush.msrb.mxu3 %v5240_v9 }
  0xcc   :  { %659 = vmatmul.f32.gmra.mxu3 %v5149_v52 }
  0xcd   :  { %v1023_v36 = vand.u32 4294901760, %v1022_v34  ;;  %938 = vmatpush.msrb.mxu0 %v5250_v20  ;;  %1146 = vmatpush.msrb.mxu3 %v5250_v20 }
  0xce   :  { %1090 = vmatpush.msrb.mxu2 %v1022_v34 }
  0xcf   :  { %v1024_v44 = vsub.f32 %v1022_v34, %v1023_v36  ;;  %940 = vmatpush.msrb.mxu0 %v5261_v41  ;;  %1148 = vmatpush.msrb.mxu3 %v5261_v41 }
  0xd0   :  { %450 = vmatmul.f32.gmra.mxu0 %v5084_v26  ;;  %751 = vmatmul.f32.vlgmr.msra.gmra.mxu1 %v542_v15  ;;  %v1019_v26 = vand.u32 4294901760, %v1018_v37  ;;  %v1034_v15 = vsub.f32 %v895_v35, %v5261_v41  ;;  %v977_v37 = vand.u32 4294901760, %v976_v29 }
  0xd1   :  { %v1025_v31 = vand.u32 4294901760, %v1024_v44  ;;  %1093 = vmatpush.msrb.mxu2 %v1028_v40  ;;  %942 = vmatpush.msrb.mxu0 %v941_v48 }
  0xd2   :  { %823 = vmatmul.f32.vlgmr.msra.gmra.mxu2 %v5092_v60  ;;  %1020 = vmatpush.msrb.mxu1 %v1019_v26  ;;  %v1035_v53 = vand.u32 4294901760, %v1034_v15  ;;  %v978_v40 = vsub.f32 %v976_v29, %v977_v37 }
  0xd3   :  { %1096 = vmatpush.msrb.mxu2 %v1034_v15  ;;  %1150 = vmatpush.msrb.mxu3 %v941_v48 }
  0xd4   :  { %869 = vmatmul.f32.vlgmr.msra.gmra.mxu3 %v5092_v60  ;;  %1026 = vmatpush.msrb.mxu1 %v1025_v31  ;;  %v1036_v1 = vsub.f32 %v1034_v15, %v1035_v53  ;;  %v979_v44 = vand.u32 4294901760, %v978_v40 }
  0xd5   :  { %1099 = vmatpush.msrb.mxu2 %v1040_v56 }
  0xd6   :  { %v1037_v60 = vand.u32 4294901760, %v1036_v1  ;;  %1032 = vmatpush.msrb.mxu1 %v1031_v58  ;;  %v4731_v1 = vmov 0  }
  0xd7   :  { %4697 = vset.pattern.permute.xlu0 %v4731_v1  ;;  %4698 = vset.pattern.permute.xlu1 %v4731_v1 }
  0xd8   :  { %699 = vmatmul.f32.vlgmr.msra.gmra.mxu0 %v5103_v4  ;;  %757 = vmatmul.f32.gmra.mxu1 %v550_v38  ;;  %v889_v4 = vld [vmem:[#allocation2 + $0x2] sm:$0xff]  ;;  %v890_v38 = vld [vmem:[#allocation2 + $0xa] sm:$0xff] }
  0xd9   :  { %1192 = vmatpush.msra.mxu0 %v993_v59  ;;  %1038 = vmatpush.msrb.mxu1 %v1037_v60  ;;  %v68_v60 = vld [vmem:[%s6795_s9] sm:$0xff] }
  0xda   :  { %827 = vmatmul.f32.gmra.mxu2 %v5110_v32  ;;  %4696 = vset.pattern.permute.xlu2 %v4731_v1 }
  0xdb   :  { %1196 = vmatpush.msra.mxu0 %v999_v11  ;;  %1044 = vmatpush.msrb.mxu1 %v1043_v8 }
  0xdc   :  { %873 = vmatmul.f32.gmra.mxu3 %v5110_v32  ;;  %v904_v32 = vsel %vm36_vm0, %v889_v4, 0  ;;  %1301 = vperm.xlu2 %4696, %v68_v60  }
  0xdd   :  { %1254 = vmatpush.msra.mxu1 %v5154_v54  ;;  %1200 = vmatpush.msra.mxu0 %v1005_v5 }
  0xde   :  { %1316 = vperm.xlu1 %4698, %v71_v7  }
  0xdf   :  { %1256 = vmatpush.msra.mxu1 %v5172_v0  ;;  %1204 = vmatpush.msra.mxu0 %v1011_v25 }
  0xe0   :  { %704 = vmatmul.f32.gmra.mxu0 %v5118_v30  ;;  %763 = vmatmul.f32.gmra.mxu1 %v558_v45  ;;  %v5305_v30 = vand.u32 4294901760, %v904_v32 }
  0xe1   :  { %1258 = vmatpush.msra.mxu1 %v5190_v12  ;;  %1208 = vmatpush.msra.mxu0 %v1017_v33 }
  0xe2   :  { %831 = vmatmul.f32.gmra.mxu2 %v5123_v39 }
  0xe3   :  { %1260 = vmatpush.msra.mxu1 %v5208_v10  ;;  %1212 = vmatpush.msra.mxu0 %v1023_v36 }
  0xe4   :  { %877 = vmatmul.f32.gmra.mxu3 %v5123_v39  ;;  %v944_v39 = vsub.f32 %v904_v32, %v5305_v30 }
  0xe5   :  { %1262 = vmatpush.msra.mxu1 %v5226_v62  ;;  %1216 = vmatpush.msra.mxu0 %v1029_v47 }
  0xe6   :  { %v945_v45 = vand.u32 4294901760, %v944_v39 }
  0xe7   :  { %1264 = vmatpush.msra.mxu1 %v5240_v9  ;;  %1220 = vmatpush.msra.mxu0 %v1035_v53  ;;  %v70_v53 = vld [vmem:[%s6795_s9 + $0x10] sm:$0xff] }
  0xe8   :  { %709 = vmatmul.f32.gmra.mxu0 %v5130_v42  ;;  %769 = vmatmul.f32.gmra.mxu1 %v566_v51  ;;  %v907_v42 = vsel %vm36_vm0, %v890_v38, 0  ;;  %v946_v51 = vsub.f32 %v944_v39, %v945_v45  ;;  %v69_v38 = vld [vmem:[%s6795_s9 + $0x8] sm:$0xff] }
  0xe9   :  { %1266 = vmatpush.msra.mxu1 %v5250_v20  ;;  %1224 = vmatpush.msra.mxu0 %v1041_v3 }
  0xea   :  { %835 = vmatmul.f32.gmra.mxu2 %v5136_v46  ;;  %v947_v0 = vand.u32 4294901760, %v946_v51  ;;  %1311 = vperm.xlu0 %4697, %v70_v53  }
  0xeb   :  { %1268 = vmatpush.msra.mxu1 %v5261_v41  ;;  %1306 = vperm.xlu2 %4696, %v69_v38  }
  0xec   :  { %881 = vmatmul.f32.gmra.mxu3 %v5136_v46  ;;  %v5314_v46 = vand.u32 4294901760, %v907_v42 }
  0xed   :  { %1270 = vmatpush.msra.mxu1 %v941_v48 }
  0xee   :  { %v952_v54 = vsub.f32 %v907_v42, %v5314_v46 }
  0xf0   :  { %714 = vmatmul.f32.gmra.mxu0 %v5143_v49  ;;  %775 = vmatmul.f32.gmra.mxu1 %v574_v6  ;;  %v891_v49 = vld [vmem:[#allocation2 + $0x12] sm:$0xff]  ;;  %v953_v2 = vand.u32 4294901760, %v952_v54 }
  0xf1   :  { %v910_v55 = vsel %vm36_vm0, %v891_v49, 0 }
  0xf2   :  { %839 = vmatmul.f32.gmra.mxu2 %v5149_v52  ;;  %v954_v6 = vsub.f32 %v952_v54, %v953_v2 }
  0xf4   :  { %885 = vmatmul.f32.gmra.mxu3 %v5149_v52  ;;  %v5322_v52 = vand.u32 4294901760, %v910_v55  ;;  %v955_v17 = vand.u32 4294901760, %v954_v6 }
  0xf6   :  { %v960_v11 = vsub.f32 %v910_v55, %v5322_v52 }
  0xf8   :  { %719 = vmatmul.f32.gmra.mxu0 %v5166_v57  ;;  %1046 = vmatmul.f32.vlgmr.msrb.gmra.mxu1 %v5305_v30  ;;  %v892_v57 = vld [vmem:[#allocation2 + $0x1a] sm:$0xff]  ;;  %v961_v19 = vand.u32 4294901760, %v960_v11 }
  0xf9   :  { %v913_v12 = vsel %vm36_vm0, %v892_v57, 0 }
  0xfa   :  { %1102 = vmatmul.f32.vlgmr.msrb.gmra.mxu2 %v944_v39  ;;  %v5333_v5 = vand.u32 4294901760, %v913_v12  ;;  %v962_v22 = vsub.f32 %v960_v11, %v961_v19 }
  0xfc   :  { %1154 = vmatmul.f32.vlgmr.msrb.gmra.mxu3 %v945_v45  ;;  %v968_v23 = vsub.f32 %v913_v12, %v5333_v5  ;;  %v963_v18 = vand.u32 4294901760, %v962_v22 }
  0xfd   :  { %v5320_v59 = vpop.f32.mrf.mxu1 }
  0xfe   :  { %v969_v21 = vand.u32 4294901760, %v968_v23 }
 0x100   :  { %948 = vmatmul.f32.vlgmr.msrb.gmra.mxu0 %v947_v0  ;;  %1050 = vmatmul.f32.gmra.mxu1 %v5314_v46  ;;  %v970_v28 = vsub.f32 %v968_v23, %v969_v21 }
 0x102   :  { %1107 = vmatmul.f32.gmra.mxu2 %v952_v54  ;;  %v971_v35 = vand.u32 4294901760, %v970_v28 }
 0x104   :  { %1160 = vmatmul.f32.gmra.mxu3 %v953_v2 }
 0x105   :  { %v5327_v61 = vpop.f32.mrf.mxu0  ;;  %v5329_v13 = vpop.f32.mrf.mxu1 }
 0x106   :  { %v5331_v63 = vpop.f32.mrf.mxu2 }
 0x107   :  { %v5335_v10 = vpop.f32.mrf.mxu3 }
 0x108   :  { %956 = vmatmul.f32.gmra.mxu0 %v955_v17  ;;  %1054 = vmatmul.f32.gmra.mxu1 %v5322_v52 }
 0x10a   :  { %1112 = vmatmul.f32.gmra.mxu2 %v960_v11 }
 0x10c   :  { %1166 = vmatmul.f32.gmra.mxu3 %v961_v19 }
 0x10d   :  { %v5340_v24 = vpop.f32.mrf.mxu0  ;;  %v5342_v25 = vpop.f32.mrf.mxu1 }
 0x10e   :  { %v5344_v62 = vpop.f32.mrf.mxu2 }
 0x10f   :  { %v5348_v9 = vpop.f32.mrf.mxu3 }
 0x110   :  { %964 = vmatmul.f32.gmra.mxu0 %v963_v18  ;;  %1058 = vmatmul.f32.gmra.mxu1 %v5333_v5 }
 0x112   :  { %1117 = vmatmul.f32.gmra.mxu2 %v968_v23 }
 0x114   :  { %1172 = vmatmul.f32.gmra.mxu3 %v969_v21 }
 0x115   :  { %v5352_v33 = vpop.f32.mrf.mxu0  ;;  %v5354_v34 = vpop.f32.mrf.mxu1 }
 0x116   :  { %v5356_v20 = vpop.f32.mrf.mxu2 }
 0x117   :  { %v5358_v36 = vpop.f32.mrf.mxu3 }
 0x118   :  { %972 = vmatmul.f32.gmra.mxu0 %v971_v35  ;;  %1062 = vmatmul.f32.gmra.mxu1 %v5346_v27 }
 0x11a   :  { %1122 = vmatmul.f32.gmra.mxu2 %v976_v29 }
 0x11c   :  { %1178 = vmatmul.f32.gmra.mxu3 %v977_v37 }
 0x11d   :  { %v5361_v41 = vpop.f32.mrf.mxu0  ;;  %v5363_v43 = vpop.f32.mrf.mxu1 }
 0x11e   :  { %v5365_v26 = vpop.f32.mrf.mxu2 }
 0x11f   :  { %v5368_v47 = vpop.f32.mrf.mxu3 }
 0x120   :  { %980 = vmatmul.f32.gmra.mxu0 %v979_v44  ;;  %1272 = vmatmul.f32.vlgmr.msra.gmra.mxu1 %v5305_v30 }
 0x125   :  { %v5370_v15 = vpop.f32.mrf.mxu0  ;;  %v5372_v48 = vpop.f32.mrf.mxu1 }
 0x126   :  { %v5374_v31 = vpop.f32.mrf.mxu2 }
 0x127   :  { %v5378_v50 = vpop.f32.mrf.mxu3 }
 0x128   :  { %1226 = vmatmul.f32.vlgmr.msra.gmra.mxu0 %v5305_v30  ;;  %1276 = vmatmul.f32.gmra.mxu1 %v5314_v46 }
 0x12d   :  { %v5383_v56 = vpop.f32.mrf.mxu0  ;;  %v5385_v58 = vpop.f32.mrf.mxu1 }
 0x12e   :  { %v5389_v3 = vpop.f32.mrf.mxu2 }
 0x12f   :  { %v5401_v32 = vpop.f32.mrf.mxu3 }
 0x130   :  { %1230 = vmatmul.f32.gmra.mxu0 %v5314_v46  ;;  %1280 = vmatmul.f32.gmra.mxu1 %v5322_v52  ;;  %v72_v46 = vld [vmem:[%s6795_s9 + $0x20] sm:$0xf] }
 0x131   :  { %1321 = vperm.xlu2 %4696, %v72_v46  }
 0x135   :  { %v5397_v8 = vpop.f32.mrf.mxu0  ;;  %v5399_v4 = vpop.f32.mrf.mxu1 }
 0x136   :  { %v5405_v30 = vpop.f32.mrf.mxu2 }
 0x137   :  { %v5414_v45 = vpop.f32.mrf.mxu3 }
 0x138   :  { %1234 = vmatmul.f32.gmra.mxu0 %v5322_v52  ;;  %1284 = vmatmul.f32.gmra.mxu1 %v5333_v5 }
 0x13d   :  { %v5410_v39 = vpop.f32.mrf.mxu0  ;;  %v5412_v42 = vpop.f32.mrf.mxu1 }
 0x13e   :  { %v5425_v54 = vpop.f32.mrf.mxu2 }
 0x13f   :  { %v5428_v55 = vpop.f32.mrf.mxu3 }
 0x140   :  { %1238 = vmatmul.f32.gmra.mxu0 %v5333_v5  ;;  %1288 = vmatmul.f32.gmra.mxu1 %v5346_v27 }
 0x145   :  { %v5421_v49 = vpop.f32.mrf.mxu0  ;;  %v5423_v51 = vpop.f32.mrf.mxu1 }
 0x146   :  { %v5434_v52 = vpop.f32.mrf.mxu2 }
 0x147   :  { %v5436_v57 = vpop.f32.mrf.mxu3 }
 0x148   :  { %1242 = vmatmul.f32.gmra.mxu0 %v5346_v27 }
 0x14d   :  { %v5430_v0 = vpop.f32.mrf.mxu0  ;;  %v5432_v2 = vpop.f32.mrf.mxu1 }
 0x14e   :  { %v5442_v12 = vpop.f32.mrf.mxu2 }
 0x14f   :  { %v5448_v5 = vpop.f32.mrf.mxu3 }
 0x150   :  { %6871 = vst [vmem:[#allocation6_spill] sm:$0xff] %v5448_v5 }
 0x155   :  { %v5438_v6 = vpop.f32.mrf.mxu0  ;;  %v5440_v11 = vpop.f32.mrf.mxu1 }
 0x156   :  { %v5450_v14 = vpop.f32.mrf.mxu2 }
 0x157   :  { %6872 = vst [vmem:[#allocation7_spill] sm:$0xff] %v5450_v14  ;;  %v5456_v16 = vpop.f32.mrf.mxu3 }
 0x158   :  { %6873 = vst [vmem:[#allocation8_spill] sm:$0xff] %v5456_v16 }
 0x15d   :  { %v5444_v17 = vpop.f32.mrf.mxu0  ;;  %v5446_v19 = vpop.f32.mrf.mxu1 }
 0x15e   :  { %v5462_v27 = vpop.f32.mrf.mxu2 }
 0x15f   :  { %v5464_v28 = vpop.f32.mrf.mxu3 }
 0x160   :  { %6875 = vst [vmem:[#allocation10_spill] sm:$0xff] %v5464_v28 }
 0x165   :  { %v5452_v22 = vpop.f32.mrf.mxu0  ;;  %v5454_v23 = vpop.f32.mrf.mxu1 }
 0x166   :  { %v5470_v37 = vpop.f32.mrf.mxu2 }
 0x167   :  { %6877 = vst [vmem:[#allocation12_spill] sm:$0xff] %v5470_v37  ;;  %v5472_v40 = vpop.f32.mrf.mxu3 }
 0x168   :  { %6878 = vst [vmem:[#allocation13_spill] sm:$0xff] %v5472_v40  ;;  %v260_v40 = vadd.f32 %v5329_v13, %v5340_v24 }
 0x16d   :  { %v5458_v18 = vpop.f32.mrf.mxu0  ;;  %v5460_v21 = vpop.f32.mrf.mxu1 }
 0x16e   :  { %6874 = vst [vmem:[#allocation9_spill] sm:$0xff] %v5460_v21  ;;  %v5478_v1 = vpop.f32.mrf.mxu2 }
 0x16f   :  { %6879 = vst [vmem:[#allocation14_spill] sm:$0xff] %v5478_v1  ;;  %v5484_v38 = vpop.f32.mrf.mxu3 }
 0x170   :  { %6880 = vst [vmem:[#allocation15_spill] sm:$0xff] %v5484_v38  ;;  %v317_v38 = vadd.f32 %v5344_v62, %v260_v40  ;;  %v272_v62 = vadd.f32 %v5363_v43, %v5370_v15 }
 0x172   :  { %v370_v13 = vadd.f32 %v5348_v9, %v317_v38 }
 0x174   :  { %v440_v40 = vadd.f32 %v5397_v8, %v370_v13 }
 0x175   :  { %v5466_v29 = vpop.f32.mrf.mxu0  ;;  %v5468_v35 = vpop.f32.mrf.mxu1 }
 0x176   :  { %6876 = vst [vmem:[#allocation11_spill] sm:$0xff] %v5466_v29  ;;  %v5486_v46 = vpop.f32.mrf.mxu2  ;;  %v256_v29 = vadd.f32 %v5320_v59, %v5327_v61 }
 0x177   :  { %6881 = vst [vmem:[#allocation16_spill] sm:$0xff] %v5486_v46  ;;  %v5492_v28 = vpop.f32.mrf.mxu3  ;;  %v264_v46 = vadd.f32 %v5342_v25, %v5352_v33 }
 0x178   :  { %6882 = vst [vmem:[#allocation17_spill] sm:$0xff] %v5492_v28  ;;  %v268_v28 = vadd.f32 %v5354_v34, %v5361_v41  ;;  %v312_v5 = vadd.f32 %v5331_v63, %v256_v29  ;;  %v332_v41 = vadd.f32 %v5374_v31, %v272_v62  ;;  %v80_v31 = vld [vmem:[%s6794_s8 + $0x30] sm:$0xff]  ;;  %v79_v62 = vld [vmem:[%s6794_s8 + $0x28] sm:$0xff] }
 0x179   :  { %v322_v59 = vadd.f32 %v5356_v20, %v264_v46  ;;  %v5546_v8 = vand.u32 4294901760, %v80_v31 }
 0x17a   :  { %v327_v61 = vadd.f32 %v5365_v26, %v268_v28  ;;  %v364_v25 = vadd.f32 %v5335_v10, %v312_v5  ;;  %v486_v26 = vadd.f32 %v5385_v58, %v440_v40 }
 0x17b   :  { %v376_v34 = vadd.f32 %v5358_v36, %v322_v59  ;;  %v82_v36 = vld [vmem:[%s6794_s8 + $0x40] sm:$0xff] }
 0x17c   :  { %v382_v63 = vadd.f32 %v5368_v47, %v327_v61  ;;  %v436_v9 = vadd.f32 %v5383_v56, %v364_v25  ;;  %v5535_v15 = vand.u32 4294901760, %v82_v36  ;;  %v81_v47 = vld [vmem:[%s6794_s8 + $0x38] sm:$0xff]  ;;  %v5584_v25 = vand.u32 4294901760, %v79_v62 }
 0x17d   :  { %v5474_v44 = vpop.f32.mrf.mxu0  ;;  %v5476_v53 = vpop.f32.mrf.mxu1  ;;  %v444_v43 = vadd.f32 %v5410_v39, %v376_v34  ;;  %v5544_v58 = vand.u32 4294901760, %v81_v47  ;;  %v388_v39 = vadd.f32 %v5378_v50, %v332_v41  ;;  %v5564_v50 = vsub.f32 %v80_v31, %v5546_v8 }
 0x17e   :  { %v5503_v14 = vpop.f32.mrf.mxu2  ;;  %v448_v10 = vadd.f32 %v5421_v49, %v382_v63  ;;  %v482_v56 = vadd.f32 %v5372_v48, %v436_v9  ;;  %v555_v49 = vadd.f32 %v5405_v30, %v486_v26  ;;  %v5551_v5 = vsub.f32 %v82_v36, %v5535_v15  ;;  %1356 = vmatpush.msra.mxu2 %v5535_v15 }
 0x17f   :  { %v5513_v24 = vpop.f32.mrf.mxu3  ;;  %v490_v29 = vadd.f32 %v5399_v4, %v444_v43  ;;  %v5561_v13 = vsub.f32 %v81_v47, %v5544_v58  ;;  %6885 = vst [vmem:[#allocation20_spill] sm:$0xff] %v5564_v50  ;;  %v452_v30 = vadd.f32 %v5430_v0, %v388_v39  ;;  %v5576_v61 = vand.u32 4294901760, %v5564_v50 }
 0x180   :  { %6883 = vst [vmem:[#allocation18_spill] sm:$0xff] %v5551_v5  ;;  %v494_v38 = vadd.f32 %v5412_v42, %v448_v10  ;;  %v5568_v59 = vand.u32 4294901760, %v5551_v5  ;;  %1358 = vmatpush.msra.mxu2 %v5544_v58  ;;  %v547_v4 = vadd.f32 %v5389_v3, %v482_v56  ;;  %v649_v40 = vadd.f32 %v5414_v45, %v555_v49  ;;  %v78_v45 = vld [vmem:[%s6794_s8 + $0x20] sm:$0xff] }
 0x181   :  { %6884 = vst [vmem:[#allocation19_spill] sm:$0xff] %v5561_v13  ;;  %v5573_v42 = vand.u32 4294901760, %v5561_v13  ;;  %v563_v3 = vadd.f32 %v5425_v54, %v490_v29  ;;  %v1404_v41 = vsub.f32 %v5564_v50, %v5576_v61  ;;  %v498_v26 = vadd.f32 %v5423_v51, %v452_v30  ;;  %v77_v51 = vld [vmem:[%s6794_s8 + $0x18] sm:$0xff]  ;;  %v76_v30 = vld [vmem:[%s6794_s8 + $0x10] sm:$0xff] }
 0x182   :  { %6886 = vst [vmem:[#allocation21_spill] sm:$0xff] %v5568_v59  ;;  %v1392_v0 = vsub.f32 %v5551_v5, %v5568_v59  ;;  %1360 = vmatpush.msra.mxu2 %v5546_v8  ;;  %v571_v34 = vadd.f32 %v5434_v52, %v494_v38  ;;  %v5602_v54 = vsub.f32 %v79_v62, %v5584_v25  ;;  %v5604_v52 = vand.u32 4294901760, %v78_v45 }
 0x183   :  { %6887 = vst [vmem:[#allocation22_spill] sm:$0xff] %v5573_v42  ;;  %v1398_v9 = vsub.f32 %v5561_v13, %v5573_v42  ;;  %v645_v36 = vadd.f32 %v5401_v32, %v547_v4  ;;  %v706_v47 = vadd.f32 %v5444_v17, %v649_v40  ;;  %v5617_v39 = vand.u32 4294901760, %v1404_v41 }
 0x184   :  { %6888 = vst [vmem:[#allocation23_spill] sm:$0xff] %v5576_v61  ;;  %v5599_v10 = vand.u32 4294901760, %v1392_v0  ;;  %1362 = vmatpush.msra.mxu2 %v5584_v25  ;;  %v5620_v49 = vand.u32 4294901760, %v5602_v54  ;;  %v5623_v32 = vsub.f32 %v78_v45, %v5604_v52  ;;  %v653_v17 = vadd.f32 %v5428_v55, %v563_v3 }
 0x185   :  { %v5480_v60 = vpop.f32.mrf.mxu0  ;;  %v5482_v7 = vpop.f32.mrf.mxu1  ;;  %6890 = vst [vmem:[#allocation25_spill] sm:$0xff] %v5602_v54  ;;  %v5609_v31 = vand.u32 4294901760, %v1398_v9  ;;  %v657_v29 = vadd.f32 %v5436_v57, %v571_v34  ;;  %v1048_v38 = vadd.f32 %v5468_v35, %v5474_v44  ;;  %v579_v4 = vadd.f32 %v5442_v12, %v498_v26 }
 0x186   :  { %v5528_v28 = vpop.f32.mrf.mxu2  ;;  %6889 = vst [vmem:[#allocation24_spill] sm:$0xff] %v5599_v10  ;;  %v1052_v56 = vadd.f32 %v5476_v53, %v5480_v60  ;;  %1394 = vmatpush.msra.mxu3 %v5599_v10  ;;  %1364 = vmatpush.msra.mxu2 %v5604_v52  ;;  %v5630_v60 = vand.u32 4294901760, %v77_v51  ;;  %v1410_v55 = vsub.f32 %v5602_v54, %v5620_v49  ;;  %v5642_v57 = vand.u32 4294901760, %v5623_v32 }
 0x187   :  { %v5556_v46 = vpop.f32.mrf.mxu3  ;;  %6891 = vst [vmem:[#allocation26_spill] sm:$0xff] %v5609_v31  ;;  %v701_v35 = vadd.f32 %v5438_v6, %v645_v36  ;;  %v759_v44 = vadd.f32 %v5440_v11, %v706_v47  ;;  %v5649_v12 = vand.u32 4294901760, %v76_v30  ;;  %v711_v34 = vadd.f32 %v5452_v22, %v653_v17 }
 0x188   :  { %6892 = vst [vmem:[#allocation27_spill] sm:$0xff] %v5617_v39  ;;  %1400 = vmatpush.msra.mxu3 %v5609_v31  ;;  %v5647_v0 = vsub.f32 %v77_v51, %v5630_v60  ;;  %1366 = vmatpush.msra.mxu2 %v5630_v60  ;;  %v5657_v3 = vand.u32 4294901760, %v1410_v55  ;;  %v1416_v6 = vsub.f32 %v5623_v32, %v5642_v57  ;;  %v5703_v55 = vpop.permute.xlu2 %1301 }
 0x189   :  { %6893 = vst [vmem:[#allocation28_spill] sm:$0xff] %v5620_v49  ;;  %v1104_v9 = vadd.f32 %v5503_v14, %v1048_v38  ;;  %v5669_v45 = vsub.f32 %v76_v30, %v5649_v12  ;;  %v716_v47 = vadd.f32 %v5458_v18, %v657_v29  ;;  %v753_v38 = vadd.f32 %v5432_v2, %v701_v35 }
 0x18a   :  { %6894 = vst [vmem:[#allocation29_spill] sm:$0xff] %v5623_v32  ;;  %1406 = vmatpush.msra.mxu3 %v5617_v39  ;;  %v5666_v41 = vand.u32 4294901760, %v5647_v0  ;;  %1368 = vmatpush.msra.mxu2 %v5649_v12  ;;  %v5676_v36 = vand.u32 4294901760, %v1416_v6 }
 0x18b   :  { %6895 = vst [vmem:[#allocation30_spill] sm:$0xff] %v5642_v57  ;;  %v1156_v29 = vadd.f32 %v5513_v24, %v1104_v9  ;;  %v771_v24 = vadd.f32 %v5454_v23, %v716_v47  ;;  %v6912_v47 = vld [vmem:[#allocation12_spill] sm:$0xff] }
 0x18c   :  { %6896 = vst [vmem:[#allocation31_spill] sm:$0xff] %v5647_v0  ;;  %1412 = vmatpush.msra.mxu3 %v5657_v3  ;;  %v1422_v17 = vsub.f32 %v5647_v0, %v5666_v41 }
 0x18d   :  { %v5488_v21 = vpop.f32.mrf.mxu0  ;;  %v5490_v16 = vpop.f32.mrf.mxu1  ;;  %6897 = vst [vmem:[#allocation32_spill] sm:$0xff] %v5657_v3 }
 0x18e   :  { %v1113_v43 = vpop.f32.mrf.mxu2  ;;  %v1056_v62 = vadd.f32 %v5482_v7, %v5488_v21  ;;  %v75_v21 = vld [vmem:[%s6794_s8 + $0x8] sm:$0xff]  ;;  %v1109_v7 = vadd.f32 %v5528_v28, %v1052_v56  ;;  %6898 = vst [vmem:[#allocation33_spill] sm:$0xff] %v5666_v41  ;;  %v74_v28 = vld [vmem:[%s6794_s8] sm:$0xff]  ;;  %1418 = vmatpush.msra.mxu3 %v5676_v36  ;;  %v5705_v6 = vand.u32 4294901760, %v1422_v17 }
 0x18f   :  { %v1167_v40 = vpop.f32.mrf.mxu3  ;;  %v5661_v11 = vand.u32 4294901760, %v75_v21  ;;  %6899 = vst [vmem:[#allocation34_spill] sm:$0xff] %v5669_v45  ;;  %v5681_v14 = vand.u32 4294901760, %v74_v28 }
 0x190   :  { %v1114_v26 = vadd.f32 %v1113_v43, %v1056_v62  ;;  %6900 = vst [vmem:[#allocation35_spill] sm:$0xff] %v5676_v36  ;;  %v5689_v43 = vand.u32 4294901760, %v5669_v45  ;;  %v1162_v30 = vadd.f32 %v5556_v46, %v1109_v7  ;;  %1424 = vmatpush.msra.mxu3 %v5705_v6 }
 0x191   :  { %v5679_v22 = vsub.f32 %v75_v21, %v5661_v11  ;;  %6902 = vst [vmem:[#allocation37_spill] sm:$0xff] %v5681_v14  ;;  %1370 = vmatpush.msra.mxu2 %v5661_v11 }
 0x192   :  { %6903 = vst [vmem:[#allocation38_spill] sm:$0xff] %v5689_v43  ;;  %v1428_v2 = vsub.f32 %v5669_v45, %v5689_v43  ;;  %v1168_v46 = vadd.f32 %v1167_v40, %v1114_v26 }
 0x193   :  { %6901 = vst [vmem:[#allocation36_spill] sm:$0xff] %v5679_v22  ;;  %v5696_v18 = vand.u32 4294901760, %v5679_v22  ;;  %1372 = vmatpush.msra.mxu2 %v5681_v14 }
 0x194   :  { %6906 = vst [vmem:[#allocation41_spill] sm:$0xff] %v5705_v6  ;;  %v5719_v9 = vand.u32 4294901760, %v1428_v2  ;;  %v6915_v2 = vld [vmem:[#allocation11_spill] sm:$0xff] }
 0x195   :  { %v5498_v1 = vpop.f32.mrf.mxu0  ;;  %v5500_v37 = vpop.f32.mrf.mxu1  ;;  %6904 = vst [vmem:[#allocation39_spill] sm:$0xff] %v5696_v18  ;;  %v1434_v7 = vsub.f32 %v5679_v22, %v5696_v18  ;;  %1457 = vmatpush.msrb.mxu2 %v5551_v5 }
 0x196   :  { %v1060_v51 = vadd.f32 %v5490_v16, %v5498_v1  ;;  %v1118_v62 = vpop.f32.mrf.mxu2  ;;  %v5699_v16 = vsub.f32 %v74_v28, %v5681_v14  ;;  %v765_v1 = vadd.f32 %v5446_v19, %v711_v34  ;;  %v829_v19 = vadd.f32 %v5462_v27, %v759_v44  ;;  %6908 = vst [vmem:[#allocation43_spill] sm:$0xff] %v5719_v9  ;;  %v6911_v27 = vld [vmem:[#allocation7_spill] sm:$0xff] }
 0x197   :  { %v5722_v26 = vand.u32 4294901760, %v1434_v7  ;;  %1460 = vmatpush.msrb.mxu2 %v5561_v13  ;;  %v825_v44 = vadd.f32 %v6911_v27, %v753_v38  ;;  %v1173_v23 = vpop.f32.mrf.mxu3  ;;  %1430 = vmatpush.msra.mxu3 %v5719_v9  ;;  %v6916_v38 = vld [vmem:[#allocation10_spill] sm:$0xff] }
 0x198   :  { %6905 = vst [vmem:[#allocation40_spill] sm:$0xff] %v5699_v16  ;;  %v5713_v28 = vand.u32 4294901760, %v5699_v16  ;;  %v1119_v34 = vadd.f32 %v1118_v62, %v1060_v51  ;;  %v833_v51 = vadd.f32 %v6912_v47, %v765_v1  ;;  %v875_v7 = vadd.f32 %v6916_v38, %v829_v19  ;;  %v6920_v19 = vld [vmem:[#allocation9_spill] sm:$0xff] }
 0x199   :  { %6909 = vst [vmem:[#allocation44_spill] sm:$0xff] %v5722_v26  ;;  %1463 = vmatpush.msrb.mxu2 %v5564_v50  ;;  %1436 = vmatpush.msra.mxu3 %v5722_v26 }
 0x19a   :  { %6907 = vst [vmem:[#allocation42_spill] sm:$0xff] %v5713_v28  ;;  %v1440_v17 = vsub.f32 %v5699_v16, %v5713_v28 }
 0x19b   :  { %1466 = vmatpush.msrb.mxu2 %v5602_v54 }
 0x19d   :  { %v5519_v33 = vpop.f32.mrf.mxu0  ;;  %v5524_v20 = vpop.f32.mrf.mxu1  ;;  %1469 = vmatpush.msrb.mxu2 %v5623_v32 }
 0x19f   :  { %1472 = vmatpush.msrb.mxu2 %v5647_v0  ;;  %v1179_v38 = vpop.f32.mrf.mxu3 }
 0x1a1   :  { %1475 = vmatpush.msrb.mxu2 %v5669_v45 }
 0x1a3   :  { %1478 = vmatpush.msrb.mxu2 %v5679_v22 }
 0x1a5   :  { %v5558_v48 = vpop.f32.mrf.mxu0  ;;  %v5589_v63 = vpop.f32.mrf.mxu1  ;;  %1481 = vmatpush.msrb.mxu2 %v5699_v16 }
 0x1a6   :  { %v1228_v40 = vadd.f32 %v5558_v48, %v1156_v29  ;;  %v5732_v48 = vand.u32 4294901760, %v1440_v17  ;;  %v6914_v29 = vld [vmem:[#allocation14_spill] sm:$0xff] }
 0x1a8   :  { %v1274_v1 = vadd.f32 %v5524_v20, %v1228_v40  ;;  %1442 = vmatpush.msra.mxu3 %v5732_v48  ;;  %v6919_v20 = vld [vmem:[#allocation15_spill] sm:$0xff] }
 0x1aa   :  { %1496 = vmatpush.msrb.mxu3 %v5535_v15 }
 0x1ac   :  { %1498 = vmatpush.msrb.mxu3 %v5544_v58 }
 0x1ad   :  { %v1231_v53 = vpop.f32.mrf.mxu0  ;;  %v1281_v56 = vpop.f32.mrf.mxu1 }
 0x1ae   :  { %v1232_v35 = vadd.f32 %v1231_v53, %v1162_v30  ;;  %v6910_v30 = vld [vmem:[#allocation6_spill] sm:$0xff]  ;;  %1500 = vmatpush.msrb.mxu3 %v5546_v8 }
 0x1af   :  { %v661_v5 = vadd.f32 %v6910_v30, %v579_v4  ;;  %6913 = vst [vmem:[#allocation6_spill] sm:$0xff] %v5732_v48  ;;  %v1064_v4 = vadd.f32 %v5500_v37, %v5519_v33  ;;  %v1174_v30 = vadd.f32 %v1173_v23, %v1119_v34 }
 0x1b0   :  { %v1278_v62 = vadd.f32 %v5589_v63, %v1232_v35  ;;  %v6917_v63 = vld [vmem:[#allocation8_spill] sm:$0xff]  ;;  %1502 = vmatpush.msrb.mxu3 %v5584_v25 }
 0x1b1   :  { %v871_v35 = vadd.f32 %v6917_v63, %v825_v44 }
 0x1b2   :  { %v5746_v37 = vadd.f32 %v1278_v62, %v875_v7  ;;  %v5760_v62 = vpop.permute.xlu0 %1311  ;;  %v5769_v7 = vpop.permute.xlu1 %1316  ;;  %1504 = vmatpush.msrb.mxu3 %v5604_v52 }
 0x1b3   :  { %v5754_v44 = vadd.f32 %v1274_v1, %v871_v35 }
 0x1b4   :  { %1506 = vmatpush.msrb.mxu3 %v5630_v60 }
 0x1b5   :  { %v1235_v21 = vpop.f32.mrf.mxu0  ;;  %v1285_v17 = vpop.f32.mrf.mxu1  ;;  %v1324_v1 = vmul.f32 %v5703_v55, %v5754_v44 }
 0x1b6   :  { %v1236_v53 = vadd.f32 %v1235_v21, %v1168_v46  ;;  %v837_v21 = vadd.f32 %v6914_v29, %v771_v24  ;;  %v721_v46 = vadd.f32 %v6915_v2, %v661_v5  ;;  %v6918_v5 = vld [vmem:[#allocation13_spill] sm:$0xff]  ;;  %v1123_v29 = vpop.f32.mrf.mxu2  ;;  %1508 = vmatpush.msrb.mxu3 %v5649_v12 }
 0x1b7   :  { %v879_v24 = vadd.f32 %v6918_v5, %v833_v51  ;;  %v1124_v40 = vadd.f32 %v1123_v29, %v1064_v4 }
 0x1b8   :  { %v1282_v27 = vadd.f32 %v1281_v56, %v1236_v53  ;;  %v883_v56 = vadd.f32 %v6919_v20, %v837_v21  ;;  %v777_v34 = vadd.f32 %v6920_v19, %v721_v46  ;;  %v5752_v53 = vpop.permute.xlu2 %1306  ;;  %v6921_v46 = vld [vmem:[#allocation16_spill] sm:$0xff]  ;;  %1510 = vmatpush.msrb.mxu3 %v5661_v11 }
 0x1b9   :  { %v1325_v2 = vmul.f32 %v5752_v53, %v5746_v37 }
 0x1ba   :  { %v5756_v23 = vadd.f32 %v1282_v27, %v879_v24  ;;  %v841_v4 = vadd.f32 %v6921_v46, %v777_v34  ;;  %v6922_v24 = vld [vmem:[#allocation17_spill] sm:$0xff]  ;;  %1512 = vmatpush.msrb.mxu3 %v5681_v14 }
 0x1bb   :  { %v1330_v35 = vsel %vm36_vm0, %v1325_v2, 0.0 }
 0x1bc   :  { %v1326_v27 = vmul.f32 %v5760_v62, %v5756_v23  ;;  %v887_v29 = vadd.f32 %v6922_v24, %v841_v4 }
 0x1bd   :  { %v1239_v47 = vpop.f32.mrf.mxu0  ;;  %v1289_v5 = vpop.f32.mrf.mxu1 }
 0x1be   :  { %v1240_v33 = vadd.f32 %v1239_v47, %v1174_v30  ;;  %v1180_v30 = vadd.f32 %v1179_v38, %v1124_v40  ;;  %v1332_v20 = vsel %vm36_vm0, %v1326_v27, 0.0 }
 0x1c0   :  { %v1286_v51 = vadd.f32 %v1285_v17, %v1240_v33  ;;  %v1329_v33 = vsel %vm36_vm0, %v1324_v1, 0.0 }
 0x1c1   :  { %v1331_v19 = vadd.f32 %v1330_v35, %v1329_v33 }
 0x1c2   :  { %v5764_v21 = vadd.f32 %v1286_v51, %v883_v56  ;;  %v5790_v51 = vpop.permute.xlu2 %1321 }
 0x1c3   :  { %v1333_v2 = vadd.f32 %v1332_v20, %v1331_v19  ;;  %v73_v19 = vld [vmem:[%s6793_s7] sm:$0xf] }
 0x1c4   :  { %v1327_v17 = vmul.f32 %v5769_v7, %v5764_v21 }
 0x1c5   :  { %v1243_v63 = vpop.f32.mrf.mxu0 }
 0x1c6   :  { %v1244_v47 = vadd.f32 %v1243_v63, %v1180_v30  ;;  %v1334_v34 = vsel %vm36_vm0, %v1327_v17, 0.0 }
 0x1c7   :  { %v1335_v4 = vadd.f32 %v1334_v34, %v1333_v2  ;;  %v1605_v34 = vsel %vm1603_vm4, %v73_v19, 0 }
 0x1c8   :  { %v1290_v56 = vadd.f32 %v1289_v5, %v1244_v47  ;;  %v5819_v2 = vand.u32 4294901760, %v1605_v34 }
 0x1ca   :  { %v5787_v40 = vadd.f32 %v1290_v56, %v887_v29  ;;  %6923 = vst [vmem:[#allocation7_spill] sm:$0xff] %v5819_v2  ;;  %1623 = vmatpush.msrb.mxu0 %v5819_v2 }
 0x1cc   :  { %v1328_v46 = vmul.f32 %v5790_v51, %v5787_v40 }
 0x1ce   :  { %v1337_v38 = vsel %vm1336_vm3, %v1328_v46, 0.0  ;;  %v5823_v46 = vsub.f32 %v1605_v34, %v5819_v2 }
 0x1cf   :  { %v1338_v30 = vadd.f32 %v1337_v38, %v1335_v4 }
 0x1d0   :  { %6924 = vst [vmem:[#allocation12_spill] sm:$0xff] %v5823_v46  ;;  %v5828_v4 = vand.u32 4294901760, %v5823_v46 }
 0x1d1   :  { %v1339_v1 = vrot.slane %v1338_v30, 4 }
 0x1d2   :  { %6925 = vst [vmem:[#allocation14_spill] sm:$0xff] %v5828_v4  ;;  %v1651_v38 = vsub.f32 %v5823_v46, %v5828_v4  ;;  %1725 = vmatpush.msra.mxu0 %v5828_v4 }
 0x1d3   :  { %v1340_v27 = vadd.f32 %v1339_v1, %v1338_v30 }
 0x1d4   :  { %v5838_v30 = vand.u32 4294901760, %v1651_v38 }
 0x1d5   :  { %v1341_v63 = vrot.slane %v1340_v27, 2 }
 0x1d6   :  { %6926 = vst [vmem:[#allocation11_spill] sm:$0xff] %v5838_v30  ;;  %1653 = vmatpush.msrb.mxu1 %v5838_v30 }
 0x1d7   :  { %v1342_v35 = vadd.f32 %v1341_v63, %v1340_v27 }
 0x1d8   :  { %1747 = vmatpush.msra.mxu1 %v5819_v2 }
 0x1d9   :  { %v1343_v17 = vrot.slane %v1342_v35, 1 }
 0x1db   :  { %v1344_v47 = vadd.f32 %v1343_v17, %v1342_v35 }
 0x1dd   :  { %v1346_v5 = vsel %vm36_vm0, %v1344_v47, 0 }
 0x1de   :  { %v1373_v24 = vand.u32 4294901760, %v1346_v5 }
 0x1e0   :  { %v1374_v29 = vsub.f32 %v1346_v5, %v1373_v24  ;;  %1444 = vmatmul.f32.vlgmr.msra.gmra.mxu3 %v1373_v24 }
 0x1e1   :  { %1576 = vmatpush.msra.mxu3 %v5535_v15 }
 0x1e2   :  { %v1375_v33 = vand.u32 4294901760, %v1374_v29 }
 0x1e3   :  { %1578 = vmatpush.msra.mxu3 %v5544_v58 }
 0x1e4   :  { %v1376_v20 = vsub.f32 %v1374_v29, %v1375_v33 }
 0x1e5   :  { %1580 = vmatpush.msra.mxu3 %v5546_v8 }
 0x1e6   :  { %v1377_v56 = vand.u32 4294901760, %v1376_v20 }
 0x1e7   :  { %1582 = vmatpush.msra.mxu3 %v5584_v25 }
 0x1e8   :  { %1378 = vmatmul.f32.vlgmr.msra.gmra.mxu2 %v1377_v56  ;;  %1516 = vmatmul.f32.vlgmr.msrb.gmra.mxu3 %v1375_v33 }
 0x1e9   :  { %1530 = vmatpush.msra.mxu2 %v5568_v59  ;;  %1584 = vmatpush.msra.mxu3 %v5604_v52 }
 0x1eb   :  { %1534 = vmatpush.msra.mxu2 %v5573_v42  ;;  %1586 = vmatpush.msra.mxu3 %v5630_v60 }
 0x1ed   :  { %1538 = vmatpush.msra.mxu2 %v5576_v61  ;;  %1588 = vmatpush.msra.mxu3 %v5649_v12 }
 0x1ef   :  { %1542 = vmatpush.msra.mxu2 %v5620_v49  ;;  %1590 = vmatpush.msra.mxu3 %v5661_v11 }
 0x1f0   :  { %1484 = vmatmul.f32.vlgmr.msrb.gmra.mxu2 %v1374_v29 }
 0x1f1   :  { %1546 = vmatpush.msra.mxu2 %v5642_v57  ;;  %1592 = vmatpush.msra.mxu3 %v5681_v14 }
 0x1f2   :  { %1594 = vmatmul.f32.vlgmr.msra.gmra.mxu3 %v1373_v24 }
 0x1f3   :  { %1550 = vmatpush.msra.mxu2 %v5666_v41  ;;  %1699 = vmatpush.msrb.mxu3 %v5819_v2 }
 0x1f5   :  { %1554 = vmatpush.msra.mxu2 %v5689_v43  ;;  %1833 = vmatpush.msra.mxu3 %v5599_v10 }
 0x1f7   :  { %1558 = vmatpush.msra.mxu2 %v5696_v18  ;;  %1839 = vmatpush.msra.mxu3 %v5609_v31 }
 0x1f9   :  { %1562 = vmatpush.msra.mxu2 %v5713_v28  ;;  %1845 = vmatpush.msra.mxu3 %v5617_v39 }
 0x1fa   :  { %1564 = vmatmul.f32.vlgmr.msra.gmra.mxu2 %v1373_v24 }
 0x1fb   :  { %1676 = vmatpush.msrb.mxu2 %v5823_v46  ;;  %1851 = vmatpush.msra.mxu3 %v5657_v3 }
 0x1fd   :  { %1795 = vmatpush.msra.mxu2 %v5535_v15  ;;  %1857 = vmatpush.msra.mxu3 %v5676_v36 }
 0x1ff   :  { %1797 = vmatpush.msra.mxu2 %v5544_v58  ;;  %1863 = vmatpush.msra.mxu3 %v5705_v6 }
 0x201   :  { %1799 = vmatpush.msra.mxu2 %v5546_v8  ;;  %1869 = vmatpush.msra.mxu3 %v5719_v9 }
 0x203   :  { %1801 = vmatpush.msra.mxu2 %v5584_v25  ;;  %1875 = vmatpush.msra.mxu3 %v5722_v26 }
 0x205   :  { %1803 = vmatpush.msra.mxu2 %v5604_v52  ;;  %1881 = vmatpush.msra.mxu3 %v5732_v48 }
 0x207   :  { %1805 = vmatpush.msra.mxu2 %v5630_v60 }
 0x209   :  { %1807 = vmatpush.msra.mxu2 %v5649_v12 }
 0x20b   :  { %1809 = vmatpush.msra.mxu2 %v5661_v11 }
 0x20d   :  { %1811 = vmatpush.msra.mxu2 %v5681_v14 }
 0x263   :  { %v1445_v1 = vpop.f32.mrf.mxu3 }
 0x26b   :  { %v1379_v27 = vpop.f32.mrf.mxu2  ;;  %v1517_v35 = vpop.f32.mrf.mxu3 }
 0x26c   :  { %v1446_v17 = vadd.f32 %v1445_v1, %v1379_v27 }
 0x273   :  { %v1485_v63 = vpop.f32.mrf.mxu2 }
 0x274   :  { %v1486_v47 = vadd.f32 %v1485_v63, %v1446_v17  ;;  %v6927_v63 = vld [vmem:[#allocation18_spill] sm:$0xff] }
 0x275   :  { %v1595_v33 = vpop.f32.mrf.mxu3 }
 0x276   :  { %v1518_v5 = vadd.f32 %v1517_v35, %v1486_v47 }
 0x27d   :  { %v1565_v24 = vpop.f32.mrf.mxu2 }
 0x27e   :  { %v1566_v29 = vadd.f32 %v1565_v24, %v1518_v5 }
 0x280   :  { %v1596_v20 = vadd.f32 %v1595_v33, %v1566_v29 }
 0x282   :  { %v5855_v56 = vmul.f32 0.001953125, %v1596_v20 }
 0x284   :  { %v1601_v19 = vsel %vm1599_vm5, %v5855_v56, 0 }
 0x285   :  { %v1624_v34 = vand.u32 4294901760, %v1601_v19 }
 0x287   :  { %v1625_v38 = vsub.f32 %v1601_v19, %v1624_v34  ;;  %1655 = vmatmul.f32.vlgmr.msrb.gmra.mxu1 %v1624_v34 }
 0x288   :  { %1935 = vmatpush.msrb.mxu1 %v5535_v15 }
 0x289   :  { %1679 = vmatmul.f32.vlgmr.msrb.gmra.mxu2 %v1625_v38  ;;  %v1626_v48 = vand.u32 4294901760, %v1625_v38 }
 0x28a   :  { %1937 = vmatpush.msrb.mxu1 %v5544_v58  ;;  %1969 = vmatpush.msrb.mxu2 %v5568_v59 }
 0x28b   :  { %v1627_v1 = vsub.f32 %v1625_v38, %v1626_v48  ;;  %1703 = vmatmul.f32.vlgmr.msrb.gmra.mxu3 %v1626_v48 }
 0x28c   :  { %1939 = vmatpush.msrb.mxu1 %v5546_v8  ;;  %2015 = vmatpush.msrb.mxu3 %v5535_v15 }
 0x28d   :  { %v1628_v27 = vand.u32 4294901760, %v1627_v1  ;;  %1973 = vmatpush.msrb.mxu2 %v5573_v42 }
 0x28e   :  { %1941 = vmatpush.msrb.mxu1 %v5584_v25  ;;  %2017 = vmatpush.msrb.mxu3 %v5544_v58 }
 0x28f   :  { %1629 = vmatmul.f32.vlgmr.msrb.gmra.mxu0 %v1628_v27  ;;  %1749 = vmatmul.f32.vlgmr.msra.gmra.mxu1 %v1624_v34 }
 0x290   :  { %1896 = vmatpush.msrb.mxu0 %v6927_v63  ;;  %1943 = vmatpush.msrb.mxu1 %v5604_v52 }
 0x291   :  { %2019 = vmatpush.msrb.mxu3 %v5546_v8  ;;  %1977 = vmatpush.msrb.mxu2 %v5576_v61 }
 0x292   :  { %1899 = vmatpush.msrb.mxu0 %v5561_v13  ;;  %1945 = vmatpush.msrb.mxu1 %v5630_v60 }
 0x293   :  { %2021 = vmatpush.msrb.mxu3 %v5584_v25  ;;  %1981 = vmatpush.msrb.mxu2 %v5620_v49 }
 0x294   :  { %1902 = vmatpush.msrb.mxu0 %v5564_v50  ;;  %1947 = vmatpush.msrb.mxu1 %v5649_v12 }
 0x295   :  { %2023 = vmatpush.msrb.mxu3 %v5604_v52  ;;  %1985 = vmatpush.msrb.mxu2 %v5642_v57 }
 0x296   :  { %1905 = vmatpush.msrb.mxu0 %v5602_v54  ;;  %1949 = vmatpush.msrb.mxu1 %v5661_v11 }
 0x297   :  { %1727 = vmatmul.f32.vlgmr.msra.gmra.mxu0 %v1624_v34  ;;  %2025 = vmatpush.msrb.mxu3 %v5630_v60 }
 0x298   :  { %1908 = vmatpush.msrb.mxu0 %v5623_v32  ;;  %1951 = vmatpush.msrb.mxu1 %v5681_v14 }
 0x299   :  { %2027 = vmatpush.msrb.mxu3 %v5649_v12  ;;  %1989 = vmatpush.msrb.mxu2 %v5666_v41 }
 0x29a   :  { %1911 = vmatpush.msrb.mxu0 %v5647_v0  ;;  %2101 = vmatpush.msra.mxu1 %v5838_v30 }
 0x29b   :  { %2029 = vmatpush.msrb.mxu3 %v5661_v11  ;;  %1993 = vmatpush.msrb.mxu2 %v5689_v43 }
 0x29c   :  { %1914 = vmatpush.msrb.mxu0 %v5669_v45 }
 0x29d   :  { %2031 = vmatpush.msrb.mxu3 %v5681_v14  ;;  %1997 = vmatpush.msrb.mxu2 %v5696_v18 }
 0x29e   :  { %1917 = vmatpush.msrb.mxu0 %v5679_v22 }
 0x29f   :  { %2001 = vmatpush.msrb.mxu2 %v5713_v28 }
 0x2a0   :  { %1920 = vmatpush.msrb.mxu0 %v5699_v16 }
 0x2a2   :  { %2071 = vmatpush.msra.mxu0 %v5819_v2 }
 0x304   :  { %v1656_v48 = vpop.f32.mrf.mxu1 }
 0x30c   :  { %v1630_v35 = vpop.f32.mrf.mxu0  ;;  %v1680_v47 = vpop.f32.mrf.mxu2 }
 0x30d   :  { %v1657_v17 = vadd.f32 %v1656_v48, %v1630_v35  ;;  %v1750_v19 = vpop.f32.mrf.mxu1 }
 0x30e   :  { %v1704_v24 = vpop.f32.mrf.mxu3 }
 0x30f   :  { %v1681_v5 = vadd.f32 %v1680_v47, %v1657_v17 }
 0x311   :  { %v1705_v29 = vadd.f32 %v1704_v24, %v1681_v5 }
 0x314   :  { %v1728_v33 = vpop.f32.mrf.mxu0 }
 0x315   :  { %v1729_v20 = vadd.f32 %v1728_v33, %v1705_v29 }
 0x317   :  { %v1751_v34 = vadd.f32 %v1750_v19, %v1729_v20 }
 0x319   :  { %v1753_v38 = vperm.slane %v1751_v34, 0 }
 0x31b   :  { %v1754_v1 = vsub.f32 %v5754_v44, %v1753_v38  ;;  %v1755_v27 = vsub.f32 %v5746_v37, %v1753_v38  ;;  %v1756_v28 = vsub.f32 %v5756_v23, %v1753_v38  ;;  %v1757_v18 = vsub.f32 %v5764_v21, %v1753_v38 }
 0x31c   :  { %v1758_v43 = vsub.f32 %v5787_v40, %v1753_v38 }
 0x31d   :  { %v1759_v48 = vmul.f32 %v1754_v1, %v5703_v55  ;;  %v1760_v35 = vmul.f32 %v1755_v27, %v5752_v53  ;;  %v1761_v17 = vmul.f32 %v1756_v28, %v5760_v62  ;;  %v1762_v47 = vmul.f32 %v1757_v18, %v5769_v7 }
 0x31e   :  { %v1763_v5 = vmul.f32 %v1758_v43, %v5790_v51 }
 0x31f   :  { %v1764_v24 = vmul.f32 %v1759_v48, %v1759_v48  ;;  %v1765_v29 = vmul.f32 %v1760_v35, %v1760_v35  ;;  %v1766_v33 = vmul.f32 %v1761_v17, %v1761_v17  ;;  %v1767_v20 = vmul.f32 %v1762_v47, %v1762_v47 }
 0x320   :  { %v1768_v38 = vmul.f32 %v1763_v5, %v1763_v5 }
 0x321   :  { %v1769_v19 = vsel %vm36_vm0, %v1764_v24, 0.0  ;;  %v1770_v34 = vsel %vm36_vm0, %v1765_v29, 0.0  ;;  %v1772_v1 = vsel %vm36_vm0, %v1766_v33, 0.0  ;;  %v1774_v27 = vsel %vm36_vm0, %v1767_v20, 0.0 }
 0x322   :  { %v1771_v41 = vadd.f32 %v1770_v34, %v1769_v19  ;;  %v1776_v18 = vsel %vm1336_vm3, %v1768_v38, 0.0 }
 0x324   :  { %v1773_v57 = vadd.f32 %v1772_v1, %v1771_v41 }
 0x326   :  { %v1775_v28 = vadd.f32 %v1774_v27, %v1773_v57 }
 0x328   :  { %v1777_v49 = vadd.f32 %v1776_v18, %v1775_v28 }
 0x32a   :  { %v1778_v43 = vrot.slane %v1777_v49, 4 }
 0x32c   :  { %v1779_v48 = vadd.f32 %v1778_v43, %v1777_v49 }
 0x32e   :  { %v1780_v35 = vrot.slane %v1779_v48, 2 }
 0x330   :  { %v1781_v17 = vadd.f32 %v1780_v35, %v1779_v48 }
 0x332   :  { %v1782_v47 = vrot.slane %v1781_v17, 1 }
 0x334   :  { %v1783_v61 = vadd.f32 %v1782_v47, %v1781_v17 }
 0x336   :  { %v1785_v24 = vsel %vm36_vm0, %v1783_v61, 0 }
 0x337   :  { %v1812_v29 = vand.u32 4294901760, %v1785_v24 }
 0x339   :  { %1883 = vmatmul.f32.vlgmr.msra.gmra.mxu3 %v1812_v29  ;;  %v1813_v5 = vsub.f32 %v1785_v24, %v1812_v29 }
 0x33a   :  { %2195 = vmatpush.msra.mxu3 %v5819_v2 }
 0x33b   :  { %1923 = vmatmul.f32.vlgmr.msrb.gmra.mxu0 %v1813_v5  ;;  %v1814_v41 = vand.u32 4294901760, %v1813_v5 }
 0x33c   :  { %2124 = vmatpush.msrb.mxu0 %v5823_v46 }
 0x33d   :  { %1955 = vmatmul.f32.vlgmr.msrb.gmra.mxu1 %v1814_v41  ;;  %v1815_v57 = vsub.f32 %v1813_v5, %v1814_v41  ;;  %v1297_v41 = vld [vmem:[%s6789_s3] sm:$0x1] }
 0x33e   :  { %2147 = vmatpush.msrb.mxu1 %v5819_v2 }
 0x33f   :  { %v1816_v49 = vand.u32 4294901760, %v1815_v57 }
 0x341   :  { %1817 = vmatmul.f32.vlgmr.msra.gmra.mxu2 %v1816_v49  ;;  %2033 = vmatmul.f32.vlgmr.msrb.gmra.mxu3 %v1812_v29 }
 0x342   :  { %2173 = vmatpush.msra.mxu2 %v5828_v4  ;;  %2296 = vmatpush.msrb.mxu3 %v5819_v2 }
 0x349   :  { %2003 = vmatmul.f32.vlgmr.msrb.gmra.mxu2 %v1812_v29 }
 0x34a   :  { %2273 = vmatpush.msrb.mxu2 %v5823_v46 }
 0x3b8   :  { %v1924_v19 = vpop.f32.mrf.mxu0 }
 0x3ba   :  { %v1956_v38 = vpop.f32.mrf.mxu1 }
 0x3bc   :  { %v1884_v61 = vpop.f32.mrf.mxu3 }
 0x3c4   :  { %v1818_v33 = vpop.f32.mrf.mxu2  ;;  %v2034_v18 = vpop.f32.mrf.mxu3 }
 0x3c5   :  { %v1885_v20 = vadd.f32 %v1884_v61, %v1818_v33  ;;  %v1298_v33 = vld [vmem:[%s6790_s4] sm:$0x1] }
 0x3c7   :  { %v1925_v34 = vadd.f32 %v1924_v19, %v1885_v20 }
 0x3c9   :  { %v1957_v1 = vadd.f32 %v1956_v38, %v1925_v34 }
 0x3cc   :  { %v2004_v27 = vpop.f32.mrf.mxu2 }
 0x3cd   :  { %v2005_v28 = vadd.f32 %v2004_v27, %v1957_v1 }
 0x3cf   :  { %v2035_v43 = vadd.f32 %v2034_v18, %v2005_v28 }
 0x3d1   :  { %v2037_v48 = vmul.f32 0.001953125, %v2035_v43 }
 0x3d3   :  { %v2038_v35 = vadd.f32 1e-05, %v2037_v48 }
 0x3d5   :  { %4699 = vrsqrt.f32 %v2038_v35  ;;  %vm2045_vm7 = vweird.f32 %v2038_v35 }
 0x3db   :  { %v4700_v17 = vpop.eup %4699 }
 0x3dc   :  { %v2040_v47 = vmul.f32 %v4700_v17, %v2038_v35  ;;  %vm2046_vm6 = vweird.f32 %v4700_v17 }
 0x3dd   :  { %vm2047_vm8 = vmor %vm2045_vm7, %vm2046_vm6 }
 0x3de   :  { %v2041_v24 = vmul.f32 %v4700_v17, %v2040_v47 }
 0x3e0   :  { %v2042_v29 = vmul.f32 0.5, %v2041_v24 }
 0x3e2   :  { %v2043_v5 = vsub.f32 1.5, %v2042_v29 }
 0x3e4   :  { %v2044_v57 = vmul.f32 %v4700_v17, %v2043_v5  ;;  %v2404_v5 = vld [vmem:[%s6788_s2 + $0x88] sm:$0xff] }
 0x3e6   :  { %v2048_v49 = vsel %vm2047_vm8, %v4700_v17, %v2044_v57  ;;  %v2403_v57 = vld [vmem:[%s6788_s2 + $0x80] sm:$0xff] }
 0x3e7   :  { %v2049_v61 = vmul.f32 %v2048_v49, %v1297_v41  ;;  %v5935_v41 = vand.u32 4294901760, %v2404_v5 }
 0x3e9   :  { %v2050_v20 = vmul.f32 %v2049_v61, %v5855_v56  ;;  %v2053_v19 = vsel %vm1599_vm5, %v2049_v61, 0  ;;  %v5941_v49 = vsub.f32 %v2404_v5, %v5935_v41  ;;  %v5943_v61 = vand.u32 4294901760, %v2403_v57 }
 0x3ea   :  { %v2072_v34 = vand.u32 4294901760, %v2053_v19 }
 0x3eb   :  { %v2051_v38 = vsub.f32 %v1298_v33, %v2050_v20  ;;  %v2402_v33 = vld [vmem:[%s6788_s2 + $0x78] sm:$0xff] }
 0x3ec   :  { %v2073_v1 = vsub.f32 %v2053_v19, %v2072_v34  ;;  %2103 = vmatmul.f32.vlgmr.msra.gmra.mxu1 %v2072_v34  ;;  %2175 = vmatmul.f32.vlgmr.msra.gmra.mxu2 %v2072_v34  ;;  %v6815_v19 = vand.u32 4294901760, %v5941_v49 }
 0x3ed   :  { %2197 = vmatmul.f32.vlgmr.msra.gmra.mxu3 %v2072_v34  ;;  %v2202_v27 = vsel %vm1599_vm5, %v2051_v38, 0  ;;  %2250 = vmatpush.msra.mxu1 %v5838_v30  ;;  %v5952_v34 = vsub.f32 %v2403_v57, %v5943_v61  ;;  %v5955_v38 = vand.u32 4294901760, %v2402_v33 }
 0x3ee   :  { %v2074_v28 = vand.u32 4294901760, %v2073_v1  ;;  %v2221_v18 = vand.u32 4294901760, %v2202_v27  ;;  %2428 = vmatpush.msra.mxu2 %v5935_v41 }
 0x3f0   :  { %v2075_v43 = vsub.f32 %v2073_v1, %v2074_v28  ;;  %v2222_v48 = vsub.f32 %v2202_v27, %v2221_v18  ;;  %v2401_v27 = vld [vmem:[%s6788_s2 + $0x70] sm:$0xff]  ;;  %2430 = vmatpush.msra.mxu2 %v5943_v61 }
 0x3f2   :  { %v2076_v35 = vand.u32 4294901760, %v2075_v43  ;;  %v2223_v17 = vand.u32 4294901760, %v2222_v48  ;;  %v2496_v43 = vsub.f32 %v5941_v49, %v6815_v19  ;;  %2432 = vmatpush.msra.mxu2 %v5955_v38 }
 0x3f4   :  { %2077 = vmatmul.f32.vlgmr.msra.gmra.mxu0 %v2076_v35  ;;  %2151 = vmatmul.f32.vlgmr.msrb.gmra.mxu1 %v2074_v28  ;;  %v2224_v56 = vsub.f32 %v2222_v48, %v2223_v17  ;;  %v5967_v35 = vsub.f32 %v2402_v33, %v5955_v38  ;;  %v2497_v5 = vand.u32 4294901760, %v2496_v43 }
 0x3f5   :  { %2276 = vmatmul.f32.vlgmr.msrb.gmra.mxu2 %v2222_v48  ;;  %2300 = vmatmul.f32.vlgmr.msrb.gmra.mxu3 %v2223_v17  ;;  %v6820_v48 = vand.u32 4294901760, %v5952_v34  ;;  %v5970_v17 = vand.u32 4294901760, %v2401_v27 }
 0x3f6   :  { %2220 = vmatpush.msra.mxu0 %v5819_v2  ;;  %2344 = vmatpush.msrb.mxu1 %v5819_v2  ;;  %v2225_v47 = vand.u32 4294901760, %v2224_v56  ;;  %v6928_v59 = vand.u32 4294901760, %v5967_v35 }
 0x3f7   :  { %v2502_v57 = vsub.f32 %v5952_v34, %v6820_v48  ;;  %2434 = vmatpush.msra.mxu2 %v5970_v17  ;;  %2498 = vmatpush.msra.mxu3 %v2497_v5 }
 0x3f9   :  { %v2503_v33 = vand.u32 4294901760, %v2502_v57 }
 0x3fb   :  { %2504 = vmatpush.msra.mxu3 %v2503_v33 }
 0x3fc   :  { %2127 = vmatmul.f32.vlgmr.msrb.gmra.mxu0 %v2073_v1  ;;  %2252 = vmatmul.f32.vlgmr.msra.gmra.mxu1 %v2221_v18 }
 0x3fd   :  { %2322 = vmatpush.msrb.mxu0 %v5828_v4  ;;  %2636 = vmatpush.msra.mxu1 %v5935_v41  ;;  %v2508_v4 = vsub.f32 %v5967_v35, %v6928_v59 }
 0x3ff   :  { %2638 = vmatpush.msra.mxu1 %v5943_v61  ;;  %v2509_v5 = vand.u32 4294901760, %v2508_v4 }
 0x401   :  { %2640 = vmatpush.msra.mxu1 %v5955_v38  ;;  %2510 = vmatpush.msra.mxu3 %v2509_v5 }
 0x403   :  { %2642 = vmatpush.msra.mxu1 %v5970_v17 }
 0x404   :  { %2226 = vmatmul.f32.vlgmr.msra.gmra.mxu0 %v2225_v47  ;;  %2346 = vmatmul.f32.vlgmr.msrb.gmra.mxu1 %v2221_v18  ;;  %v2400_v47 = vld [vmem:[%s6788_s2 + $0x68] sm:$0xff] }
 0x405   :  { %2577 = vmatpush.msra.mxu0 %v5941_v49  ;;  %v5995_v46 = vand.u32 4294901760, %v2400_v47 }
 0x407   :  { %2580 = vmatpush.msra.mxu0 %v5952_v34  ;;  %v6013_v16 = vsub.f32 %v2400_v47, %v5995_v46  ;;  %2644 = vmatpush.msra.mxu1 %v5995_v46 }
 0x408   :  { %2436 = vmatpush.msra.mxu2 %v5995_v46 }
 0x409   :  { %2583 = vmatpush.msra.mxu0 %v5967_v35 }
 0x40c   :  { %2324 = vmatmul.f32.vlgmr.msrb.gmra.mxu0 %v2221_v18 }
 0x469   :  { %v2104_v24 = vpop.f32.mrf.mxu1 }
 0x46f   :  { %v2176_v28 = vpop.f32.mrf.mxu2 }
 0x470   :  { %v2198_v48 = vpop.f32.mrf.mxu3 }
 0x471   :  { %v2078_v29 = vpop.f32.mrf.mxu0  ;;  %v2152_v20 = vpop.f32.mrf.mxu1 }
 0x472   :  { %v2105_v1 = vadd.f32 %v2104_v24, %v2078_v29  ;;  %v2399_v24 = vld [vmem:[%s6788_s2 + $0x60] sm:$0xff]  ;;  %v2398_v29 = vld [vmem:[%s6788_s2 + $0x58] sm:$0xff] }
 0x473   :  { %v5997_v43 = vand.u32 4294901760, %v2399_v24  ;;  %v5999_v42 = vand.u32 4294901760, %v2398_v29 }
 0x475   :  { %v6016_v22 = vsub.f32 %v2399_v24, %v5997_v43  ;;  %v6019_v45 = vsub.f32 %v2398_v29, %v5999_v42  ;;  %2646 = vmatpush.msra.mxu1 %v5997_v43  ;;  %2438 = vmatpush.msra.mxu2 %v5997_v43  ;;  %v6929_v29 = vand.u32 4294901760, %v6013_v16 }
 0x477   :  { %v2520_v50 = vsub.f32 %v6013_v16, %v6929_v29  ;;  %v6930_v33 = vand.u32 4294901760, %v6016_v22  ;;  %2648 = vmatpush.msra.mxu1 %v5999_v42  ;;  %2440 = vmatpush.msra.mxu2 %v5999_v42 }
 0x479   :  { %v2128_v18 = vpop.f32.mrf.mxu0  ;;  %v2253_v0 = vpop.f32.mrf.mxu1  ;;  %v2521_v29 = vand.u32 4294901760, %v2520_v50 }
 0x47a   :  { %v2129_v56 = vadd.f32 %v2128_v18, %v2105_v1  ;;  %v5988_v1 = vsub.f32 %v2401_v27, %v5970_v17  ;;  %v2397_v18 = vld [vmem:[%s6788_s2 + $0x50] sm:$0xff]  ;;  %v2396_v27 = vld [vmem:[%s6788_s2 + $0x48] sm:$0xff] }
 0x47b   :  { %v6029_v47 = vand.u32 4294901760, %v2396_v27 }
 0x47c   :  { %v2153_v19 = vadd.f32 %v2152_v20, %v2129_v56  ;;  %v6833_v20 = vand.u32 4294901760, %v5988_v1  ;;  %2586 = vmatpush.msra.mxu0 %v5988_v1  ;;  %v6010_v56 = vand.u32 4294901760, %v2397_v18 }
 0x47d   :  { %v6038_v54 = vsub.f32 %v2396_v27, %v6029_v47  ;;  %v6931_v27 = vand.u32 4294901760, %v6019_v45 }
 0x47e   :  { %v2514_v59 = vsub.f32 %v5988_v1, %v6833_v20  ;;  %v6026_v57 = vsub.f32 %v2397_v18, %v6010_v56  ;;  %2589 = vmatpush.msra.mxu0 %v6013_v16  ;;  %v2177_v4 = vadd.f32 %v2176_v28, %v2153_v19  ;;  %v2526_v19 = vsub.f32 %v6016_v22, %v6930_v33  ;;  %v2277_v28 = vpop.f32.mrf.mxu2 }
 0x47f   :  { %v2532_v5 = vsub.f32 %v6019_v45, %v6931_v27  ;;  %2650 = vmatpush.msra.mxu1 %v6010_v56  ;;  %2442 = vmatpush.msra.mxu2 %v6010_v56 }
 0x480   :  { %v2515_v18 = vand.u32 4294901760, %v2514_v59  ;;  %v6842_v32 = vand.u32 4294901760, %v6026_v57  ;;  %2592 = vmatpush.msra.mxu0 %v6016_v22  ;;  %v2199_v59 = vadd.f32 %v2198_v48, %v2177_v4  ;;  %v2527_v33 = vand.u32 4294901760, %v2526_v19 }
 0x481   :  { %v2227_v20 = vpop.f32.mrf.mxu0  ;;  %v2533_v27 = vand.u32 4294901760, %v2532_v5  ;;  %2652 = vmatpush.msra.mxu1 %v6029_v47  ;;  %2444 = vmatpush.msra.mxu2 %v6029_v47  ;;  %v2347_v5 = vpop.f32.mrf.mxu1 }
 0x482   :  { %v2254_v24 = vadd.f32 %v2253_v0, %v2227_v20  ;;  %2516 = vmatpush.msra.mxu3 %v2515_v18  ;;  %v6843_v0 = vand.u32 4294901760, %v6038_v54  ;;  %2595 = vmatpush.msra.mxu0 %v6019_v45  ;;  %v2538_v2 = vsub.f32 %v6026_v57, %v6842_v32  ;;  %v2301_v18 = vpop.f32.mrf.mxu3  ;;  %v2350_v48 = vperm.slane %v2199_v59, 0 }
 0x484   :  { %v2278_v20 = vadd.f32 %v2277_v28, %v2254_v24  ;;  %2598 = vmatpush.msra.mxu0 %v6026_v57  ;;  %2522 = vmatpush.msra.mxu3 %v2521_v29  ;;  %v2544_v24 = vsub.f32 %v6038_v54, %v6843_v0  ;;  %v2539_v19 = vand.u32 4294901760, %v2538_v2  ;;  %v6932_v28 = vand.u32 4294901760, %v5941_v49 }
 0x485   :  { %v6933_v0 = vand.u32 4294901760, %v5952_v34  ;;  %v2352_v59 = vmul.f32 %v2350_v48, %v5746_v37  ;;  %v2353_v2 = vmul.f32 %v2350_v48, %v5756_v23  ;;  %v2354_v49 = vmul.f32 %v2350_v48, %v5764_v21 }
 0x486   :  { %v2302_v50 = vadd.f32 %v2301_v18, %v2278_v20  ;;  %2601 = vmatpush.msra.mxu0 %v6038_v54  ;;  %2528 = vmatpush.msra.mxu3 %v2527_v33  ;;  %v2545_v32 = vand.u32 4294901760, %v2544_v24  ;;  %v2351_v20 = vmul.f32 %v2350_v48, %v5754_v44  ;;  %v6934_v18 = vand.u32 4294901760, %v5967_v35 }
 0x487   :  { %2694 = vmatpush.msrb.mxu2 %v6932_v28  ;;  %v6935_v34 = vand.u32 4294901760, %v5988_v1  ;;  %v6936_v37 = vand.u32 4294901760, %v6013_v16 }
 0x488   :  { %2534 = vmatpush.msra.mxu3 %v2533_v27  ;;  %v2355_v27 = vmul.f32 %v2350_v48, %v5787_v40  ;;  %v6937_v40 = vand.u32 4294901760, %v6016_v22  ;;  %v6939_v22 = vand.u32 4294901760, %v6026_v57 }
 0x489   :  { %v2325_v4 = vpop.f32.mrf.mxu0  ;;  %2698 = vmatpush.msrb.mxu2 %v6933_v0 }
 0x48a   :  { %v2326_v29 = vadd.f32 %v2325_v4, %v2302_v50  ;;  %2540 = vmatpush.msra.mxu3 %v2539_v19  ;;  %v6938_v19 = vand.u32 4294901760, %v6019_v45  ;;  %v2390_v45 = vld [vmem:[%s6788_s2 + $0x40] sm:$0xff] }
 0x48b   :  { %2702 = vmatpush.msrb.mxu2 %v6934_v18 }
 0x48c   :  { %v2348_v13 = vadd.f32 %v2347_v5, %v2326_v29  ;;  %2546 = vmatpush.msra.mxu3 %v2545_v32  ;;  %v2388_v29 = vld [vmem:[%s6788_s2 + $0x30] sm:$0xff] }
 0x48d   :  { %2706 = vmatpush.msrb.mxu2 %v6935_v34 }
 0x48e   :  { %v2356_v33 = vperm.slane %v2348_v13, 0  ;;  %2756 = vmatpush.msrb.mxu3 %v5935_v41 }
 0x48f   :  { %2710 = vmatpush.msrb.mxu2 %v6936_v37  ;;  %v2386_v37 = vld [vmem:[%s6788_s2 + $0x20] sm:$0xff] }
 0x490   :  { %v2357_v0 = vadd.f32 %v2356_v33, %v2351_v20  ;;  %v2358_v24 = vadd.f32 %v2356_v33, %v2352_v59  ;;  %v2359_v44 = vadd.f32 %v2356_v33, %v2353_v2  ;;  %v2360_v50 = vadd.f32 %v2356_v33, %v2354_v49  ;;  %2758 = vmatpush.msrb.mxu3 %v5943_v61 }
 0x491   :  { %v2361_v35 = vadd.f32 %v2356_v33, %v2355_v27  ;;  %2714 = vmatpush.msrb.mxu2 %v6937_v40  ;;  %v6940_v61 = vand.u32 4294901760, %v6038_v54  ;;  %v6130_v59 = vand.u32 4294901760, %v2388_v29 }
 0x492   :  { %v2362_v23 = vmax.f32 %v2357_v0, 0.0  ;;  %v2363_v4 = vmax.f32 %v2358_v24, 0.0  ;;  %v2364_v21 = vmax.f32 %v2359_v44, 0.0  ;;  %v2365_v13 = vmax.f32 %v2360_v50, 0.0  ;;  %2760 = vmatpush.msrb.mxu3 %v5955_v38 }
 0x493   :  { %v2366_v32 = vmax.f32 %v2361_v35, 0.0  ;;  %2718 = vmatpush.msrb.mxu2 %v6938_v19  ;;  %v6108_v38 = vand.u32 4294901760, %v2390_v45  ;;  %v6152_v44 = vsub.f32 %v2388_v29, %v6130_v59 }
 0x494   :  { %v2367_v1 = vmul.f32 %v2362_v23, %v5703_v55  ;;  %v2368_v48 = vmul.f32 %v2363_v4, %v5752_v53  ;;  %v2369_v41 = vmul.f32 %v2364_v21, %v5760_v62  ;;  %v2370_v16 = vmul.f32 %v2365_v13, %v5769_v7  ;;  %2762 = vmatpush.msrb.mxu3 %v5970_v17  ;;  %v2389_v17 = vld [vmem:[%s6788_s2 + $0x38] sm:$0xff] }
 0x495   :  { %v2371_v28 = vmul.f32 %v2366_v32, %v5790_v51  ;;  %2722 = vmatpush.msrb.mxu2 %v6939_v22  ;;  %2817 = vmatpush.msrb.mxu0 %v6108_v38  ;;  %v6118_v57 = vand.u32 4294901760, %v2389_v17  ;;  %v6850_v21 = vand.u32 4294901760, %v6152_v44  ;;  %v2385_v32 = vld [vmem:[%s6788_s2 + $0x18] sm:$0xff] }
 0x496   :  { %2372 = vst.msk [vmem:[#allocation2 + $0x1] sm:$0xff] %vm36_vm0, %v2367_v1  ;;  %2764 = vmatpush.msrb.mxu3 %v5995_v46  ;;  %v6116_v46 = vsub.f32 %v2390_v45, %v6108_v38 }
 0x497   :  { %2373 = vst.msk [vmem:[#allocation2 + $0x9] sm:$0xff] %vm36_vm0, %v2368_v48  ;;  %2726 = vmatpush.msrb.mxu2 %v6940_v61  ;;  %2819 = vmatpush.msrb.mxu0 %v6118_v57  ;;  %v2897_v1 = vsub.f32 %v6152_v44, %v6850_v21  ;;  %v6172_v48 = vand.u32 4294901760, %v2386_v37 }
 0x498   :  { %2374 = vst.msk [vmem:[#allocation2 + $0x11] sm:$0xff] %vm36_vm0, %v2369_v41  ;;  %2766 = vmatpush.msrb.mxu3 %v5997_v43  ;;  %v2387_v43 = vld [vmem:[%s6788_s2 + $0x28] sm:$0xff]  ;;  %v2884_v18 = vand.u32 4294901760, %v6116_v46 }
 0x499   :  { %2375 = vst.msk [vmem:[#allocation2 + $0x19] sm:$0xff] %vm36_vm0, %v2370_v16  ;;  %2821 = vmatpush.msrb.mxu0 %v6130_v59  ;;  %v6146_v24 = vand.u32 4294901760, %v2387_v43  ;;  %v2898_v61 = vand.u32 4294901760, %v2897_v1 }
 0x49a   :  { %2376 = vst.msk [vmem:[#allocation2 + $0x21] sm:$0xf] %vm1336_vm3, %v2371_v28  ;;  %2768 = vmatpush.msrb.mxu3 %v5999_v42  ;;  %v6133_v42 = vsub.f32 %v2389_v17, %v6118_v57  ;;  %v2885_v34 = vsub.f32 %v6116_v46, %v2884_v18  ;;  %v2384_v28 = vld [vmem:[%s6788_s2 + $0x10] sm:$0xff]  ;;  %v6184_v17 = vand.u32 4294901760, %v2385_v32 }
 0x49b   :  { %2823 = vmatpush.msrb.mxu0 %v6146_v24  ;;  %v6177_v19 = vsub.f32 %v2387_v43, %v6146_v24  ;;  %v6191_v43 = vsub.f32 %v2386_v37, %v6172_v48 }
 0x49c   :  { %2770 = vmatpush.msrb.mxu3 %v6010_v56  ;;  %v2890_v0 = vand.u32 4294901760, %v6133_v42  ;;  %v2886_v50 = vand.u32 4294901760, %v2885_v34 }
 0x49d   :  { %v2391_v54 = vld [vmem:[#allocation2 + $0x1] sm:$0xff]  ;;  %2825 = vmatpush.msrb.mxu0 %v6172_v48  ;;  %v6849_v29 = vand.u32 4294901760, %v6177_v19 }
 0x49e   :  { %v2406_v5 = vsel %vm36_vm0, %v2391_v54, 0  ;;  %v2392_v20 = vld [vmem:[#allocation2 + $0x9] sm:$0xff]  ;;  %2772 = vmatpush.msrb.mxu3 %v6029_v47  ;;  %v2891_v35 = vsub.f32 %v6133_v42, %v2890_v0  ;;  %2887 = vmatpush.msrb.mxu1 %v2886_v50  ;;  %v6846_v50 = vand.u32 4294901760, %v6191_v43  ;;  %v2377_v21 = vld [vmem:[#allocation2] sm:$0xff] }
 0x49f   :  { %v6136_v2 = vand.u32 4294901760, %v2406_v5  ;;  %v2409_v49 = vsel %vm36_vm0, %v2392_v20, 0  ;;  %v2393_v27 = vld [vmem:[#allocation2 + $0x11] sm:$0xff]  ;;  %v2383_v54 = vld [vmem:[%s6788_s2 + $0x8] sm:$0xff]  ;;  %v6196_v20 = vand.u32 4294901760, %v2384_v28  ;;  %2827 = vmatpush.msrb.mxu0 %v6184_v17 }
 0x4a0   :  { %v6139_v33 = vand.u32 4294901760, %v2409_v49  ;;  %v2412_v4 = vsel %vm36_vm0, %v2393_v27, 0  ;;  %v2892_v13 = vand.u32 4294901760, %v2891_v35  ;;  %v2394_v16 = vld [vmem:[#allocation2 + $0x19] sm:$0xff]  ;;  %v6210_v35 = vand.u32 4294901760, %v2383_v54 }
 0x4a1   :  { %2548 = vmatmul.f32.vlgmr.msra.gmra.mxu3 %v6136_v2  ;;  %v2446_v56 = vsub.f32 %v2406_v5, %v6136_v2  ;;  %v6174_v41 = vand.u32 4294901760, %v2412_v4  ;;  %v2415_v5 = vsel %vm36_vm0, %v2394_v16, 0  ;;  %v2382_v27 = vld [vmem:[%s6788_s2] sm:$0xff]  ;;  %2829 = vmatpush.msrb.mxu0 %v6196_v20 }
 0x4a2   :  { %3025 = vmatpush.msra.mxu3 %v6108_v38  ;;  %v2454_v23 = vsub.f32 %v2409_v49, %v6139_v33  ;;  %2893 = vmatpush.msrb.mxu1 %v2892_v13  ;;  %v6199_v49 = vsub.f32 %v2385_v32, %v6184_v17  ;;  %v6214_v13 = vsub.f32 %v2384_v28, %v6196_v20  ;;  %v6216_v32 = vand.u32 4294901760, %v2382_v27 }
 0x4a3   :  { %2604 = vmatmul.f32.vlgmr.msra.gmra.mxu0 %v2446_v56  ;;  %v2447_v47 = vand.u32 4294901760, %v2446_v56  ;;  %v2462_v34 = vsub.f32 %v2412_v4, %v6174_v41  ;;  %v6224_v1 = vsub.f32 %v2383_v54, %v6210_v35 }
 0x4a4   :  { %3027 = vmatpush.msra.mxu3 %v6118_v57  ;;  %v2455_v45 = vand.u32 4294901760, %v2454_v23  ;;  %2899 = vmatpush.msrb.mxu1 %v2898_v61  ;;  %v6848_v16 = vand.u32 4294901760, %v6214_v13  ;;  %v6232_v28 = vsub.f32 %v2382_v27, %v6216_v32  ;;  %v6235_v61 = vand.u32 4294901760, %v2415_v5 }
 0x4a5   :  { %2656 = vmatmul.f32.vlgmr.msra.gmra.mxu1 %v2447_v47  ;;  %v2448_v40 = vsub.f32 %v2446_v56, %v2447_v47  ;;  %v2903_v56 = vsub.f32 %v6177_v19, %v6849_v29  ;;  %v6847_v47 = vand.u32 4294901760, %v6199_v49  ;;  %2831 = vmatpush.msrb.mxu0 %v6210_v35 }
 0x4a6   :  { %3029 = vmatpush.msra.mxu3 %v6130_v59  ;;  %v2456_v37 = vsub.f32 %v2454_v23, %v2455_v45  ;;  %v2932_v27 = vand.u32 4294901760, %v6232_v28  ;;  %v2470_v29 = vsub.f32 %v2415_v5, %v6235_v61 }
 0x4a7   :  { %v2449_v22 = vand.u32 4294901760, %v2448_v40  ;;  %v2904_v4 = vand.u32 4294901760, %v2903_v56  ;;  %v2909_v40 = vsub.f32 %v6191_v43, %v6846_v50  ;;  %2833 = vmatpush.msrb.mxu0 %v6216_v32 }
 0x4a8   :  { %3031 = vmatpush.msra.mxu3 %v6146_v24  ;;  %v2457_v56 = vand.u32 4294901760, %v2456_v37  ;;  %v2395_v37 = vld [vmem:[#allocation2 + $0x21] sm:$0xf] }
 0x4a9   :  { %2450 = vmatmul.f32.vlgmr.msra.gmra.mxu2 %v2449_v22  ;;  %2552 = vmatmul.f32.gmra.mxu3 %v6139_v33  ;;  %v2463_v22 = vand.u32 4294901760, %v2462_v34  ;;  %v2910_v54 = vand.u32 4294901760, %v2909_v40 }
 0x4aa   :  { %2966 = vmatpush.msra.mxu2 %v6116_v46  ;;  %3033 = vmatpush.msra.mxu3 %v6172_v48  ;;  %v6941_v46 = vand.u32 4294901760, %v6152_v44 }
 0x4ab   :  { %2609 = vmatmul.f32.gmra.mxu0 %v2454_v23  ;;  %v2915_v23 = vsub.f32 %v6199_v49, %v6847_v47  ;;  %2905 = vmatpush.msrb.mxu1 %v2904_v4  ;;  %v2921_v47 = vsub.f32 %v6214_v13, %v6848_v16 }
 0x4ac   :  { %2969 = vmatpush.msra.mxu2 %v6133_v42  ;;  %3035 = vmatpush.msra.mxu3 %v6184_v17  ;;  %v6942_v42 = vand.u32 4294901760, %v6177_v19 }
 0x4ad   :  { %2662 = vmatmul.f32.gmra.mxu1 %v2455_v45  ;;  %v6851_v45 = vand.u32 4294901760, %v6224_v1  ;;  %v2916_v50 = vand.u32 4294901760, %v2915_v23  ;;  %v2922_v40 = vand.u32 4294901760, %v2921_v47  ;;  %v2933_v23 = vsub.f32 %v6232_v28, %v2932_v27  ;;  %3083 = vmatpush.msra.mxu0 %v2884_v18 }
 0x4ae   :  { %2972 = vmatpush.msra.mxu2 %v6152_v44  ;;  %2911 = vmatpush.msrb.mxu1 %v2910_v54  ;;  %v2464_v54 = vsub.f32 %v2462_v34, %v2463_v22  ;;  %v6943_v44 = vand.u32 4294901760, %v6191_v43 }
 0x4af   :  { %v2927_v4 = vsub.f32 %v6224_v1, %v6851_v45  ;;  %3037 = vmatpush.msra.mxu3 %v6196_v20  ;;  %v2934_v45 = vand.u32 4294901760, %v2933_v23  ;;  %3087 = vmatpush.msra.mxu0 %v2890_v0 }
 0x4b0   :  { %2917 = vmatpush.msrb.mxu1 %v2916_v50  ;;  %2975 = vmatpush.msra.mxu2 %v6177_v19  ;;  %v2795_v50 = vsel %vm36_vm0, %v2377_v21, 0  ;;  %v2465_v5 = vand.u32 4294901760, %v2464_v54  ;;  %v6944_v19 = vand.u32 4294901760, %v6199_v49 }
 0x4b1   :  { %2458 = vmatmul.f32.gmra.mxu2 %v2457_v56  ;;  %2556 = vmatmul.f32.gmra.mxu3 %v6174_v41  ;;  %v2928_v16 = vand.u32 4294901760, %v2927_v4  ;;  %v2418_v56 = vsel %vm36_vm0, %v2395_v37, 0  ;;  %v6270_v18 = vand.u32 4294901760, %v2795_v50  ;;  %v2379_v37 = vld [vmem:[#allocation2 + $0x10] sm:$0xff] }
 0x4b2   :  { %2923 = vmatpush.msrb.mxu1 %v2922_v40  ;;  %2978 = vmatpush.msra.mxu2 %v6191_v43  ;;  %v6263_v47 = vand.u32 4294901760, %v2418_v56  ;;  %v2380_v40 = vld [vmem:[#allocation2 + $0x18] sm:$0xff] }
 0x4b3   :  { %2614 = vmatmul.f32.gmra.mxu0 %v2462_v34  ;;  %v2471_v34 = vand.u32 4294901760, %v2470_v29  ;;  %3039 = vmatpush.msra.mxu3 %v6210_v35  ;;  %v2804_v23 = vsel %vm36_vm0, %v2380_v40, 0 }
 0x4b4   :  { %2929 = vmatpush.msrb.mxu1 %v2928_v16  ;;  %2981 = vmatpush.msra.mxu2 %v6199_v49  ;;  %v2478_v21 = vsub.f32 %v2418_v56, %v6263_v47  ;;  %v2378_v16 = vld [vmem:[#allocation2 + $0x8] sm:$0xff]  ;;  %v6328_v56 = vand.u32 4294901760, %v2804_v23 }
 0x4b5   :  { %2668 = vmatmul.f32.gmra.mxu1 %v2463_v22  ;;  %3091 = vmatpush.msra.mxu0 %v6941_v46  ;;  %v2472_v0 = vsub.f32 %v2470_v29, %v2471_v34  ;;  %v6281_v22 = vsub.f32 %v2795_v50, %v6270_v18  ;;  %v2381_v50 = vld [vmem:[#allocation2 + $0x20] sm:$0xf] }
 0x4b6   :  { %2935 = vmatpush.msrb.mxu1 %v2934_v45  ;;  %2984 = vmatpush.msra.mxu2 %v6214_v13  ;;  %v2479_v45 = vand.u32 4294901760, %v2478_v21 }
 0x4b7   :  { %3095 = vmatpush.msra.mxu0 %v6942_v42  ;;  %3041 = vmatpush.msra.mxu3 %v6216_v32  ;;  %v2836_v43 = vand.u32 4294901760, %v6281_v22 }
 0x4b8   :  { %3145 = vmatpush.msra.mxu1 %v6108_v38  ;;  %v2798_v38 = vsel %vm36_vm0, %v2378_v16, 0  ;;  %2987 = vmatpush.msra.mxu2 %v6224_v1  ;;  %v2480_v49 = vsub.f32 %v2478_v21, %v2479_v45 }
 0x4b9   :  { %2466 = vmatmul.f32.gmra.mxu2 %v2465_v5  ;;  %2560 = vmatmul.f32.gmra.mxu3 %v6235_v61  ;;  %v6294_v4 = vand.u32 4294901760, %v2798_v38 }
 0x4ba   :  { %3147 = vmatpush.msra.mxu1 %v6118_v57  ;;  %3099 = vmatpush.msra.mxu0 %v6943_v44  ;;  %v6945_v57 = vand.u32 4294901760, %v6214_v13  ;;  %v2801_v13 = vsel %vm36_vm0, %v2379_v37, 0 }
 0x4bb   :  { %2619 = vmatmul.f32.gmra.mxu0 %v2470_v29  ;;  %v2473_v29 = vand.u32 4294901760, %v2472_v0  ;;  %2990 = vmatpush.msra.mxu2 %v6232_v28 }
 0x4bc   :  { %3149 = vmatpush.msra.mxu1 %v6130_v59  ;;  %3103 = vmatpush.msra.mxu0 %v6944_v19  ;;  %v6946_v59 = vand.u32 4294901760, %v6224_v1  ;;  %v2481_v1 = vand.u32 4294901760, %v2480_v49  ;;  %v3195_v19 = vld [vmem:[%s6788_s2 + $0xc8] sm:$0xff] }
 0x4bd   :  { %2674 = vmatmul.f32.gmra.mxu1 %v2471_v34  ;;  %v6335_v34 = vsub.f32 %v2804_v23, %v6328_v56  ;;  %v3193_v23 = vld [vmem:[%s6788_s2 + $0xb8] sm:$0xff] }
 0x4be   :  { %3151 = vmatpush.msra.mxu1 %v6146_v24  ;;  %3107 = vmatpush.msra.mxu0 %v6945_v57  ;;  %v2837_v24 = vsub.f32 %v6281_v22, %v2836_v43 }
 0x4bf   :  { %v6853_v42 = vand.u32 4294901760, %v6335_v34 }
 0x4c0   :  { %3153 = vmatpush.msra.mxu1 %v6172_v48  ;;  %3111 = vmatpush.msra.mxu0 %v6946_v59  ;;  %v6307_v48 = vsub.f32 %v2798_v38, %v6294_v4 }
 0x4c1   :  { %2474 = vmatmul.f32.gmra.mxu2 %v2473_v29  ;;  %2564 = vmatmul.f32.gmra.mxu3 %v6263_v47 }
 0x4c2   :  { %3155 = vmatpush.msra.mxu1 %v6184_v17  ;;  %3115 = vmatpush.msra.mxu0 %v2932_v27  ;;  %v2838_v17 = vand.u32 4294901760, %v2837_v24  ;;  %v2844_v28 = vand.u32 4294901760, %v6307_v48  ;;  %v6314_v27 = vand.u32 4294901760, %v2801_v13  ;;  %v3194_v24 = vld [vmem:[%s6788_s2 + $0xc0] sm:$0xff] }
 0x4c3   :  { %2624 = vmatmul.f32.gmra.mxu0 %v2478_v21  ;;  %v3196_v21 = vld [vmem:[%s6788_s2 + $0xd0] sm:$0xff] }
 0x4c4   :  { %3157 = vmatpush.msra.mxu1 %v6196_v20  ;;  %v2845_v20 = vsub.f32 %v6307_v48, %v2844_v28  ;;  %v6346_v16 = vand.u32 4294901760, %v3196_v21 }
 0x4c5   :  { %2680 = vmatmul.f32.gmra.mxu1 %v2479_v45  ;;  %v6364_v45 = vand.u32 4294901760, %v3195_v19 }
 0x4c6   :  { %3159 = vmatpush.msra.mxu1 %v6210_v35  ;;  %v6322_v35 = vsub.f32 %v2801_v13, %v6314_v27  ;;  %v2846_v54 = vand.u32 4294901760, %v2845_v20  ;;  %v6350_v44 = vsub.f32 %v3196_v21, %v6346_v16 }
 0x4c7   :  { %v6372_v59 = vsub.f32 %v3195_v19, %v6364_v45 }
 0x4c8   :  { %3161 = vmatpush.msra.mxu1 %v6216_v32  ;;  %v2852_v32 = vand.u32 4294901760, %v6322_v35  ;;  %v3287_v29 = vand.u32 4294901760, %v6350_v44 }
 0x4c9   :  { %2482 = vmatmul.f32.gmra.mxu2 %v2481_v1  ;;  %2774 = vmatmul.f32.vlgmr.msrb.gmra.mxu3 %v6136_v2  ;;  %v3293_v1 = vand.u32 4294901760, %v6372_v59 }
 0x4ca   :  { %v2853_v5 = vsub.f32 %v6322_v35, %v2852_v32  ;;  %v3288_v57 = vsub.f32 %v6350_v44, %v3287_v29 }
 0x4cb   :  { %2839 = vmatmul.f32.vlgmr.msrb.gmra.mxu0 %v2838_v17  ;;  %v6382_v17 = vand.u32 4294901760, %v3194_v24 }
 0x4cc   :  { %v2854_v46 = vand.u32 4294901760, %v2853_v5  ;;  %3369 = vmatpush.msrb.mxu0 %v6350_v44  ;;  %v3289_v13 = vand.u32 4294901760, %v3288_v57  ;;  %v6400_v5 = vand.u32 4294901760, %v3193_v23  ;;  %v3192_v57 = vld [vmem:[%s6788_s2 + $0xb0] sm:$0xff] }
 0x4cd   :  { %2937 = vmatmul.f32.vlgmr.msrb.gmra.mxu1 %v6270_v18  ;;  %v6390_v40 = vsub.f32 %v3194_v24, %v6382_v17  ;;  %v3191_v24 = vld [vmem:[%s6788_s2 + $0xa8] sm:$0xff] }
 0x4ce   :  { %3428 = vmatpush.msrb.mxu1 %v6346_v16  ;;  %3372 = vmatpush.msrb.mxu0 %v6372_v59  ;;  %v6411_v21 = vsub.f32 %v3193_v23, %v6400_v5 }
 0x4cf   :  { %3290 = vmatpush.msrb.mxu3 %v3289_v13 }
 0x4d0   :  { %3430 = vmatpush.msrb.mxu1 %v6364_v45  ;;  %3375 = vmatpush.msrb.mxu0 %v6390_v40  ;;  %v6855_v19 = vand.u32 4294901760, %v6411_v21 }
 0x4d1   :  { %2728 = vmatmul.f32.vlgmr.msrb.gmra.mxu2 %v6136_v2  ;;  %2778 = vmatmul.f32.gmra.mxu3 %v6139_v33  ;;  %v2807_v2 = vsel %vm36_vm0, %v2381_v50, 0  ;;  %v6856_v50 = vand.u32 4294901760, %v6390_v40 }
 0x4d2   :  { %v6341_v0 = vand.u32 4294901760, %v2807_v2  ;;  %3220 = vmatpush.msrb.mxu2 %v6346_v16  ;;  %3432 = vmatpush.msrb.mxu1 %v6382_v17 }
 0x4d3   :  { %2847 = vmatmul.f32.gmra.mxu0 %v2846_v54 }
 0x4d4   :  { %v6358_v38 = vsub.f32 %v2807_v2, %v6341_v0  ;;  %3222 = vmatpush.msrb.mxu2 %v6364_v45  ;;  %v3300_v2 = vsub.f32 %v6390_v40, %v6856_v50  ;;  %3434 = vmatpush.msrb.mxu1 %v6400_v5 }
 0x4d5   :  { %2941 = vmatmul.f32.gmra.mxu1 %v6294_v4  ;;  %3378 = vmatpush.msrb.mxu0 %v6411_v21 }
 0x4d6   :  { %v6852_v37 = vand.u32 4294901760, %v6358_v38  ;;  %3224 = vmatpush.msrb.mxu2 %v6382_v17  ;;  %v6951_v44 = vand.u32 4294901760, %v6358_v38 }
 0x4d8   :  { %v2869_v20 = vsub.f32 %v6358_v38, %v6852_v37  ;;  %3226 = vmatpush.msrb.mxu2 %v6400_v5 }
 0x4d9   :  { %2732 = vmatmul.f32.gmra.mxu2 %v6139_v33  ;;  %2782 = vmatmul.f32.gmra.mxu3 %v6174_v41  ;;  %v2861_v33 = vsub.f32 %v6335_v34, %v6853_v42 }
 0x4db   :  { %2855 = vmatmul.f32.gmra.mxu0 %v2854_v46  ;;  %v2862_v49 = vand.u32 4294901760, %v2861_v33  ;;  %v2870_v46 = vand.u32 4294901760, %v2869_v20  ;;  %v3301_v33 = vand.u32 4294901760, %v3300_v2 }
 0x4dd   :  { %2945 = vmatmul.f32.gmra.mxu1 %v6314_v27 }
 0x4e1   :  { %2736 = vmatmul.f32.gmra.mxu2 %v6174_v41  ;;  %2786 = vmatmul.f32.gmra.mxu3 %v6235_v61  ;;  %v3294_v41 = vsub.f32 %v6372_v59, %v3293_v1 }
 0x4e3   :  { %2863 = vmatmul.f32.gmra.mxu0 %v2862_v49  ;;  %v3295_v54 = vand.u32 4294901760, %v3294_v41  ;;  %v6418_v49 = vand.u32 4294901760, %v3192_v57  ;;  %v6432_v41 = vand.u32 4294901760, %v3191_v24 }
 0x4e5   :  { %2949 = vmatmul.f32.gmra.mxu1 %v6328_v56  ;;  %3296 = vmatpush.msrb.mxu3 %v3295_v54  ;;  %v6430_v13 = vsub.f32 %v3192_v57, %v6418_v49  ;;  %v6442_v54 = vsub.f32 %v3191_v24, %v6432_v41  ;;  %v3188_v24 = vld [vmem:[%s6788_s2 + $0x90] sm:$0xff] }
 0x4e6   :  { %3228 = vmatpush.msrb.mxu2 %v6418_v49  ;;  %3436 = vmatpush.msrb.mxu1 %v6418_v49  ;;  %v6468_v37 = vand.u32 4294901760, %v3188_v24 }
 0x4e7   :  { %3302 = vmatpush.msrb.mxu3 %v3301_v33  ;;  %v6854_v23 = vand.u32 4294901760, %v6430_v13  ;;  %3381 = vmatpush.msrb.mxu0 %v6430_v13 }
 0x4e8   :  { %3230 = vmatpush.msrb.mxu2 %v6432_v41  ;;  %3438 = vmatpush.msrb.mxu1 %v6432_v41 }
 0x4e9   :  { %2740 = vmatmul.f32.gmra.mxu2 %v6235_v61  ;;  %2790 = vmatmul.f32.gmra.mxu3 %v6263_v47  ;;  %v3306_v61 = vsub.f32 %v6411_v21, %v6855_v19  ;;  %v3312_v2 = vsub.f32 %v6430_v13, %v6854_v23  ;;  %v3334_v23 = vsub.f32 %v3188_v24, %v6468_v37 }
 0x4ea   :  { %3384 = vmatpush.msrb.mxu0 %v6442_v54 }
 0x4eb   :  { %2871 = vmatmul.f32.gmra.mxu0 %v2870_v46  ;;  %v3307_v20 = vand.u32 4294901760, %v3306_v61  ;;  %v3317_v46 = vand.u32 4294901760, %v6442_v54  ;;  %v3313_v33 = vand.u32 4294901760, %v3312_v2  ;;  %v3189_v61 = vld [vmem:[%s6788_s2 + $0x98] sm:$0xff]  ;;  %v3335_v19 = vand.u32 4294901760, %v3334_v23 }
 0x4ec   :  { %v6466_v2 = vand.u32 4294901760, %v3189_v61 }
 0x4ed   :  { %2953 = vmatmul.f32.gmra.mxu1 %v6341_v0  ;;  %3308 = vmatpush.msrb.mxu3 %v3307_v20  ;;  %v3318_v57 = vsub.f32 %v6442_v54, %v3317_v46  ;;  %v3336_v50 = vsub.f32 %v3334_v23, %v3335_v19 }
 0x4ee   :  { %v3328_v42 = vsub.f32 %v3189_v61, %v6466_v2 }
 0x4ef   :  { %3314 = vmatpush.msrb.mxu3 %v3313_v33 }
 0x4f0   :  { %v3329_v33 = vand.u32 4294901760, %v3328_v42 }
 0x4f1   :  { %2744 = vmatmul.f32.gmra.mxu2 %v6263_v47  ;;  %3045 = vmatmul.f32.vlgmr.msra.gmra.mxu3 %v2836_v43  ;;  %v3190_v47 = vld [vmem:[%s6788_s2 + $0xa0] sm:$0xff] }
 0x4f2   :  { %v6453_v43 = vand.u32 4294901760, %v3190_v47  ;;  %v3330_v61 = vsub.f32 %v3328_v42, %v3329_v33 }
 0x4f3   :  { %3117 = vmatmul.f32.vlgmr.msra.gmra.mxu0 %v6270_v18 }
 0x4f4   :  { %3232 = vmatpush.msrb.mxu2 %v6453_v43  ;;  %v3322_v20 = vsub.f32 %v3190_v47, %v6453_v43  ;;  %3440 = vmatpush.msrb.mxu1 %v6453_v43 }
 0x4f5   :  { %3163 = vmatmul.f32.vlgmr.msra.gmra.mxu1 %v6270_v18  ;;  %v3319_v18 = vand.u32 4294901760, %v3318_v57 }
 0x4f6   :  { %v3323_v54 = vand.u32 4294901760, %v3322_v20  ;;  %3387 = vmatpush.msrb.mxu0 %v3322_v20  ;;  %3234 = vmatpush.msrb.mxu2 %v6466_v2 }
 0x4f7   :  { %3320 = vmatpush.msrb.mxu3 %v3319_v18  ;;  %3442 = vmatpush.msrb.mxu1 %v6466_v2 }
 0x4f8   :  { %v3324_v47 = vsub.f32 %v3322_v20, %v3323_v54  ;;  %3390 = vmatpush.msrb.mxu0 %v3328_v42  ;;  %3236 = vmatpush.msrb.mxu2 %v6468_v37  ;;  %v6948_v42 = vand.u32 4294901760, %v6411_v21  ;;  %v6955_v20 = vld [vmem:[#allocation20_spill] sm:$0xff] }
 0x4f9   :  { %2993 = vmatmul.f32.vlgmr.msra.gmra.mxu2 %v6281_v22  ;;  %3051 = vmatmul.f32.gmra.mxu3 %v2844_v28  ;;  %v3331_v22 = vand.u32 4294901760, %v3330_v61  ;;  %v3337_v28 = vand.u32 4294901760, %v3336_v50  ;;  %v3187_v61 = vld [vmem:[#allocation2 + $0x22] sm:$0xf] }
 0x4fa   :  { %v3325_v57 = vand.u32 4294901760, %v3324_v47  ;;  %3393 = vmatpush.msrb.mxu0 %v3334_v23  ;;  %3486 = vmatpush.msra.mxu2 %v3287_v29  ;;  %v3184_v29 = vld [vmem:[#allocation2 + $0xa] sm:$0xff] }
 0x4fb   :  { %3121 = vmatmul.f32.gmra.mxu0 %v6294_v4  ;;  %3444 = vmatpush.msrb.mxu1 %v6468_v37 }
 0x4fc   :  { %3326 = vmatpush.msrb.mxu3 %v3325_v57  ;;  %3490 = vmatpush.msra.mxu2 %v3293_v1  ;;  %v6957_v57 = vld [vmem:[#allocation29_spill] sm:$0xff] }
 0x4fd   :  { %3167 = vmatmul.f32.gmra.mxu1 %v6294_v4  ;;  %3624 = vmatpush.msra.mxu0 %v5535_v15  ;;  %v6947_v4 = vand.u32 4294901760, %v6390_v40 }
 0x4fe   :  { %3662 = vmatpush.msra.mxu1 %v5599_v10  ;;  %3332 = vmatpush.msrb.mxu3 %v3331_v22 }
 0x4ff   :  { %3494 = vmatpush.msra.mxu2 %v6947_v4  ;;  %3626 = vmatpush.msra.mxu0 %v5544_v58 }
 0x500   :  { %3338 = vmatpush.msrb.mxu3 %v3337_v28  ;;  %3668 = vmatpush.msra.mxu1 %v5609_v31  ;;  %v6958_v28 = vld [vmem:[#allocation31_spill] sm:$0xff] }
 0x501   :  { %2998 = vmatmul.f32.gmra.mxu2 %v6307_v48  ;;  %3057 = vmatmul.f32.gmra.mxu3 %v2852_v32  ;;  %v6949_v48 = vand.u32 4294901760, %v6430_v13  ;;  %v6950_v32 = vand.u32 4294901760, %v6335_v34  ;;  %v6953_v13 = vld [vmem:[#allocation19_spill] sm:$0xff] }
 0x502   :  { %3548 = vmatpush.msra.mxu3 %v6346_v16  ;;  %3498 = vmatpush.msra.mxu2 %v6948_v42 }
 0x503   :  { %3125 = vmatmul.f32.gmra.mxu0 %v6314_v27  ;;  %3674 = vmatpush.msra.mxu1 %v5617_v39 }
 0x504   :  { %3550 = vmatpush.msra.mxu3 %v6364_v45  ;;  %3502 = vmatpush.msra.mxu2 %v6949_v48  ;;  %v3201_v45 = vsel %vm36_vm0, %v3184_v29, 0  ;;  %v6960_v29 = vld [vmem:[#allocation36_spill] sm:$0xff] }
 0x505   :  { %3171 = vmatmul.f32.gmra.mxu1 %v6314_v27  ;;  %v3183_v27 = vld [vmem:[#allocation2 + $0x2] sm:$0xff]  ;;  %3628 = vmatpush.msra.mxu0 %v5546_v8  ;;  %v6535_v1 = vand.u32 4294901760, %v3201_v45 }
 0x506   :  { %3552 = vmatpush.msra.mxu3 %v6382_v17  ;;  %3506 = vmatpush.msra.mxu2 %v3317_v46  ;;  %v3198_v16 = vsel %vm36_vm0, %v3183_v27, 0  ;;  %v3185_v17 = vld [vmem:[#allocation2 + $0x12] sm:$0xff]  ;;  %v3210_v27 = vsel %vm36_vm0, %v3187_v61, 0 }
 0x507   :  { %3680 = vmatpush.msra.mxu1 %v5657_v3  ;;  %3630 = vmatpush.msra.mxu0 %v5584_v25  ;;  %v3204_v40 = vsel %vm36_vm0, %v3185_v17, 0  ;;  %v6954_v46 = vld [vmem:[#allocation7_spill] sm:$0xff] }
 0x508   :  { %3554 = vmatpush.msra.mxu3 %v6400_v5  ;;  %3510 = vmatpush.msra.mxu2 %v3323_v54  ;;  %v6547_v5 = vand.u32 4294901760, %v3204_v40 }
 0x509   :  { %3003 = vmatmul.f32.gmra.mxu2 %v6322_v35  ;;  %3063 = vmatmul.f32.gmra.mxu3 %v6950_v32  ;;  %v6517_v35 = vand.u32 4294901760, %v3198_v16 }
 0x50a   :  { %3686 = vmatpush.msra.mxu1 %v5676_v36  ;;  %3556 = vmatpush.msra.mxu3 %v6418_v49  ;;  %v3254_v23 = vsub.f32 %v3204_v40, %v6547_v5 }
 0x50b   :  { %3129 = vmatmul.f32.gmra.mxu0 %v6328_v56  ;;  %3514 = vmatpush.msra.mxu2 %v3329_v33 }
 0x50c   :  { %3558 = vmatpush.msra.mxu3 %v6432_v41  ;;  %3692 = vmatpush.msra.mxu1 %v5705_v6  ;;  %v3255_v54 = vand.u32 4294901760, %v3254_v23 }
 0x50d   :  { %3175 = vmatmul.f32.gmra.mxu1 %v6328_v56  ;;  %3518 = vmatpush.msra.mxu2 %v3335_v19  ;;  %v3238_v56 = vsub.f32 %v3198_v16, %v6517_v35  ;;  %v3186_v19 = vld [vmem:[#allocation2 + $0x1a] sm:$0xff]  ;;  %v6959_v16 = vld [vmem:[#allocation34_spill] sm:$0xff] }
 0x50e   :  { %3560 = vmatpush.msra.mxu3 %v6453_v43  ;;  %3698 = vmatpush.msra.mxu1 %v5719_v9  ;;  %v3207_v24 = vsel %vm36_vm0, %v3186_v19, 0  ;;  %v3256_v4 = vsub.f32 %v3254_v23, %v3255_v54 }
 0x50f   :  { %3632 = vmatpush.msra.mxu0 %v5604_v52  ;;  %v3239_v59 = vand.u32 4294901760, %v3238_v56  ;;  %v6565_v47 = vand.u32 4294901760, %v3207_v24 }
 0x510   :  { %3562 = vmatpush.msra.mxu3 %v6466_v2  ;;  %3704 = vmatpush.msra.mxu1 %v5722_v26  ;;  %v6956_v2 = vld [vmem:[#allocation25_spill] sm:$0xff] }
 0x511   :  { %3008 = vmatmul.f32.gmra.mxu2 %v6335_v34  ;;  %3069 = vmatmul.f32.gmra.mxu3 %v6951_v44  ;;  %v6952_v34 = vld [vmem:[#allocation6_spill] sm:$0xff]  ;;  %v3262_v42 = vsub.f32 %v3207_v24, %v6565_v47 }
 0x512   :  { %3564 = vmatpush.msra.mxu3 %v6468_v37  ;;  %3710 = vmatpush.msra.mxu1 %v6952_v34  ;;  %v3246_v37 = vsub.f32 %v3201_v45, %v6535_v1 }
 0x513   :  { %3133 = vmatmul.f32.gmra.mxu0 %v6341_v0  ;;  %v3263_v45 = vand.u32 4294901760, %v3262_v42 }
 0x514   :  { %3634 = vmatpush.msra.mxu0 %v5630_v60  ;;  %v3247_v50 = vand.u32 4294901760, %v3246_v37 }
 0x515   :  { %3179 = vmatmul.f32.gmra.mxu1 %v6341_v0  ;;  %v3240_v0 = vsub.f32 %v3238_v56, %v3239_v59  ;;  %v3264_v40 = vsub.f32 %v3262_v42, %v3263_v45 }
 0x516   :  { %3636 = vmatpush.msra.mxu0 %v5649_v12  ;;  %v3248_v41 = vsub.f32 %v3246_v37, %v3247_v50 }
 0x518   :  { %3638 = vmatpush.msra.mxu0 %v5661_v11  ;;  %v3249_v18 = vand.u32 4294901760, %v3248_v41  ;;  %v3265_v41 = vand.u32 4294901760, %v3264_v40 }
 0x519   :  { %3013 = vmatmul.f32.gmra.mxu2 %v6358_v38  ;;  %3340 = vmatmul.f32.vlgmr.msrb.gmra.mxu3 %v6517_v35  ;;  %v3241_v38 = vand.u32 4294901760, %v3240_v0  ;;  %v6961_v0 = vld [vmem:[#allocation40_spill] sm:$0xff] }
 0x51a   :  { %3916 = vmatpush.msrb.mxu3 %v5838_v30  ;;  %3640 = vmatpush.msra.mxu0 %v5681_v14 }
 0x51b   :  { %3396 = vmatmul.f32.vlgmr.msrb.gmra.mxu0 %v3238_v56  ;;  %v3257_v56 = vand.u32 4294901760, %v3256_v4 }
 0x51c   :  { %3725 = vmatpush.msrb.mxu0 %v6927_v63 }
 0x51d   :  { %3448 = vmatmul.f32.vlgmr.msrb.gmra.mxu1 %v3239_v59  ;;  %v6582_v59 = vand.u32 4294901760, %v3210_v27 }
 0x51e   :  { %3764 = vmatpush.msrb.mxu1 %v5535_v15  ;;  %3728 = vmatpush.msrb.mxu0 %v6953_v13 }
 0x520   :  { %v6550_v21 = vpop.f32.mrf.mxu0  ;;  %3766 = vmatpush.msrb.mxu1 %v5544_v58  ;;  %3731 = vmatpush.msrb.mxu0 %v6955_v20 }
 0x521   :  { %3242 = vmatmul.f32.vlgmr.msrb.gmra.mxu2 %v3241_v38  ;;  %3344 = vmatmul.f32.gmra.mxu3 %v6535_v1  ;;  %v3270_v38 = vsub.f32 %v3210_v27, %v6582_v59 }
 0x522   :  { %v6554_v49 = vpop.f32.mrf.mxu1  ;;  %3768 = vmatpush.msrb.mxu1 %v5546_v8  ;;  %3886 = vmatpush.msrb.mxu2 %v6954_v46 }
 0x523   :  { %3401 = vmatmul.f32.gmra.mxu0 %v3246_v37 }
 0x524   :  { %v2549_v43 = vpop.f32.mrf.mxu3  ;;  %3770 = vmatpush.msrb.mxu1 %v5584_v25  ;;  %3734 = vmatpush.msrb.mxu0 %v6956_v2 }
 0x525   :  { %3454 = vmatmul.f32.gmra.mxu1 %v3247_v50 }
 0x526   :  { %3772 = vmatpush.msrb.mxu1 %v5604_v52  ;;  %3737 = vmatpush.msrb.mxu0 %v6957_v57 }
 0x528   :  { %v6567_v33 = vpop.f32.mrf.mxu0  ;;  %3774 = vmatpush.msrb.mxu1 %v5630_v60  ;;  %3740 = vmatpush.msrb.mxu0 %v6958_v28 }
 0x529   :  { %3250 = vmatmul.f32.gmra.mxu2 %v3249_v18  ;;  %3348 = vmatmul.f32.gmra.mxu3 %v6547_v5 }
 0x52a   :  { %v6572_v22 = vpop.f32.mrf.mxu1  ;;  %3776 = vmatpush.msrb.mxu1 %v5649_v12  ;;  %3743 = vmatpush.msrb.mxu0 %v6959_v16 }
 0x52b   :  { %3406 = vmatmul.f32.gmra.mxu0 %v3254_v23  ;;  %v3271_v23 = vand.u32 4294901760, %v3270_v38 }
 0x52c   :  { %v2451_v48 = vpop.f32.mrf.mxu2  ;;  %v2553_v32 = vpop.f32.mrf.mxu3  ;;  %3778 = vmatpush.msrb.mxu1 %v5661_v11  ;;  %3746 = vmatpush.msrb.mxu0 %v6960_v29 }
 0x52d   :  { %v2550_v44 = vadd.f32 %v2549_v43, %v2451_v48  ;;  %3460 = vmatmul.f32.gmra.mxu1 %v3255_v54  ;;  %v3272_v18 = vsub.f32 %v3270_v38, %v3271_v23 }
 0x52e   :  { %3780 = vmatpush.msrb.mxu1 %v5681_v14  ;;  %3749 = vmatpush.msrb.mxu0 %v6961_v0 }
 0x52f   :  { %v3273_v4 = vand.u32 4294901760, %v3272_v18  ;;  %v2606_v18 = vadd.f32 %v6550_v21, %v2550_v44 }
 0x530   :  { %v2615_v17 = vpop.f32.mrf.mxu0 }
 0x531   :  { %3258 = vmatmul.f32.gmra.mxu2 %v3257_v56  ;;  %3352 = vmatmul.f32.gmra.mxu3 %v6565_v47 }
 0x532   :  { %v6586_v37 = vpop.f32.mrf.mxu1 }
 0x533   :  { %3411 = vmatmul.f32.gmra.mxu0 %v3262_v42 }
 0x534   :  { %v2459_v50 = vpop.f32.mrf.mxu2  ;;  %v2557_v19 = vpop.f32.mrf.mxu3 }
 0x535   :  { %3466 = vmatmul.f32.gmra.mxu1 %v3263_v45  ;;  %v6962_v45 = vld [vmem:[#allocation14_spill] sm:$0xff]  ;;  %v2554_v16 = vadd.f32 %v2553_v32, %v2459_v50 }
 0x538   :  { %v2620_v43 = vpop.f32.mrf.mxu0 }
 0x539   :  { %3266 = vmatmul.f32.gmra.mxu2 %v3265_v41  ;;  %3356 = vmatmul.f32.gmra.mxu3 %v6582_v59 }
 0x53a   :  { %v6590_v24 = vpop.f32.mrf.mxu1 }
 0x53b   :  { %3416 = vmatmul.f32.gmra.mxu0 %v3270_v38 }
 0x53c   :  { %v2467_v54 = vpop.f32.mrf.mxu2  ;;  %v2561_v61 = vpop.f32.mrf.mxu3 }
 0x53d   :  { %3472 = vmatmul.f32.gmra.mxu1 %v3271_v23 }
 0x540   :  { %v2625_v42 = vpop.f32.mrf.mxu0 }
 0x541   :  { %3274 = vmatmul.f32.gmra.mxu2 %v3273_v4  ;;  %3566 = vmatmul.f32.vlgmr.msra.gmra.mxu3 %v6517_v35 }
 0x542   :  { %4010 = vmatpush.msra.mxu3 %v6954_v46  ;;  %v2681_v56 = vpop.f32.mrf.mxu1 }
 0x544   :  { %v2475_v48 = vpop.f32.mrf.mxu2  ;;  %v2565_v27 = vpop.f32.mrf.mxu3 }
 0x548   :  { %v2840_v41 = vpop.f32.mrf.mxu0 }
 0x549   :  { %3520 = vmatmul.f32.vlgmr.msra.gmra.mxu2 %v6517_v35  ;;  %3570 = vmatmul.f32.gmra.mxu3 %v6535_v1  ;;  %v2658_v35 = vadd.f32 %v6554_v49, %v2606_v18 }
 0x54a   :  { %3988 = vmatpush.msra.mxu2 %v6962_v45  ;;  %v2938_v4 = vpop.f32.mrf.mxu1  ;;  %v2611_v45 = vadd.f32 %v6567_v33, %v2554_v16 }
 0x54c   :  { %v2483_v40 = vpop.f32.mrf.mxu2  ;;  %v2775_v38 = vpop.f32.mrf.mxu3  ;;  %v2664_v44 = vadd.f32 %v6572_v22, %v2611_v45 }
 0x54d   :  { %v2566_v23 = vadd.f32 %v2565_v27, %v2483_v40 }
 0x54f   :  { %v2626_v0 = vadd.f32 %v2625_v42, %v2566_v23 }
 0x550   :  { %v2848_v2 = vpop.f32.mrf.mxu0 }
 0x551   :  { %3524 = vmatmul.f32.gmra.mxu2 %v6535_v1  ;;  %3574 = vmatmul.f32.gmra.mxu3 %v6547_v5  ;;  %v2682_v29 = vadd.f32 %v2681_v56, %v2626_v0  ;;  %v2558_v1 = vadd.f32 %v2557_v19, %v2467_v54 }
 0x552   :  { %v2942_v27 = vpop.f32.mrf.mxu1 }
 0x553   :  { %v2616_v42 = vadd.f32 %v2615_v17, %v2558_v1 }
 0x554   :  { %v2729_v30 = vpop.f32.mrf.mxu2  ;;  %v2779_v28 = vpop.f32.mrf.mxu3 }
 0x555   :  { %v2730_v57 = vadd.f32 %v2729_v30, %v2658_v35  ;;  %v2670_v16 = vadd.f32 %v6586_v37, %v2616_v42 }
 0x557   :  { %v2776_v20 = vadd.f32 %v2775_v38, %v2730_v57  ;;  %v2562_v57 = vadd.f32 %v2561_v61, %v2475_v48 }
 0x558   :  { %v2856_v30 = vpop.f32.mrf.mxu0 }
 0x559   :  { %3528 = vmatmul.f32.gmra.mxu2 %v6547_v5  ;;  %3578 = vmatmul.f32.gmra.mxu3 %v6565_v47  ;;  %v2841_v21 = vadd.f32 %v2840_v41, %v2776_v20  ;;  %v2621_v45 = vadd.f32 %v2620_v43, %v2562_v57 }
 0x55a   :  { %v2946_v5 = vpop.f32.mrf.mxu1 }
 0x55b   :  { %v2939_v0 = vadd.f32 %v2938_v4, %v2841_v21  ;;  %v2676_v38 = vadd.f32 %v6590_v24, %v2621_v45 }
 0x55c   :  { %v2733_v32 = vpop.f32.mrf.mxu2  ;;  %v2783_v50 = vpop.f32.mrf.mxu3 }
 0x55d   :  { %v2734_v49 = vadd.f32 %v2733_v32, %v2664_v44 }
 0x55f   :  { %v2780_v56 = vadd.f32 %v2779_v28, %v2734_v49 }
 0x560   :  { %v2864_v28 = vpop.f32.mrf.mxu0 }
 0x561   :  { %3532 = vmatmul.f32.gmra.mxu2 %v6565_v47  ;;  %3582 = vmatmul.f32.gmra.mxu3 %v6582_v59  ;;  %v2849_v33 = vadd.f32 %v2848_v2, %v2780_v56 }
 0x562   :  { %v2950_v61 = vpop.f32.mrf.mxu1 }
 0x563   :  { %v2943_v20 = vadd.f32 %v2942_v27, %v2849_v33 }
 0x564   :  { %v2737_v19 = vpop.f32.mrf.mxu2  ;;  %v2787_v54 = vpop.f32.mrf.mxu3 }
 0x565   :  { %v2738_v22 = vadd.f32 %v2737_v19, %v2670_v16 }
 0x567   :  { %v2784_v40 = vadd.f32 %v2783_v50, %v2738_v22 }
 0x568   :  { %v2872_v21 = vpop.f32.mrf.mxu0 }
 0x569   :  { %3536 = vmatmul.f32.gmra.mxu2 %v6582_v59  ;;  %v2857_v17 = vadd.f32 %v2856_v30, %v2784_v40 }
 0x56a   :  { %v2954_v1 = vpop.f32.mrf.mxu1 }
 0x56b   :  { %v2947_v47 = vadd.f32 %v2946_v5, %v2857_v17 }
 0x56c   :  { %v2741_v41 = vpop.f32.mrf.mxu2  ;;  %v2791_v23 = vpop.f32.mrf.mxu3 }
 0x56d   :  { %v2742_v2 = vadd.f32 %v2741_v41, %v2676_v38 }
 0x56f   :  { %v2788_v48 = vadd.f32 %v2787_v54, %v2742_v2 }
 0x570   :  { %v3118_v42 = vpop.f32.mrf.mxu0 }
 0x571   :  { %v2865_v18 = vadd.f32 %v2864_v28, %v2788_v48 }
 0x572   :  { %v3164_v30 = vpop.f32.mrf.mxu1 }
 0x573   :  { %v2951_v37 = vadd.f32 %v2950_v61, %v2865_v18 }
 0x574   :  { %v2745_v4 = vpop.f32.mrf.mxu2  ;;  %v3046_v35 = vpop.f32.mrf.mxu3 }
 0x575   :  { %v2746_v27 = vadd.f32 %v2745_v4, %v2682_v29 }
 0x577   :  { %v2792_v43 = vadd.f32 %v2791_v23, %v2746_v27 }
 0x578   :  { %v3122_v28 = vpop.f32.mrf.mxu0 }
 0x579   :  { %v2873_v44 = vadd.f32 %v2872_v21, %v2792_v43 }
 0x57b   :  { %v2955_v59 = vadd.f32 %v2954_v1, %v2873_v44 }
 0x57c   :  { %v2994_v32 = vpop.f32.mrf.mxu2  ;;  %v3052_v50 = vpop.f32.mrf.mxu3 }
 0x57d   :  { %v2995_v49 = vadd.f32 %v2994_v32, %v2939_v0  ;;  %v3168_v0 = vpop.f32.mrf.mxu1 }
 0x57f   :  { %v3047_v24 = vadd.f32 %v3046_v35, %v2995_v49 }
 0x580   :  { %v3126_v48 = vpop.f32.mrf.mxu0 }
 0x581   :  { %v3119_v56 = vadd.f32 %v3118_v42, %v3047_v24 }
 0x583   :  { %v6610_v33 = vadd.f32 %v3164_v30, %v3119_v56 }
 0x584   :  { %v2999_v57 = vpop.f32.mrf.mxu2  ;;  %v3058_v5 = vpop.f32.mrf.mxu3 }
 0x585   :  { %v3000_v16 = vadd.f32 %v2999_v57, %v2943_v20  ;;  %v3172_v4 = vpop.f32.mrf.mxu1 }
 0x587   :  { %v3053_v19 = vadd.f32 %v3052_v50, %v3000_v16 }
 0x588   :  { %v3130_v27 = vpop.f32.mrf.mxu0 }
 0x589   :  { %v3123_v31 = vadd.f32 %v3122_v28, %v3053_v19 }
 0x58c   :  { %v3004_v54 = vpop.f32.mrf.mxu2  ;;  %v3064_v29 = vpop.f32.mrf.mxu3 }
 0x58d   :  { %v3005_v22 = vadd.f32 %v3004_v54, %v2947_v47  ;;  %v3176_v47 = vpop.f32.mrf.mxu1 }
 0x58f   :  { %v3059_v45 = vadd.f32 %v3058_v5, %v3005_v22 }
 0x590   :  { %v3134_v1 = vpop.f32.mrf.mxu0 }
 0x594   :  { %v3009_v40 = vpop.f32.mrf.mxu2  ;;  %v3070_v17 = vpop.f32.mrf.mxu3 }
 0x595   :  { %v3010_v38 = vadd.f32 %v3009_v40, %v2951_v37  ;;  %v6614_v50 = vpop.f32.mrf.mxu1 }
 0x597   :  { %v3065_v41 = vadd.f32 %v3064_v29, %v3010_v38 }
 0x598   :  { %v3397_v24 = vpop.f32.mrf.mxu0 }
 0x59c   :  { %v3014_v23 = vpop.f32.mrf.mxu2  ;;  %v3341_v2 = vpop.f32.mrf.mxu3 }
 0x59d   :  { %v3015_v61 = vadd.f32 %v3014_v23, %v2955_v59  ;;  %v3449_v42 = vpop.f32.mrf.mxu1 }
 0x59f   :  { %v6612_v18 = vadd.f32 %v3070_v17, %v3015_v61 }
 0x5a0   :  { %v3402_v30 = vpop.f32.mrf.mxu0 }
 0x5a4   :  { %v3243_v35 = vpop.f32.mrf.mxu2  ;;  %v3345_v20 = vpop.f32.mrf.mxu3 }
 0x5a5   :  { %v3455_v57 = vpop.f32.mrf.mxu1  ;;  %v3342_v40 = vadd.f32 %v3341_v2, %v3243_v35  ;;  %v3131_v35 = vadd.f32 %v3130_v27, %v3065_v41 }
 0x5a7   :  { %v3398_v61 = vadd.f32 %v3397_v24, %v3342_v40  ;;  %v3177_v19 = vadd.f32 %v3176_v47, %v3131_v35 }
 0x5a8   :  { %v3407_v54 = vpop.f32.mrf.mxu0 }
 0x5a9   :  { %v3450_v36 = vadd.f32 %v3449_v42, %v3398_v61 }
 0x5ac   :  { %v3251_v21 = vpop.f32.mrf.mxu2  ;;  %v3349_v43 = vpop.f32.mrf.mxu3 }
 0x5ad   :  { %v3346_v29 = vadd.f32 %v3345_v20, %v3251_v21  ;;  %v3461_v38 = vpop.f32.mrf.mxu1  ;;  %v3127_v21 = vadd.f32 %v3126_v48, %v3059_v45 }
 0x5af   :  { %v3403_v23 = vadd.f32 %v3402_v30, %v3346_v29  ;;  %v3173_v42 = vadd.f32 %v3172_v4, %v3127_v21 }
 0x5b0   :  { %v3412_v9 = vpop.f32.mrf.mxu0 }
 0x5b1   :  { %v3456_v26 = vadd.f32 %v3455_v57, %v3403_v23 }
 0x5b4   :  { %v3259_v44 = vpop.f32.mrf.mxu2  ;;  %v3353_v32 = vpop.f32.mrf.mxu3 }
 0x5b5   :  { %v3350_v17 = vadd.f32 %v3349_v43, %v3259_v44  ;;  %v3467_v20 = vpop.f32.mrf.mxu1  ;;  %v3169_v43 = vadd.f32 %v3168_v0, %v3123_v31 }
 0x5b7   :  { %v3408_v13 = vadd.f32 %v3407_v54, %v3350_v17 }
 0x5b9   :  { %v3462_v39 = vadd.f32 %v3461_v38, %v3408_v13  ;;  %v3417_v13 = vpop.f32.mrf.mxu0 }
 0x5bc   :  { %v3267_v37 = vpop.f32.mrf.mxu2  ;;  %v3357_v49 = vpop.f32.mrf.mxu3 }
 0x5bd   :  { %v3354_v34 = vadd.f32 %v3353_v32, %v3267_v37 }
 0x5bf   :  { %v3413_v10 = vadd.f32 %v3412_v9, %v3354_v34 }
 0x5c1   :  { %v3468_v54 = vadd.f32 %v3467_v20, %v3413_v10  ;;  %v3473_v10 = vpop.f32.mrf.mxu1 }
 0x5c4   :  { %v3275_v59 = vpop.f32.mrf.mxu2  ;;  %v3567_v56 = vpop.f32.mrf.mxu3 }
 0x5c5   :  { %v3358_v44 = vadd.f32 %v3357_v49, %v3275_v59 }
 0x5c7   :  { %v3418_v9 = vadd.f32 %v3417_v13, %v3358_v44  ;;  %v6963_v44 = vld [vmem:[#allocation21_spill] sm:$0xff]  ;;  %v6971_v13 = vld [vmem:[#allocation24_spill] sm:$0xff] }
 0x5cc   :  { %v3521_v5 = vpop.f32.mrf.mxu2  ;;  %v3571_v16 = vpop.f32.mrf.mxu3 }
 0x5cd   :  { %v3522_v46 = vadd.f32 %v3521_v5, %v3450_v36 }
 0x5cf   :  { %v3568_v24 = vadd.f32 %v3567_v56, %v3522_v46  ;;  %v3474_v46 = vadd.f32 %v3473_v10, %v3418_v9  ;;  %v6973_v9 = vld [vmem:[#allocation26_spill] sm:$0xff] }
 0x5d0   :  { %v6976_v10 = vld [vmem:[#allocation42_spill] sm:$0xff] }
 0x5d4   :  { %v3525_v22 = vpop.f32.mrf.mxu2  ;;  %v3575_v63 = vpop.f32.mrf.mxu3 }
 0x5d5   :  { %v3526_v3 = vadd.f32 %v3525_v22, %v3456_v26 }
 0x5d7   :  { %v3572_v2 = vadd.f32 %v3571_v16, %v3526_v3 }
 0x5d9   :  { %v6616_v57 = vadd.f32 %v3572_v2, %v3169_v43 }
 0x5db   :  { %v3594_v31 = vmul.f32 %v6616_v57, %v5752_v53 }
 0x5dc   :  { %v3529_v6 = vpop.f32.mrf.mxu2  ;;  %v3579_v32 = vpop.f32.mrf.mxu3 }
 0x5dd   :  { %v3530_v14 = vadd.f32 %v3529_v6, %v3462_v39  ;;  %v6619_v39 = vadd.f32 %v3568_v24, %v6610_v33  ;;  %v3135_v6 = vadd.f32 %v3134_v1, %v6612_v18  ;;  %v3599_v45 = vsel %vm36_vm0, %v3594_v31, 0.0  ;;  %v6964_v24 = vld [vmem:[#allocation22_spill] sm:$0xff]  ;;  %v6975_v31 = vld [vmem:[#allocation27_spill] sm:$0xff] }
 0x5df   :  { %v3576_v30 = vadd.f32 %v3575_v63, %v3530_v14  ;;  %v3593_v63 = vmul.f32 %v6619_v39, %v5703_v55  ;;  %v3181_v18 = vadd.f32 %v6614_v50, %v3135_v6  ;;  %v6977_v6 = vld [vmem:[#allocation32_spill] sm:$0xff] }
 0x5e1   :  { %v6621_v36 = vadd.f32 %v3576_v30, %v3173_v42  ;;  %v3598_v48 = vsel %vm36_vm0, %v3593_v63, 0.0  ;;  %v6965_v30 = vld [vmem:[#allocation23_spill] sm:$0xff]  ;;  %v6969_v42 = vld [vmem:[#allocation33_spill] sm:$0xff]  ;;  %v6978_v63 = vld [vmem:[#allocation12_spill] sm:$0xff] }
 0x5e2   :  { %v3600_v47 = vadd.f32 %v3599_v45, %v3598_v48  ;;  %v6982_v45 = vld [vmem:[#allocation44_spill] sm:$0xff] }
 0x5e3   :  { %v3595_v34 = vmul.f32 %v6621_v36, %v5760_v62 }
 0x5e4   :  { %v3533_v37 = vpop.f32.mrf.mxu2  ;;  %v3583_v0 = vpop.f32.mrf.mxu3 }
 0x5e5   :  { %v3534_v26 = vadd.f32 %v3533_v37, %v3468_v54  ;;  %v3601_v4 = vsel %vm36_vm0, %v3595_v34, 0.0  ;;  %v6966_v54 = vld [vmem:[#allocation28_spill] sm:$0xff]  ;;  %v6968_v37 = vld [vmem:[#allocation37_spill] sm:$0xff]  ;;  %v6979_v34 = vld [vmem:[#allocation35_spill] sm:$0xff] }
 0x5e6   :  { %v3602_v59 = vadd.f32 %v3601_v4, %v3600_v47 }
 0x5e7   :  { %v3580_v3 = vadd.f32 %v3579_v32, %v3534_v26  ;;  %v6967_v32 = vld [vmem:[#allocation30_spill] sm:$0xff]  ;;  %v6970_v26 = vld [vmem:[#allocation7_spill] sm:$0xff] }
 0x5e9   :  { %v6625_v14 = vadd.f32 %v3580_v3, %v3177_v19  ;;  %v6972_v19 = vld [vmem:[#allocation38_spill] sm:$0xff]  ;;  %v6974_v3 = vld [vmem:[#allocation39_spill] sm:$0xff] }
 0x5eb   :  { %v3596_v28 = vmul.f32 %v6625_v14, %v5769_v7 }
 0x5ec   :  { %v3537_v33 = vpop.f32.mrf.mxu2 }
 0x5ed   :  { %v3538_v41 = vadd.f32 %v3537_v33, %v3474_v46  ;;  %v3603_v1 = vsel %vm36_vm0, %v3596_v28, 0.0  ;;  %v6980_v46 = vld [vmem:[#allocation41_spill] sm:$0xff]  ;;  %v6981_v33 = vld [vmem:[#allocation43_spill] sm:$0xff]  ;;  %v6983_v28 = vld [vmem:[#allocation6_spill] sm:$0xff] }
 0x5ee   :  { %v3604_v5 = vadd.f32 %v3603_v1, %v3602_v59 }
 0x5ef   :  { %v3584_v27 = vadd.f32 %v3583_v0, %v3538_v41 }
 0x5f1   :  { %v6639_v49 = vadd.f32 %v3584_v27, %v3181_v18 }
 0x5f3   :  { %v3597_v56 = vmul.f32 %v6639_v49, %v5790_v51 }
 0x5f5   :  { %v3605_v16 = vsel %vm1336_vm3, %v3597_v56, 0.0 }
 0x5f6   :  { %v3606_v29 = vadd.f32 %v3605_v16, %v3604_v5 }
 0x5f8   :  { %v3607_v22 = vrot.slane %v3606_v29, 4 }
 0x5fa   :  { %v3608_v40 = vadd.f32 %v3607_v22, %v3606_v29 }
 0x5fc   :  { %v3609_v17 = vrot.slane %v3608_v40, 2 }
 0x5fe   :  { %v3610_v38 = vadd.f32 %v3609_v17, %v3608_v40 }
 0x600   :  { %v3611_v23 = vrot.slane %v3610_v38, 1 }
 0x602   :  { %v3612_v50 = vadd.f32 %v3611_v23, %v3610_v38 }
 0x604   :  { %v3614_v61 = vsel %vm36_vm0, %v3612_v50, 0  ;;  %v6984_v50 = vld [vmem:[#allocation18_spill] sm:$0xff] }
 0x605   :  { %v3641_v20 = vand.u32 4294901760, %v3614_v61 }
 0x607   :  { %v3642_v21 = vsub.f32 %v3614_v61, %v3641_v20  ;;  %3712 = vmatmul.f32.vlgmr.msra.gmra.mxu1 %v3641_v20  ;;  %v6985_v61 = vld [vmem:[#allocation19_spill] sm:$0xff] }
 0x608   :  { %3844 = vmatpush.msra.mxu1 %v5535_v15 }
 0x609   :  { %v3643_v2 = vand.u32 4294901760, %v3642_v21 }
 0x60a   :  { %3846 = vmatpush.msra.mxu1 %v5544_v58 }
 0x60b   :  { %v3644_v35 = vsub.f32 %v3642_v21, %v3643_v2 }
 0x60c   :  { %3848 = vmatpush.msra.mxu1 %v5546_v8 }
 0x60d   :  { %v3645_v43 = vand.u32 4294901760, %v3644_v35 }
 0x60e   :  { %3850 = vmatpush.msra.mxu1 %v5584_v25 }
 0x60f   :  { %3646 = vmatmul.f32.vlgmr.msra.gmra.mxu0 %v3645_v43  ;;  %3784 = vmatmul.f32.vlgmr.msrb.gmra.mxu1 %v3643_v2 }
 0x610   :  { %3798 = vmatpush.msra.mxu0 %v6963_v44  ;;  %3852 = vmatpush.msra.mxu1 %v5604_v52 }
 0x612   :  { %3802 = vmatpush.msra.mxu0 %v6964_v24  ;;  %3854 = vmatpush.msra.mxu1 %v5630_v60 }
 0x614   :  { %3806 = vmatpush.msra.mxu0 %v6965_v30  ;;  %3856 = vmatpush.msra.mxu1 %v5649_v12 }
 0x616   :  { %3810 = vmatpush.msra.mxu0 %v6966_v54  ;;  %3858 = vmatpush.msra.mxu1 %v5661_v11 }
 0x617   :  { %3752 = vmatmul.f32.vlgmr.msrb.gmra.mxu0 %v3642_v21 }
 0x618   :  { %3814 = vmatpush.msra.mxu0 %v6967_v32  ;;  %3860 = vmatpush.msra.mxu1 %v6968_v37 }
 0x619   :  { %3862 = vmatmul.f32.vlgmr.msra.gmra.mxu1 %v3641_v20 }
 0x61a   :  { %3818 = vmatpush.msra.mxu0 %v6969_v42  ;;  %3962 = vmatpush.msrb.mxu1 %v6970_v26 }
 0x61c   :  { %4096 = vmatpush.msra.mxu1 %v6971_v13  ;;  %3822 = vmatpush.msra.mxu0 %v6972_v19 }
 0x61e   :  { %4102 = vmatpush.msra.mxu1 %v6973_v9  ;;  %3826 = vmatpush.msra.mxu0 %v6974_v3 }
 0x620   :  { %4108 = vmatpush.msra.mxu1 %v6975_v31  ;;  %3830 = vmatpush.msra.mxu0 %v6976_v10 }
 0x621   :  { %3832 = vmatmul.f32.vlgmr.msra.gmra.mxu0 %v3641_v20  ;;  %v6991_v20 = vld [vmem:[#allocation34_spill] sm:$0xff] }
 0x622   :  { %4114 = vmatpush.msra.mxu1 %v6977_v6  ;;  %3939 = vmatpush.msrb.mxu0 %v6978_v63 }
 0x624   :  { %4058 = vmatpush.msra.mxu0 %v5535_v15  ;;  %4120 = vmatpush.msra.mxu1 %v6979_v34 }
 0x626   :  { %4060 = vmatpush.msra.mxu0 %v5544_v58  ;;  %4126 = vmatpush.msra.mxu1 %v6980_v46 }
 0x628   :  { %4062 = vmatpush.msra.mxu0 %v5546_v8  ;;  %4132 = vmatpush.msra.mxu1 %v6981_v33 }
 0x62a   :  { %4064 = vmatpush.msra.mxu0 %v5584_v25  ;;  %4138 = vmatpush.msra.mxu1 %v6982_v45 }
 0x62c   :  { %4066 = vmatpush.msra.mxu0 %v5604_v52  ;;  %4144 = vmatpush.msra.mxu1 %v6983_v28 }
 0x62e   :  { %4068 = vmatpush.msra.mxu0 %v5630_v60 }
 0x630   :  { %4070 = vmatpush.msra.mxu0 %v5649_v12 }
 0x632   :  { %4072 = vmatpush.msra.mxu0 %v5661_v11 }
 0x634   :  { %4074 = vmatpush.msra.mxu0 %v6968_v37 }
 0x684   :  { %v3713_v41 = vpop.f32.mrf.mxu1 }
 0x68c   :  { %v3647_v0 = vpop.f32.mrf.mxu0  ;;  %v3785_v4 = vpop.f32.mrf.mxu1 }
 0x68d   :  { %v3714_v18 = vadd.f32 %v3713_v41, %v3647_v0 }
 0x694   :  { %v3753_v48 = vpop.f32.mrf.mxu0 }
 0x695   :  { %v3754_v27 = vadd.f32 %v3753_v48, %v3714_v18 }
 0x696   :  { %v3863_v56 = vpop.f32.mrf.mxu1 }
 0x697   :  { %v3786_v47 = vadd.f32 %v3785_v4, %v3754_v27 }
 0x69e   :  { %v3833_v1 = vpop.f32.mrf.mxu0 }
 0x69f   :  { %v3834_v59 = vadd.f32 %v3833_v1, %v3786_v47 }
 0x6a1   :  { %v3864_v5 = vadd.f32 %v3863_v56, %v3834_v59 }
 0x6a3   :  { %v6683_v16 = vmul.f32 0.001953125, %v3864_v5 }
 0x6a5   :  { %v3868_v29 = vsel %vm1599_vm5, %v6683_v16, 0 }
 0x6a6   :  { %v3887_v22 = vand.u32 4294901760, %v3868_v29 }
 0x6a8   :  { %v3888_v40 = vsub.f32 %v3868_v29, %v3887_v22  ;;  %3918 = vmatmul.f32.vlgmr.msrb.gmra.mxu3 %v3887_v22 }
 0x6a9   :  { %4198 = vmatpush.msrb.mxu3 %v5535_v15 }
 0x6aa   :  { %v3889_v17 = vand.u32 4294901760, %v3888_v40  ;;  %3942 = vmatmul.f32.vlgmr.msrb.gmra.mxu0 %v3888_v40 }
 0x6ab   :  { %4200 = vmatpush.msrb.mxu3 %v5544_v58  ;;  %4232 = vmatpush.msrb.mxu0 %v6963_v44 }
 0x6ac   :  { %v3890_v38 = vsub.f32 %v3888_v40, %v3889_v17  ;;  %3966 = vmatmul.f32.vlgmr.msrb.gmra.mxu1 %v3889_v17 }
 0x6ad   :  { %4202 = vmatpush.msrb.mxu3 %v5546_v8  ;;  %4278 = vmatpush.msrb.mxu1 %v5535_v15  ;;  %v6986_v15 = vld [vmem:[#allocation20_spill] sm:$0xff] }
 0x6ae   :  { %v3891_v23 = vand.u32 4294901760, %v3890_v38  ;;  %4236 = vmatpush.msrb.mxu0 %v6964_v24 }
 0x6af   :  { %4204 = vmatpush.msrb.mxu3 %v5584_v25  ;;  %4280 = vmatpush.msrb.mxu1 %v5544_v58  ;;  %v6987_v58 = vld [vmem:[#allocation25_spill] sm:$0xff] }
 0x6b0   :  { %3892 = vmatmul.f32.vlgmr.msrb.gmra.mxu2 %v3891_v23  ;;  %4012 = vmatmul.f32.vlgmr.msra.gmra.mxu3 %v3887_v22 }
 0x6b1   :  { %4159 = vmatpush.msrb.mxu2 %v6984_v50  ;;  %4206 = vmatpush.msrb.mxu3 %v5604_v52 }
 0x6b2   :  { %4282 = vmatpush.msrb.mxu1 %v5546_v8  ;;  %4240 = vmatpush.msrb.mxu0 %v6965_v30  ;;  %v6988_v8 = vld [vmem:[#allocation29_spill] sm:$0xff] }
 0x6b3   :  { %4162 = vmatpush.msrb.mxu2 %v6985_v61  ;;  %4208 = vmatpush.msrb.mxu3 %v5630_v60 }
 0x6b4   :  { %4284 = vmatpush.msrb.mxu1 %v5584_v25  ;;  %4244 = vmatpush.msrb.mxu0 %v6966_v54  ;;  %v6989_v25 = vld [vmem:[#allocation31_spill] sm:$0xff] }
 0x6b5   :  { %4165 = vmatpush.msrb.mxu2 %v6986_v15  ;;  %4210 = vmatpush.msrb.mxu3 %v5649_v12  ;;  %v6994_v15 = vld [vmem:[#allocation14_spill] sm:$0xff] }
 0x6b6   :  { %4286 = vmatpush.msrb.mxu1 %v5604_v52  ;;  %4248 = vmatpush.msrb.mxu0 %v6967_v32  ;;  %v6990_v52 = vld [vmem:[#allocation11_spill] sm:$0xff] }
 0x6b7   :  { %4168 = vmatpush.msrb.mxu2 %v6987_v58  ;;  %4212 = vmatpush.msrb.mxu3 %v5661_v11 }
 0x6b8   :  { %3990 = vmatmul.f32.vlgmr.msra.gmra.mxu2 %v3887_v22  ;;  %4288 = vmatpush.msrb.mxu1 %v5630_v60  ;;  %v6992_v60 = vld [vmem:[#allocation36_spill] sm:$0xff] }
 0x6b9   :  { %4171 = vmatpush.msrb.mxu2 %v6988_v8  ;;  %4214 = vmatpush.msrb.mxu3 %v6968_v37 }
 0x6ba   :  { %4290 = vmatpush.msrb.mxu1 %v5649_v12  ;;  %4252 = vmatpush.msrb.mxu0 %v6969_v42  ;;  %v6993_v12 = vld [vmem:[#allocation40_spill] sm:$0xff] }
 0x6bb   :  { %4174 = vmatpush.msrb.mxu2 %v6989_v25  ;;  %4364 = vmatpush.msra.mxu3 %v6990_v52 }
 0x6bc   :  { %4292 = vmatpush.msrb.mxu1 %v5661_v11  ;;  %4256 = vmatpush.msrb.mxu0 %v6972_v19 }
 0x6bd   :  { %4177 = vmatpush.msrb.mxu2 %v6991_v20 }
 0x6be   :  { %4294 = vmatpush.msrb.mxu1 %v6968_v37  ;;  %4260 = vmatpush.msrb.mxu0 %v6974_v3 }
 0x6bf   :  { %4180 = vmatpush.msrb.mxu2 %v6992_v60 }
 0x6c0   :  { %4264 = vmatpush.msrb.mxu0 %v6976_v10 }
 0x6c1   :  { %4183 = vmatpush.msrb.mxu2 %v6993_v12 }
 0x6c3   :  { %4334 = vmatpush.msra.mxu2 %v6970_v26 }
 0x727   :  { %v3943_v11 = vpop.f32.mrf.mxu0 }
 0x729   :  { %v3967_v44 = vpop.f32.mrf.mxu1 }
 0x72b   :  { %v3919_v21 = vpop.f32.mrf.mxu3 }
 0x733   :  { %v3893_v2 = vpop.f32.mrf.mxu2  ;;  %v4013_v32 = vpop.f32.mrf.mxu3 }
 0x734   :  { %v3920_v35 = vadd.f32 %v3919_v21, %v3893_v2 }
 0x736   :  { %v3944_v43 = vadd.f32 %v3943_v11, %v3920_v35 }
 0x738   :  { %v3968_v24 = vadd.f32 %v3967_v44, %v3944_v43 }
 0x73b   :  { %v3991_v30 = vpop.f32.mrf.mxu2 }
 0x73c   :  { %v3992_v54 = vadd.f32 %v3991_v30, %v3968_v24 }
 0x73e   :  { %v4014_v37 = vadd.f32 %v4013_v32, %v3992_v54 }
 0x740   :  { %v4016_v42 = vperm.slane %v4014_v37, 0 }
 0x742   :  { %v4017_v13 = vsub.f32 %v6619_v39, %v4016_v42  ;;  %v4018_v19 = vsub.f32 %v6616_v57, %v4016_v42  ;;  %v4019_v9 = vsub.f32 %v6621_v36, %v4016_v42  ;;  %v4020_v3 = vsub.f32 %v6625_v14, %v4016_v42 }
 0x743   :  { %v4021_v31 = vsub.f32 %v6639_v49, %v4016_v42 }
 0x744   :  { %v4022_v10 = vmul.f32 %v4017_v13, %v5703_v55  ;;  %v4023_v6 = vmul.f32 %v4018_v19, %v5752_v53  ;;  %v4024_v34 = vmul.f32 %v4019_v9, %v5760_v62  ;;  %v4025_v46 = vmul.f32 %v4020_v3, %v5769_v7  ;;  %v3592_v3 = vld [vmem:[%s6792_s6] sm:$0x1] }
 0x745   :  { %v4026_v33 = vmul.f32 %v4021_v31, %v5790_v51 }
 0x746   :  { %v4027_v45 = vmul.f32 %v4022_v10, %v4022_v10  ;;  %v4028_v28 = vmul.f32 %v4023_v6, %v4023_v6  ;;  %v4029_v41 = vmul.f32 %v4024_v34, %v4024_v34  ;;  %v4030_v0 = vmul.f32 %v4025_v46, %v4025_v46 }
 0x747   :  { %v4031_v27 = vmul.f32 %v4026_v33, %v4026_v33 }
 0x748   :  { %v4032_v48 = vsel %vm36_vm0, %v4027_v45, 0.0  ;;  %v4033_v4 = vsel %vm36_vm0, %v4028_v28, 0.0  ;;  %v4035_v55 = vsel %vm36_vm0, %v4029_v41, 0.0  ;;  %v4037_v53 = vsel %vm36_vm0, %v4030_v0, 0.0 }
 0x749   :  { %v4034_v18 = vadd.f32 %v4033_v4, %v4032_v48  ;;  %v4039_v7 = vsel %vm1336_vm3, %v4031_v27, 0.0 }
 0x74b   :  { %v4036_v47 = vadd.f32 %v4035_v55, %v4034_v18 }
 0x74d   :  { %v4038_v62 = vadd.f32 %v4037_v53, %v4036_v47 }
 0x74f   :  { %v4040_v1 = vadd.f32 %v4039_v7, %v4038_v62 }
 0x751   :  { %v4041_v51 = vrot.slane %v4040_v1, 4 }
 0x753   :  { %v4042_v59 = vadd.f32 %v4041_v51, %v4040_v1 }
 0x755   :  { %v4043_v56 = vrot.slane %v4042_v59, 2 }
 0x757   :  { %v4044_v5 = vadd.f32 %v4043_v56, %v4042_v59 }
 0x759   :  { %v4045_v29 = vrot.slane %v4044_v5, 1 }
 0x75b   :  { %v4046_v22 = vadd.f32 %v4045_v29, %v4044_v5 }
 0x75d   :  { %v4048_v40 = vsel %vm36_vm0, %v4046_v22, 0 }
 0x75e   :  { %v4075_v17 = vand.u32 4294901760, %v4048_v40 }
 0x760   :  { %4146 = vmatmul.f32.vlgmr.msra.gmra.mxu1 %v4075_v17  ;;  %v4076_v38 = vsub.f32 %v4048_v40, %v4075_v17 }
 0x761   :  { %4458 = vmatpush.msra.mxu1 %v6970_v26 }
 0x762   :  { %4186 = vmatmul.f32.vlgmr.msrb.gmra.mxu2 %v4076_v38  ;;  %v4077_v23 = vand.u32 4294901760, %v4076_v38 }
 0x763   :  { %4387 = vmatpush.msrb.mxu2 %v6978_v63 }
 0x764   :  { %4218 = vmatmul.f32.vlgmr.msrb.gmra.mxu3 %v4077_v23  ;;  %v4078_v50 = vsub.f32 %v4076_v38, %v4077_v23 }
 0x765   :  { %4410 = vmatpush.msrb.mxu3 %v6970_v26 }
 0x766   :  { %v4079_v61 = vand.u32 4294901760, %v4078_v50 }
 0x768   :  { %4080 = vmatmul.f32.vlgmr.msra.gmra.mxu0 %v4079_v61  ;;  %4296 = vmatmul.f32.vlgmr.msrb.gmra.mxu1 %v4075_v17 }
 0x769   :  { %4436 = vmatpush.msra.mxu0 %v6994_v15  ;;  %4559 = vmatpush.msrb.mxu1 %v6970_v26 }
 0x770   :  { %4266 = vmatmul.f32.vlgmr.msrb.gmra.mxu0 %v4075_v17 }
 0x771   :  { %4536 = vmatpush.msrb.mxu0 %v6978_v63  ;;  %v3591_v63 = vld [vmem:[%s6791_s5] sm:$0x1]  ;;  %s4732_s5 = smov 124  }
 0x7dd   :  { %v4147_v58 = vpop.f32.mrf.mxu1 }
 0x7e5   :  { %v4081_v8 = vpop.f32.mrf.mxu0  ;;  %v4187_v20 = vpop.f32.mrf.mxu2 }
 0x7e6   :  { %v4148_v25 = vadd.f32 %v4147_v58, %v4081_v8  ;;  %v4297_v11 = vpop.f32.mrf.mxu1 }
 0x7e7   :  { %v4219_v12 = vpop.f32.mrf.mxu3 }
 0x7e8   :  { %v4188_v60 = vadd.f32 %v4187_v20, %v4148_v25 }
 0x7ea   :  { %v4220_v21 = vadd.f32 %v4219_v12, %v4188_v60 }
 0x7ed   :  { %v4267_v2 = vpop.f32.mrf.mxu0 }
 0x7ee   :  { %v4268_v35 = vadd.f32 %v4267_v2, %v4220_v21 }
 0x7f0   :  { %v4298_v43 = vadd.f32 %v4297_v11, %v4268_v35 }
 0x7f2   :  { %v4300_v44 = vmul.f32 0.001953125, %v4298_v43 }
 0x7f4   :  { %v4301_v24 = vadd.f32 1e-05, %v4300_v44 }
 0x7f6   :  { %4701 = vrsqrt.f32 %v4301_v24  ;;  %vm4308_vm10 = vweird.f32 %v4301_v24 }
 0x7fc   :  { %v4702_v30 = vpop.eup %4701 }
 0x7fd   :  { %v4303_v54 = vmul.f32 %v4702_v30, %v4301_v24  ;;  %vm4309_vm9 = vweird.f32 %v4702_v30 }
 0x7fe   :  { %vm4310_vm11 = vmor %vm4308_vm10, %vm4309_vm9 }
 0x7ff   :  { %v4304_v32 = vmul.f32 %v4702_v30, %v4303_v54 }
 0x801   :  { %v4305_v37 = vmul.f32 0.5, %v4304_v32 }
 0x803   :  { %v4306_v42 = vsub.f32 1.5, %v4305_v37 }
 0x805   :  { %v4307_v13 = vmul.f32 %v4702_v30, %v4306_v42 }
 0x807   :  { %v4311_v19 = vsel %vm4310_vm11, %v4702_v30, %v4307_v13 }
 0x808   :  { %v4312_v9 = vmul.f32 %v4311_v19, %v3591_v63  ;;  %v4626_v63 = vld [vmem:[%s6786_s0 + $0x8] sm:$0xff] }
 0x80a   :  { %v4313_v31 = vmul.f32 %v4312_v9, %v6683_v16  ;;  %v4316_v10 = vsel %vm1599_vm5, %v4312_v9, 0  ;;  %v4649_v9 = vld [vmem:[%s6786_s0 + $0x10] sm:$0xff] }
 0x80b   :  { %v4335_v6 = vand.u32 4294901760, %v4316_v10 }
 0x80c   :  { %v4314_v34 = vsub.f32 %v3592_v3, %v4313_v31  ;;  %v4625_v3 = vld [vmem:[%s6786_s0] sm:$0xff] }
 0x80d   :  { %v4336_v46 = vsub.f32 %v4316_v10, %v4335_v6  ;;  %4366 = vmatmul.f32.vlgmr.msra.gmra.mxu3 %v4335_v6  ;;  %4438 = vmatmul.f32.vlgmr.msra.gmra.mxu0 %v4335_v6 }
 0x80e   :  { %4460 = vmatmul.f32.vlgmr.msra.gmra.mxu1 %v4335_v6  ;;  %v4465_v33 = vsel %vm1599_vm5, %v4314_v34, 0  ;;  %4513 = vmatpush.msra.mxu3 %v6990_v52 }
 0x80f   :  { %v4337_v45 = vand.u32 4294901760, %v4336_v46  ;;  %v4484_v28 = vand.u32 4294901760, %v4465_v33 }
 0x811   :  { %v4338_v41 = vsub.f32 %v4336_v46, %v4337_v45  ;;  %v4485_v0 = vsub.f32 %v4465_v33, %v4484_v28 }
 0x813   :  { %v4339_v48 = vand.u32 4294901760, %v4338_v41  ;;  %v4486_v4 = vand.u32 4294901760, %v4485_v0 }
 0x815   :  { %4340 = vmatmul.f32.vlgmr.msra.gmra.mxu2 %v4339_v48  ;;  %4414 = vmatmul.f32.vlgmr.msrb.gmra.mxu3 %v4337_v45  ;;  %v4487_v16 = vsub.f32 %v4485_v0, %v4486_v4  ;;  %v4650_v45 = vld [vmem:[%s6786_s0 + $0x18] sm:$0xff] }
 0x816   :  { %4539 = vmatmul.f32.vlgmr.msrb.gmra.mxu0 %v4485_v0  ;;  %4563 = vmatmul.f32.vlgmr.msrb.gmra.mxu1 %v4486_v4 }
 0x817   :  { %4483 = vmatpush.msra.mxu2 %v6970_v26  ;;  %4607 = vmatpush.msrb.mxu3 %v6970_v26  ;;  %v4488_v52 = vand.u32 4294901760, %v4487_v16 }
 0x81d   :  { %4390 = vmatmul.f32.vlgmr.msrb.gmra.mxu2 %v4336_v46  ;;  %4515 = vmatmul.f32.vlgmr.msra.gmra.mxu3 %v4484_v28 }
 0x81e   :  { %4585 = vmatpush.msrb.mxu2 %v6994_v15 }
 0x825   :  { %4489 = vmatmul.f32.vlgmr.msra.gmra.mxu2 %v4488_v52  ;;  %4609 = vmatmul.f32.vlgmr.msrb.gmra.mxu3 %v4484_v28 }
 0x82d   :  { %4587 = vmatmul.f32.vlgmr.msrb.gmra.mxu2 %v4484_v28 }
 0x88a   :  { %v4439_v53 = vpop.f32.mrf.mxu0 }
 0x88b   :  { %v4461_v1 = vpop.f32.mrf.mxu1 }
 0x890   :  { %v4367_v18 = vpop.f32.mrf.mxu3 }
 0x893   :  { %v4540_v29 = vpop.f32.mrf.mxu0  ;;  %v4564_v17 = vpop.f32.mrf.mxu1 }
 0x898   :  { %v4341_v27 = vpop.f32.mrf.mxu2  ;;  %v4415_v55 = vpop.f32.mrf.mxu3 }
 0x899   :  { %v4368_v47 = vadd.f32 %v4367_v18, %v4341_v27 }
 0x8a0   :  { %v4391_v62 = vpop.f32.mrf.mxu2  ;;  %v4516_v26 = vpop.f32.mrf.mxu3 }
 0x8a1   :  { %v4392_v7 = vadd.f32 %v4391_v62, %v4368_v47 }
 0x8a3   :  { %v4416_v51 = vadd.f32 %v4415_v55, %v4392_v7 }
 0x8a5   :  { %v4440_v59 = vadd.f32 %v4439_v53, %v4416_v51 }
 0x8a7   :  { %v4462_v40 = vadd.f32 %v4461_v1, %v4440_v59 }
 0x8a8   :  { %v4490_v56 = vpop.f32.mrf.mxu2  ;;  %v4610_v15 = vpop.f32.mrf.mxu3 }
 0x8a9   :  { %v4517_v5 = vadd.f32 %v4516_v26, %v4490_v56  ;;  %v4613_v23 = vperm.slane %v4462_v40, 0 }
 0x8ab   :  { %v4541_v22 = vadd.f32 %v4540_v29, %v4517_v5  ;;  %v4616_v8 = vmul.f32 %v4613_v23, %v6621_v36  ;;  %v4617_v20 = vmul.f32 %v4613_v23, %v6625_v14  ;;  %v4615_v60 = vmul.f32 %v4613_v23, %v6616_v57 }
 0x8ac   :  { %v4614_v12 = vmul.f32 %v4613_v23, %v6619_v39  ;;  %v4618_v36 = vmul.f32 %v4613_v23, %v6639_v49 }
 0x8ad   :  { %v4565_v38 = vadd.f32 %v4564_v17, %v4541_v22 }
 0x8b0   :  { %v4588_v50 = vpop.f32.mrf.mxu2 }
 0x8b1   :  { %v4589_v61 = vadd.f32 %v4588_v50, %v4565_v38 }
 0x8b3   :  { %v4611_v58 = vadd.f32 %v4610_v15, %v4589_v61 }
 0x8b5   :  { %v4619_v25 = vperm.slane %v4611_v58, 0 }
 0x8b7   :  { %v4622_v21 = vadd.f32 %v4619_v25, %v4616_v8  ;;  %v4623_v2 = vadd.f32 %v4619_v25, %v4617_v20  ;;  %v4621_v35 = vadd.f32 %v4619_v25, %v4615_v60  ;;  %v4620_v11 = vadd.f32 %v4619_v25, %v4614_v12 }
 0x8b8   :  { %v4624_v39 = vadd.f32 %v4619_v25, %v4618_v36 }
 0x8b9   :  { %v4654_v43 = vrot.slane %v4622_v21, 3  ;;  %v4655_v44 = vrot.slane %v4623_v2, 3  ;;  %v4632_v24 = vrot.slane %v4621_v35, 1  ;;  %v4634_v30 = vrot.slane %v4622_v21, 1 }
 0x8ba   :  { %v4631_v54 = vrot.slane %v4620_v11, 1  ;;  %v4657_v37 = vrot.slane %v4624_v39, 3 }
 0x8bb   :  { %v4656_v32 = vsel %vm4653_vm12, %v4654_v43, %v4655_v44  ;;  %v4635_v14 = vsel %vm4630_vm13, %v4632_v24, %v4634_v30 }
 0x8bc   :  { %4659 = vrot.lane.b32.xlu0 %v4656_v32, %s4732_s5  ;;  %4638 = vrot.lane.b32.xlu2 %v4635_v14, %s4732_s5  ;;  %v4633_v57 = vsel %vm4630_vm13, %v4631_v54, %v4632_v24  ;;  %v4658_v42 = vsel %vm4653_vm12, %v4655_v44, %v4657_v37 }
 0x8bd   :  { %4636 = vrot.lane.b32.xlu1 %v4633_v57, %s4732_s5 }
 0x8c5   :  { %4661 = vrot.lane.b32.xlu1 %v4658_v42, %s4732_s5 }
 0x916   :  { %v4639_v13 = vpop.permute.xlu2 %4638 }
 0x917   :  { %v4643_v19 = vadd.f32 %v4639_v13, %v4626_v63 }
 0x919   :  { %v4645_v49 = vmax.f32 %v4643_v19, 0.0 }
 0x91b   :  { %4648 = vst.msk [vmem:[#allocation3 + $0x8] sm:$0xff] %vm4646_vm14, %v4645_v49 }
 0x92e   :  { %v4660_v31 = vpop.permute.xlu0 %4659 }
 0x92f   :  { %v4665_v10 = vadd.f32 %v4660_v31, %v4649_v9  ;;  %v4637_v6 = vpop.permute.xlu1 %4636 }
 0x930   :  { %v4642_v34 = vadd.f32 %v4637_v6, %v4625_v3 }
 0x931   :  { %v4667_v46 = vmax.f32 %v4665_v10, 0.0 }
 0x932   :  { %v4644_v33 = vmax.f32 %v4642_v34, 0.0 }
 0x933   :  { %4669 = vst.msk [vmem:[#allocation3 + $0x10] sm:$0xff] %vm4646_vm14, %v4667_v46 }
 0x934   :  { %4647 = vst.msk [vmem:[#allocation3] sm:$0xff] %vm4646_vm14, %v4644_v33 }
 0x937   :  { %v4662_v28 = vpop.permute.xlu1 %4661 }
 0x938   :  { %v4666_v41 = vadd.f32 %v4662_v28, %v4650_v45 }
 0x93a   :  { %v4668_v0 = vmax.f32 %v4666_v41, 0.0 }
 0x93c   :  { %4670 = vst.msk [vmem:[#allocation3 + $0x18] sm:$0xff] %vm4646_vm14, %v4668_v0 }
 0x93d   :  { %4683 = dma.vmem_to_hbm [thread:$0]  %s4676_s15, 512, %s4678_s17, [#allocation4], %s4734_s18, %s4734_s18, %s4735_s19  }
 0x93e   :  { %4727 = dma.done.wait [#allocation4], 512  }
 0x93f   :  { %4728 = vsyncadd [#allocation4], 4294966784 }
 0x940   :  { %4688 = vsyncpa [#allocation4], 1 }

</bundles_post_ra>
